<compile_context>
chip_gen: v7x
topology: tpu7x:2x2x1
jax: 0.10.0
libtpu: 0.0.40
codegen_flags: <defaults>
</compile_context>

<pallas_src>
import functools

import jax
import jax.numpy as jnp
from jax.experimental import pallas as pl
from jax.experimental.pallas import tpu as pltpu

BN_EPS = 1e-5
LRELU_SLOPE = 0.2


def _round_up(x, m):
    return ((x + m - 1) // m) * m


def _slab_offsets(hidden_dims):
    """Static offsets of [b | gamma | beta] per hidden layer inside the slab."""
    offs = []
    off = 0
    for n in hidden_dims:
        offs.append(off)
        off += 3 * n
    return offs, off  # (per-layer offsets, offset of the final-layer bias)


# ---------------------------------------------------------------------------
# Fused Pallas kernel: whole generator MLP in one body
# ---------------------------------------------------------------------------
def generator_pallas(z, w_list, vec, bn_batch):
    """z: [G*B, latent] f32; w_list: 5 bf16 weight matrices; vec: [1, T] f32 slab."""
    B_total, latent = z.shape
    assert B_total % bn_batch == 0
    G = B_total // bn_batch
    B = bn_batch

    k_pad = int(w_list[0].shape[0])
    hidden_dims = [int(w.shape[1]) for w in w_list[:-1]]
    n_out_pad = int(w_list[-1].shape[1])
    offs, b5_off = _slab_offsets(hidden_dims)
    total = b5_off + n_out_pad
    assert vec.shape == (1, total), vec.shape

    inv_b = 1.0 / B

    def kernel(z_ref, w1_ref, w2_ref, w3_ref, w4_ref, w5_ref, vec_ref,
               o_ref, zpad_ref):
        # Zero-pad z [B, latent] -> [B, k_pad] inside VMEM (no wrapper pad op).
        zpad_ref[...] = jnp.zeros_like(zpad_ref)
        zpad_ref[:, :latent] = z_ref[...]
        h = zpad_ref[...].astype(jnp.bfloat16)

        def hidden(h_bf16, w_ref, off, n):
            # Linear: bf16 x bf16 on the MXU, f32 accumulation.
            y = jnp.dot(h_bf16, w_ref[...], preferred_element_type=jnp.float32)
            b = vec_ref[:, off:off + n]
            gamma = vec_ref[:, off + n:off + 2 * n]
            beta = vec_ref[:, off + 2 * n:off + 3 * n]
            y = y + b
            # BatchNorm1d (training mode), single-pass stats in f32.
            mean = jnp.sum(y, axis=0, keepdims=True) * inv_b
            ex2 = jnp.sum(y * y, axis=0, keepdims=True) * inv_b
            var = ex2 - mean * mean                      # biased variance
            scale = gamma * jax.lax.rsqrt(var + BN_EPS)
            shift = beta - mean * scale
            y = y * scale + shift                        # one FMA normalization
            # LeakyReLU(0.2), then back to bf16 for the next MXU matmul.
            y = jnp.where(y > 0, y, LRELU_SLOPE * y)
            return y.astype(jnp.bfloat16)

        for w_ref, off, n in zip((w1_ref, w2_ref, w3_ref, w4_ref),
                                 offs, hidden_dims):
            h = hidden(h, w_ref, off, n)

        # Final Linear + Tanh, f32 output (lane-dense: n_out_pad % 128 == 0).
        y = jnp.dot(h, w5_ref[...], preferred_element_type=jnp.float32)
        o_ref[...] = jnp.tanh(y + vec_ref[:, b5_off:b5_off + n_out_pad])

    # BlockSpecs: z / output are blocked over the BN-batch grid axis; weights
    # and the vector slab are pinned to block (0, 0) so they stay resident.
    in_specs = [pl.BlockSpec((B, latent), lambda g: (g, 0))]
    for w in w_list:
        shp = tuple(int(d) for d in w.shape)
        in_specs.append(pl.BlockSpec(shp, lambda g: (0, 0)))
    in_specs.append(pl.BlockSpec((1, total), lambda g: (0, 0)))
    out_spec = pl.BlockSpec((B, n_out_pad), lambda g: (g, 0))

    # Advisory cost estimate (latency-bound kernel; helps XLA scheduling).
    k_dims = [k_pad] + hidden_dims
    n_dims = hidden_dims + [n_out_pad]
    flops = 2 * B_total * sum(k * n for k, n in zip(k_dims, n_dims))
    transcend = B_total * n_out_pad + G * sum(hidden_dims)
    bytes_acc = (sum(w.size * w.dtype.itemsize for w in w_list)
                 + vec.size * vec.dtype.itemsize
                 + z.size * z.dtype.itemsize
                 + B_total * n_out_pad * 4)

    return pl.pallas_call(
        kernel,
        out_shape=jax.ShapeDtypeStruct((B_total, n_out_pad), jnp.float32),
        grid_spec=pltpu.PrefetchScalarGridSpec(
            num_scalar_prefetch=0,
            grid=(G,),
            in_specs=in_specs,
            out_specs=out_spec,
            scratch_shapes=[pltpu.VMEM((B, k_pad), jnp.float32)],
        ),
        compiler_params=pltpu.CompilerParams(
            dimension_semantics=("parallel",),
            vmem_limit_bytes=32 * 1024 * 1024,
        ),
        cost_estimate=pl.CostEstimate(
            flops=int(flops),
            transcendentals=int(transcend),
            bytes_accessed=int(bytes_acc),
        ),
    )(z, *w_list, vec)


# ---------------------------------------------------------------------------
# Parameter construction (PyTorch nn.Linear-style init) + preparation
# ---------------------------------------------------------------------------
def init_generator_params(key, latent_dim, image_size, output_channel):
    dims = [latent_dim, 128, 256, 512, 1024,
            output_channel * image_size * image_size]
    params = []
    for i in range(len(dims) - 1):
        fan_in, fan_out = dims[i], dims[i + 1]
        key, kw, kb = jax.random.split(key, 3)
        bound = 1.0 / jnp.sqrt(fan_in)
        w = jax.random.uniform(kw, (fan_in, fan_out), jnp.float32, -bound, bound)
        b = jax.random.uniform(kb, (1, fan_out), jnp.float32, -bound, bound)
        layer = {"w": w, "b": b}
        if i < len(dims) - 2:  # hidden layers have BatchNorm1d
            layer["gamma"] = jnp.ones((1, fan_out), jnp.float32)
            layer["beta"] = jnp.zeros((1, fan_out), jnp.float32)
        params.append(layer)
    return params


def prepare_params(params, latent_dim):
    """bf16 weights (K of first layer / N of last layer zero-padded to 128
    multiples) + one f32 slab packing every small per-layer vector."""
    k_pad = _round_up(latent_dim, 128)
    n_out = int(params[-1]["w"].shape[1])
    n_pad = _round_up(n_out, 128)

    w_list = [jnp.pad(params[0]["w"],
                      ((0, k_pad - latent_dim), (0, 0))).astype(jnp.bfloat16)]
    for layer in params[1:-1]:
        w_list.append(layer["w"].astype(jnp.bfloat16))
    w_list.append(jnp.pad(params[-1]["w"],
                          ((0, 0), (0, n_pad - n_out))).astype(jnp.bfloat16))

    pieces = []
    for layer in params[:-1]:
        pieces += [layer["b"], layer["gamma"], layer["beta"]]
    pieces.append(jnp.pad(params[-1]["b"], ((0, 0), (0, n_pad - n_out))))
    vec = jnp.concatenate(pieces, axis=1).astype(jnp.float32)
    return w_list, vec


# ---------------------------------------------------------------------------
# Forward (single pallas_call) + matched pure-JAX reference
# ---------------------------------------------------------------------------
@functools.partial(jax.jit,
                   static_argnames=("latent_dim", "image_size",
                                    "output_channel", "bn_batch"))
def generator_forward(z, w_list, vec, *, latent_dim, image_size,
                      output_channel, bn_batch=None):
    B_total = z.shape[0]
    bsz = B_total if bn_batch is None else bn_batch
    out = generator_pallas(z, w_list, vec, bsz)
    n_out = output_channel * image_size * image_size
    img = out[:, :n_out]
    return img.reshape(B_total, output_channel, image_size, image_size)  # .view


def generator_reference(z, w_list, vec, latent_dim, image_size,
                        output_channel, bn_batch=None):
    """Pure-JAX reference performing the identical (bf16-weight) computation."""
    B_total = z.shape[0]
    bsz = B_total if bn_batch is None else bn_batch
    G = B_total // bsz
    k_pad = int(w_list[0].shape[0])
    hidden_dims = [int(w.shape[1]) for w in w_list[:-1]]
    n_out_pad = int(w_list[-1].shape[1])
    offs, b5_off = _slab_offsets(hidden_dims)

    outs = []
    for g in range(G):
        zg = z[g * bsz:(g + 1) * bsz]
        h = jnp.pad(zg, ((0, 0), (0, k_pad - latent_dim))).astype(jnp.bfloat16)
        for w, off, n in zip(w_list[:-1], offs, hidden_dims):
            y = jnp.dot(h, w, preferred_element_type=jnp.float32)
            b = vec[:, off:off + n]
            gamma = vec[:, off + n:off + 2 * n]
            beta = vec[:, off + 2 * n:off + 3 * n]
            y = y + b
            mean = jnp.sum(y, axis=0, keepdims=True) / bsz
            ex2 = jnp.sum(y * y, axis=0, keepdims=True) / bsz
            var = ex2 - mean * mean
            scale = gamma * jax.lax.rsqrt(var + BN_EPS)
            shift = beta - mean * scale
            y = y * scale + shift
            h = jnp.where(y > 0, y, LRELU_SLOPE * y).astype(jnp.bfloat16)
        y = jnp.tanh(jnp.dot(h, w_list[-1], preferred_element_type=jnp.float32)
                     + vec[:, b5_off:b5_off + n_out_pad])
        outs.append(y)
    out = jnp.concatenate(outs, axis=0)
    n_out = output_channel * image_size * image_size
    return out[:, :n_out].reshape(B_total, output_channel, image_size, image_size)


if __name__ == "__main__":
    # Small shapes consistent with the module (BatchNorm needs batch > 1).
    BATCH = 8
    LATENT_DIM = 100
    IMAGE_SIZE = 16
    OUTPUT_CHANNEL = 3

    key = jax.random.PRNGKey(0)
    key, zkey, z2key = jax.random.split(key, 3)
    z = jax.random.normal(zkey, (BATCH, LATENT_DIM), jnp.float32)

    params = init_generator_params(key, LATENT_DIM, IMAGE_SIZE, OUTPUT_CHANNEL)
    w_list, vec = prepare_params(params, LATENT_DIM)

    # --- Single BN batch: exact module semantics (grid G = 1) ---
    img = generator_forward(z, w_list, vec, latent_dim=LATENT_DIM,
                            image_size=IMAGE_SIZE, output_channel=OUTPUT_CHANNEL)
    img = jax.block_until_ready(img)
    assert img.shape == (BATCH, OUTPUT_CHANNEL, IMAGE_SIZE, IMAGE_SIZE), img.shape

    ref = generator_reference(z, w_list, vec, LATENT_DIM, IMAGE_SIZE,
                              OUTPUT_CHANNEL)
    err = float(jnp.max(jnp.abs(img - ref)))
    assert jnp.allclose(img, ref, atol=1e-2, rtol=1e-2), err

    # --- Two independent BN batches in one call (weight-DMA amortization) ---
    z2 = jax.random.normal(z2key, (2 * BATCH, LATENT_DIM), jnp.float32)
    img2 = generator_forward(z2, w_list, vec, latent_dim=LATENT_DIM,
                             image_size=IMAGE_SIZE, output_channel=OUTPUT_CHANNEL,
                             bn_batch=BATCH)
    img2 = jax.block_until_ready(img2)
    ref2 = generator_reference(z2, w_list, vec, LATENT_DIM, IMAGE_SIZE,
                               OUTPUT_CHANNEL, bn_batch=BATCH)
    err2 = float(jnp.max(jnp.abs(img2 - ref2)))
    assert jnp.allclose(img2, ref2, atol=1e-2, rtol=1e-2), err2

    print("KERNEL_OK")
</pallas_src>

<mosaic_0001>
module attributes {stable_mosaic.version = 11 : i64} {
  func.func @kernel(%arg0: i32, %arg1: memref<8x100xf32, #tpu.memory_space<vmem>>, %arg2: memref<128x128xbf16, #tpu.memory_space<vmem>>, %arg3: memref<128x256xbf16, #tpu.memory_space<vmem>>, %arg4: memref<256x512xbf16, #tpu.memory_space<vmem>>, %arg5: memref<512x1024xbf16, #tpu.memory_space<vmem>>, %arg6: memref<1024x768xbf16, #tpu.memory_space<vmem>>, %arg7: memref<1x6528xf32, #tpu.memory_space<vmem>>, %arg8: memref<8x768xf32, #tpu.memory_space<vmem>>, %arg9: memref<8x128xf32, #tpu.memory_space<vmem>>) attributes {dimension_semantics = [#tpu.dimension_semantics<parallel>], iteration_bounds = array<i64: 1>, scalar_prefetch = 0 : i64, scratch_operands = 1 : i64, tpu.core_type = #tpu.core_type<tc>, window_params = [{transform_indices = @transform_0, window_bounds = array<i64: 8, 100>}, {pipeline_mode = #tpu.pipeline_mode<synchronous>, transform_indices = @transform_1, window_bounds = array<i64: 128, 128>}, {pipeline_mode = #tpu.pipeline_mode<synchronous>, transform_indices = @transform_2, window_bounds = array<i64: 128, 256>}, {pipeline_mode = #tpu.pipeline_mode<synchronous>, transform_indices = @transform_3, window_bounds = array<i64: 256, 512>}, {pipeline_mode = #tpu.pipeline_mode<synchronous>, transform_indices = @transform_4, window_bounds = array<i64: 512, 1024>}, {pipeline_mode = #tpu.pipeline_mode<synchronous>, transform_indices = @transform_5, window_bounds = array<i64: 1024, 768>}, {pipeline_mode = #tpu.pipeline_mode<synchronous>, transform_indices = @transform_6, window_bounds = array<i64: 1, 6528>}, {transform_indices = @transform_7, window_bounds = array<i64: 8, 768>}]} {
    %cst = arith.constant 0.000000e+00 : f32
    %0 = vector.broadcast %cst : f32 to vector<8x128xf32>
    %c0 = arith.constant 0 : index
    %c0_0 = arith.constant 0 : index
    %1 = vector.load %arg9[%c0, %c0_0] : memref<8x128xf32, #tpu.memory_space<vmem>>, vector<8x128xf32>
    tpu.vector_store %arg9[%c0, %c0_0], %0 {strides = array<i32>} : memref<8x128xf32, #tpu.memory_space<vmem>>, vector<8x128xf32>,
    %c0_1 = arith.constant 0 : index
    %c0_2 = arith.constant 0 : index
    %2 = vector.load %arg1[%c0_1, %c0_2] : memref<8x100xf32, #tpu.memory_space<vmem>>, vector<8x100xf32>
    %c0_3 = arith.constant 0 : index
    %c0_4 = arith.constant 0 : index
    %3 = vector.load %arg9[%c0_3, %c0_4] : memref<8x128xf32, #tpu.memory_space<vmem>>, vector<8x100xf32>
    tpu.vector_store %arg9[%c0_3, %c0_4], %2 {strides = array<i32>} : memref<8x128xf32, #tpu.memory_space<vmem>>, vector<8x100xf32>,
    %c0_5 = arith.constant 0 : index
    %c0_6 = arith.constant 0 : index
    %4 = vector.load %arg9[%c0_5, %c0_6] : memref<8x128xf32, #tpu.memory_space<vmem>>, vector<8x128xf32>
    %5 = arith.truncf %4 : vector<8x128xf32> to vector<8x128xbf16>
    %c0_7 = arith.constant 0 : index
    %c0_8 = arith.constant 0 : index
    %6 = vector.load %arg2[%c0_7, %c0_8] : memref<128x128xbf16, #tpu.memory_space<vmem>>, vector<128x128xbf16>
    %cst_9 = arith.constant dense<0.000000e+00> : vector<8x128xf32>
    %7 = tpu.matmul %5, %6, %cst_9 {dimension_numbers = #tpu.dot_dimension_numbers<[1], [0], [0], [1], [0, 0, 1, 1], [], []>} : vector<8x128xbf16>, vector<128x128xbf16>, vector<8x128xf32> -> vector<8x128xf32>
    %c0_10 = arith.constant 0 : index
    %c0_11 = arith.constant 0 : index
    %8 = vector.load %arg7[%c0_10, %c0_11] : memref<1x6528xf32, #tpu.memory_space<vmem>>, vector<1x128xf32>
    %c0_12 = arith.constant 0 : index
    %c128 = arith.constant 128 : index
    %9 = vector.load %arg7[%c0_12, %c128] : memref<1x6528xf32, #tpu.memory_space<vmem>>, vector<1x128xf32>
    %c0_13 = arith.constant 0 : index
    %c256 = arith.constant 256 : index
    %10 = vector.load %arg7[%c0_13, %c256] : memref<1x6528xf32, #tpu.memory_space<vmem>>, vector<1x128xf32>
    %11 = vector.broadcast %8 : vector<1x128xf32> to vector<8x128xf32>
    %12 = arith.addf %7, %11 : vector<8x128xf32>
    %cst_14 = arith.constant dense<0.000000e+00> : vector<128xf32>
    %13 = vector.multi_reduction <add>, %12, %cst_14 [0] : vector<8x128xf32> to vector<128xf32>
    %14 = vector.shape_cast %13 : vector<128xf32> to vector<1x128xf32>
    %cst_15 = arith.constant 1.250000e-01 : f32
    %15 = vector.broadcast %cst_15 : f32 to vector<1x128xf32>
    %16 = arith.mulf %14, %15 : vector<1x128xf32>
    %17 = arith.mulf %12, %12 : vector<8x128xf32>
    %cst_16 = arith.constant dense<0.000000e+00> : vector<128xf32>
    %18 = vector.multi_reduction <add>, %17, %cst_16 [0] : vector<8x128xf32> to vector<128xf32>
    %19 = vector.shape_cast %18 : vector<128xf32> to vector<1x128xf32>
    %cst_17 = arith.constant 1.250000e-01 : f32
    %20 = vector.broadcast %cst_17 : f32 to vector<1x128xf32>
    %21 = arith.mulf %19, %20 : vector<1x128xf32>
    %22 = arith.mulf %16, %16 : vector<1x128xf32>
    %23 = arith.subf %21, %22 : vector<1x128xf32>
    %cst_18 = arith.constant 9.99999974E-6 : f32
    %24 = vector.broadcast %cst_18 : f32 to vector<1x128xf32>
    %25 = arith.addf %23, %24 : vector<1x128xf32>
    %26 = math.rsqrt %25 : vector<1x128xf32>
    %27 = arith.mulf %9, %26 : vector<1x128xf32>
    %28 = arith.mulf %16, %27 : vector<1x128xf32>
    %29 = arith.subf %10, %28 : vector<1x128xf32>
    %30 = vector.broadcast %27 : vector<1x128xf32> to vector<8x128xf32>
    %31 = arith.mulf %12, %30 : vector<8x128xf32>
    %32 = vector.broadcast %29 : vector<1x128xf32> to vector<8x128xf32>
    %33 = arith.addf %31, %32 : vector<8x128xf32>
    %cst_19 = arith.constant 0.000000e+00 : f32
    %34 = vector.broadcast %cst_19 : f32 to vector<8x128xf32>
    %35 = arith.cmpf ogt, %33, %34 : vector<8x128xf32>
    %cst_20 = arith.constant 2.000000e-01 : f32
    %36 = vector.broadcast %cst_20 : f32 to vector<8x128xf32>
    %37 = arith.mulf %36, %33 : vector<8x128xf32>
    %38 = arith.select %35, %33, %37 : vector<8x128xi1>, vector<8x128xf32>
    %39 = arith.truncf %38 : vector<8x128xf32> to vector<8x128xbf16>
    %c0_21 = arith.constant 0 : index
    %c0_22 = arith.constant 0 : index
    %40 = vector.load %arg3[%c0_21, %c0_22] : memref<128x256xbf16, #tpu.memory_space<vmem>>, vector<128x256xbf16>
    %cst_23 = arith.constant dense<0.000000e+00> : vector<8x256xf32>
    %41 = tpu.matmul %39, %40, %cst_23 {dimension_numbers = #tpu.dot_dimension_numbers<[1], [0], [0], [1], [0, 0, 1, 1], [], []>} : vector<8x128xbf16>, vector<128x256xbf16>, vector<8x256xf32> -> vector<8x256xf32>
    %c0_24 = arith.constant 0 : index
    %c384 = arith.constant 384 : index
    %42 = vector.load %arg7[%c0_24, %c384] : memref<1x6528xf32, #tpu.memory_space<vmem>>, vector<1x256xf32>
    %c0_25 = arith.constant 0 : index
    %c640 = arith.constant 640 : index
    %43 = vector.load %arg7[%c0_25, %c640] : memref<1x6528xf32, #tpu.memory_space<vmem>>, vector<1x256xf32>
    %c0_26 = arith.constant 0 : index
    %c896 = arith.constant 896 : index
    %44 = vector.load %arg7[%c0_26, %c896] : memref<1x6528xf32, #tpu.memory_space<vmem>>, vector<1x256xf32>
    %45 = vector.broadcast %42 : vector<1x256xf32> to vector<8x256xf32>
    %46 = arith.addf %41, %45 : vector<8x256xf32>
    %cst_27 = arith.constant dense<0.000000e+00> : vector<256xf32>
    %47 = vector.multi_reduction <add>, %46, %cst_27 [0] : vector<8x256xf32> to vector<256xf32>
    %48 = vector.shape_cast %47 : vector<256xf32> to vector<1x256xf32>
    %cst_28 = arith.constant 1.250000e-01 : f32
    %49 = vector.broadcast %cst_28 : f32 to vector<1x256xf32>
    %50 = arith.mulf %48, %49 : vector<1x256xf32>
    %51 = arith.mulf %46, %46 : vector<8x256xf32>
    %cst_29 = arith.constant dense<0.000000e+00> : vector<256xf32>
    %52 = vector.multi_reduction <add>, %51, %cst_29 [0] : vector<8x256xf32> to vector<256xf32>
    %53 = vector.shape_cast %52 : vector<256xf32> to vector<1x256xf32>
    %cst_30 = arith.constant 1.250000e-01 : f32
    %54 = vector.broadcast %cst_30 : f32 to vector<1x256xf32>
    %55 = arith.mulf %53, %54 : vector<1x256xf32>
    %56 = arith.mulf %50, %50 : vector<1x256xf32>
    %57 = arith.subf %55, %56 : vector<1x256xf32>
    %cst_31 = arith.constant 9.99999974E-6 : f32
    %58 = vector.broadcast %cst_31 : f32 to vector<1x256xf32>
    %59 = arith.addf %57, %58 : vector<1x256xf32>
    %60 = math.rsqrt %59 : vector<1x256xf32>
    %61 = arith.mulf %43, %60 : vector<1x256xf32>
    %62 = arith.mulf %50, %61 : vector<1x256xf32>
    %63 = arith.subf %44, %62 : vector<1x256xf32>
    %64 = vector.broadcast %61 : vector<1x256xf32> to vector<8x256xf32>
    %65 = arith.mulf %46, %64 : vector<8x256xf32>
    %66 = vector.broadcast %63 : vector<1x256xf32> to vector<8x256xf32>
    %67 = arith.addf %65, %66 : vector<8x256xf32>
    %cst_32 = arith.constant 0.000000e+00 : f32
    %68 = vector.broadcast %cst_32 : f32 to vector<8x256xf32>
    %69 = arith.cmpf ogt, %67, %68 : vector<8x256xf32>
    %cst_33 = arith.constant 2.000000e-01 : f32
    %70 = vector.broadcast %cst_33 : f32 to vector<8x256xf32>
    %71 = arith.mulf %70, %67 : vector<8x256xf32>
    %72 = arith.select %69, %67, %71 : vector<8x256xi1>, vector<8x256xf32>
    %73 = arith.truncf %72 : vector<8x256xf32> to vector<8x256xbf16>
    %c0_34 = arith.constant 0 : index
    %c0_35 = arith.constant 0 : index
    %74 = vector.load %arg4[%c0_34, %c0_35] : memref<256x512xbf16, #tpu.memory_space<vmem>>, vector<256x512xbf16>
    %cst_36 = arith.constant dense<0.000000e+00> : vector<8x512xf32>
    %75 = tpu.matmul %73, %74, %cst_36 {dimension_numbers = #tpu.dot_dimension_numbers<[1], [0], [0], [1], [0, 0, 1, 1], [], []>} : vector<8x256xbf16>, vector<256x512xbf16>, vector<8x512xf32> -> vector<8x512xf32>
    %c0_37 = arith.constant 0 : index
    %c1152 = arith.constant 1152 : index
    %76 = vector.load %arg7[%c0_37, %c1152] : memref<1x6528xf32, #tpu.memory_space<vmem>>, vector<1x512xf32>
    %c0_38 = arith.constant 0 : index
    %c1664 = arith.constant 1664 : index
    %77 = vector.load %arg7[%c0_38, %c1664] : memref<1x6528xf32, #tpu.memory_space<vmem>>, vector<1x512xf32>
    %c0_39 = arith.constant 0 : index
    %c2176 = arith.constant 2176 : index
    %78 = vector.load %arg7[%c0_39, %c2176] : memref<1x6528xf32, #tpu.memory_space<vmem>>, vector<1x512xf32>
    %79 = vector.broadcast %76 : vector<1x512xf32> to vector<8x512xf32>
    %80 = arith.addf %75, %79 : vector<8x512xf32>
    %cst_40 = arith.constant dense<0.000000e+00> : vector<512xf32>
    %81 = vector.multi_reduction <add>, %80, %cst_40 [0] : vector<8x512xf32> to vector<512xf32>
    %82 = vector.shape_cast %81 : vector<512xf32> to vector<1x512xf32>
    %cst_41 = arith.constant 1.250000e-01 : f32
    %83 = vector.broadcast %cst_41 : f32 to vector<1x512xf32>
    %84 = arith.mulf %82, %83 : vector<1x512xf32>
    %85 = arith.mulf %80, %80 : vector<8x512xf32>
    %cst_42 = arith.constant dense<0.000000e+00> : vector<512xf32>
    %86 = vector.multi_reduction <add>, %85, %cst_42 [0] : vector<8x512xf32> to vector<512xf32>
    %87 = vector.shape_cast %86 : vector<512xf32> to vector<1x512xf32>
    %cst_43 = arith.constant 1.250000e-01 : f32
    %88 = vector.broadcast %cst_43 : f32 to vector<1x512xf32>
    %89 = arith.mulf %87, %88 : vector<1x512xf32>
    %90 = arith.mulf %84, %84 : vector<1x512xf32>
    %91 = arith.subf %89, %90 : vector<1x512xf32>
    %cst_44 = arith.constant 9.99999974E-6 : f32
    %92 = vector.broadcast %cst_44 : f32 to vector<1x512xf32>
    %93 = arith.addf %91, %92 : vector<1x512xf32>
    %94 = math.rsqrt %93 : vector<1x512xf32>
    %95 = arith.mulf %77, %94 : vector<1x512xf32>
    %96 = arith.mulf %84, %95 : vector<1x512xf32>
    %97 = arith.subf %78, %96 : vector<1x512xf32>
    %98 = vector.broadcast %95 : vector<1x512xf32> to vector<8x512xf32>
    %99 = arith.mulf %80, %98 : vector<8x512xf32>
    %100 = vector.broadcast %97 : vector<1x512xf32> to vector<8x512xf32>
    %101 = arith.addf %99, %100 : vector<8x512xf32>
    %cst_45 = arith.constant 0.000000e+00 : f32
    %102 = vector.broadcast %cst_45 : f32 to vector<8x512xf32>
    %103 = arith.cmpf ogt, %101, %102 : vector<8x512xf32>
    %cst_46 = arith.constant 2.000000e-01 : f32
    %104 = vector.broadcast %cst_46 : f32 to vector<8x512xf32>
    %105 = arith.mulf %104, %101 : vector<8x512xf32>
    %106 = arith.select %103, %101, %105 : vector<8x512xi1>, vector<8x512xf32>
    %107 = arith.truncf %106 : vector<8x512xf32> to vector<8x512xbf16>
    %c0_47 = arith.constant 0 : index
    %c0_48 = arith.constant 0 : index
    %108 = vector.load %arg5[%c0_47, %c0_48] : memref<512x1024xbf16, #tpu.memory_space<vmem>>, vector<512x1024xbf16>
    %cst_49 = arith.constant dense<0.000000e+00> : vector<8x1024xf32>
    %109 = tpu.matmul %107, %108, %cst_49 {dimension_numbers = #tpu.dot_dimension_numbers<[1], [0], [0], [1], [0, 0, 1, 1], [], []>} : vector<8x512xbf16>, vector<512x1024xbf16>, vector<8x1024xf32> -> vector<8x1024xf32>
    %c0_50 = arith.constant 0 : index
    %c2688 = arith.constant 2688 : index
    %110 = vector.load %arg7[%c0_50, %c2688] : memref<1x6528xf32, #tpu.memory_space<vmem>>, vector<1x1024xf32>
    %c0_51 = arith.constant 0 : index
    %c3712 = arith.constant 3712 : index
    %111 = vector.load %arg7[%c0_51, %c3712] : memref<1x6528xf32, #tpu.memory_space<vmem>>, vector<1x1024xf32>
    %c0_52 = arith.constant 0 : index
    %c4736 = arith.constant 4736 : index
    %112 = vector.load %arg7[%c0_52, %c4736] : memref<1x6528xf32, #tpu.memory_space<vmem>>, vector<1x1024xf32>
    %113 = vector.broadcast %110 : vector<1x1024xf32> to vector<8x1024xf32>
    %114 = arith.addf %109, %113 : vector<8x1024xf32>
    %cst_53 = arith.constant dense<0.000000e+00> : vector<1024xf32>
    %115 = vector.multi_reduction <add>, %114, %cst_53 [0] : vector<8x1024xf32> to vector<1024xf32>
    %116 = vector.shape_cast %115 : vector<1024xf32> to vector<1x1024xf32>
    %cst_54 = arith.constant 1.250000e-01 : f32
    %117 = vector.broadcast %cst_54 : f32 to vector<1x1024xf32>
    %118 = arith.mulf %116, %117 : vector<1x1024xf32>
    %119 = arith.mulf %114, %114 : vector<8x1024xf32>
    %cst_55 = arith.constant dense<0.000000e+00> : vector<1024xf32>
    %120 = vector.multi_reduction <add>, %119, %cst_55 [0] : vector<8x1024xf32> to vector<1024xf32>
    %121 = vector.shape_cast %120 : vector<1024xf32> to vector<1x1024xf32>
    %cst_56 = arith.constant 1.250000e-01 : f32
    %122 = vector.broadcast %cst_56 : f32 to vector<1x1024xf32>
    %123 = arith.mulf %121, %122 : vector<1x1024xf32>
    %124 = arith.mulf %118, %118 : vector<1x1024xf32>
    %125 = arith.subf %123, %124 : vector<1x1024xf32>
    %cst_57 = arith.constant 9.99999974E-6 : f32
    %126 = vector.broadcast %cst_57 : f32 to vector<1x1024xf32>
    %127 = arith.addf %125, %126 : vector<1x1024xf32>
    %128 = math.rsqrt %127 : vector<1x1024xf32>
    %129 = arith.mulf %111, %128 : vector<1x1024xf32>
    %130 = arith.mulf %118, %129 : vector<1x1024xf32>
    %131 = arith.subf %112, %130 : vector<1x1024xf32>
    %132 = vector.broadcast %129 : vector<1x1024xf32> to vector<8x1024xf32>
    %133 = arith.mulf %114, %132 : vector<8x1024xf32>
    %134 = vector.broadcast %131 : vector<1x1024xf32> to vector<8x1024xf32>
    %135 = arith.addf %133, %134 : vector<8x1024xf32>
    %cst_58 = arith.constant 0.000000e+00 : f32
    %136 = vector.broadcast %cst_58 : f32 to vector<8x1024xf32>
    %137 = arith.cmpf ogt, %135, %136 : vector<8x1024xf32>
    %cst_59 = arith.constant 2.000000e-01 : f32
    %138 = vector.broadcast %cst_59 : f32 to vector<8x1024xf32>
    %139 = arith.mulf %138, %135 : vector<8x1024xf32>
    %140 = arith.select %137, %135, %139 : vector<8x1024xi1>, vector<8x1024xf32>
    %141 = arith.truncf %140 : vector<8x1024xf32> to vector<8x1024xbf16>
    %c0_60 = arith.constant 0 : index
    %c0_61 = arith.constant 0 : index
    %142 = vector.load %arg6[%c0_60, %c0_61] : memref<1024x768xbf16, #tpu.memory_space<vmem>>, vector<1024x768xbf16>
    %cst_62 = arith.constant dense<0.000000e+00> : vector<8x768xf32>
    %143 = tpu.matmul %141, %142, %cst_62 {dimension_numbers = #tpu.dot_dimension_numbers<[1], [0], [0], [1], [0, 0, 1, 1], [], []>} : vector<8x1024xbf16>, vector<1024x768xbf16>, vector<8x768xf32> -> vector<8x768xf32>
    %c0_63 = arith.constant 0 : index
    %c5760 = arith.constant 5760 : index
    %144 = vector.load %arg7[%c0_63, %c5760] : memref<1x6528xf32, #tpu.memory_space<vmem>>, vector<1x768xf32>
    %145 = vector.broadcast %144 : vector<1x768xf32> to vector<8x768xf32>
    %146 = arith.addf %143, %145 : vector<8x768xf32>
    %147 = math.tanh %146 : vector<8x768xf32>
    %c0_64 = arith.constant 0 : index
    %c0_65 = arith.constant 0 : index
    %148 = vector.load %arg8[%c0_64, %c0_65] : memref<8x768xf32, #tpu.memory_space<vmem>>, vector<8x768xf32>
    tpu.vector_store %arg8[%c0_64, %c0_65], %147 {strides = array<i32>} : memref<8x768xf32, #tpu.memory_space<vmem>>, vector<8x768xf32>,
    return
  }
  func.func @transform_0(%arg0: i32) -> (i32, i32) {
    %c0_i32 = arith.constant 0 : i32
    %c0_i32_0 = arith.constant 0 : i32
    return %arg0, %c0_i32 : i32, i32
  }
  func.func @transform_1(%arg0: i32) -> (i32, i32) {
    %c0_i32 = arith.constant 0 : i32
    %c0_i32_0 = arith.constant 0 : i32
    %c0_i32_1 = arith.constant 0 : i32
    return %c0_i32, %c0_i32_0 : i32, i32
  }
  func.func @transform_2(%arg0: i32) -> (i32, i32) {
    %c0_i32 = arith.constant 0 : i32
    %c0_i32_0 = arith.constant 0 : i32
    %c0_i32_1 = arith.constant 0 : i32
    return %c0_i32, %c0_i32_0 : i32, i32
  }
  func.func @transform_3(%arg0: i32) -> (i32, i32) {
    %c0_i32 = arith.constant 0 : i32
    %c0_i32_0 = arith.constant 0 : i32
    %c0_i32_1 = arith.constant 0 : i32
    return %c0_i32, %c0_i32_0 : i32, i32
  }
  func.func @transform_4(%arg0: i32) -> (i32, i32) {
    %c0_i32 = arith.constant 0 : i32
    %c0_i32_0 = arith.constant 0 : i32
    %c0_i32_1 = arith.constant 0 : i32
    return %c0_i32, %c0_i32_0 : i32, i32
  }
  func.func @transform_5(%arg0: i32) -> (i32, i32) {
    %c0_i32 = arith.constant 0 : i32
    %c0_i32_0 = arith.constant 0 : i32
    %c0_i32_1 = arith.constant 0 : i32
    return %c0_i32, %c0_i32_0 : i32, i32
  }
  func.func @transform_6(%arg0: i32) -> (i32, i32) {
    %c0_i32 = arith.constant 0 : i32
    %c0_i32_0 = arith.constant 0 : i32
    %c0_i32_1 = arith.constant 0 : i32
    return %c0_i32, %c0_i32_0 : i32, i32
  }
  func.func @transform_7(%arg0: i32) -> (i32, i32) {
    %c0_i32 = arith.constant 0 : i32
    %c0_i32_0 = arith.constant 0 : i32
    return %arg0, %c0_i32 : i32, i32
  }
}

</mosaic_0001>

<bundles_post_ra>
// kernel: generator_forward.1
= control target key start
LH: loop header
LB: loop body
LE: loop exit
PB: predicated region body
PF: predicated region fallthrough
CT: control target
= control target key end

     0   :  { %12 = vsyncpa [#allocation4], 0  ;;  %s8695_s0 = inlined_call_operand.hbm [shape: f32[8,100], index: 0, kind: input, shape index: {}]   ;;  %s8696_s1 = inlined_call_operand.hbm [shape: bf16[128,128], index: 1, kind: input, shape index: {}]   ;;  %s8697_s2 = inlined_call_operand.hbm [shape: bf16[128,256], index: 2, kind: input, shape index: {}]   ;;  %s8698_s3 = inlined_call_operand.hbm [shape: bf16[256,512], index: 3, kind: input, shape index: {}]   ;;  %s8699_s4 = inlined_call_operand.hbm [shape: bf16[512,1024], index: 4, kind: input, shape index: {}]   ;;  %s8700_s5 = inlined_call_operand.hbm [shape: bf16[1024,768], index: 5, kind: input, shape index: {}]   ;;  %s8701_s6 = inlined_call_operand.hbm [shape: f32[1,6528], index: 6, kind: input, shape index: {}]   ;;  %s8702_s7 = inlined_call_operand.vmem [shape: f32[8,768], index: 7, kind: output, shape index: {}]  }
   0x1   :  { %13 = vsyncpa [#allocation6], 0 }
   0x2   :  { %14 = vsyncpa [#allocation9], 0 }
   0x3   :  { %15 = vsyncpa [#allocation12], 0  ;;  %s8151_s24 = smov [#allocation5]   ;;  %s7989_s28 = scalar_lea.hbm %s8696_s1, 1024 }
   0x4   :  { %s31_s25 = sshll.u32 %s8151_s24, 4  ;;  %p7990_p0 = scmp.ne.s32.totalorder %s8696_s1, %s7989_s28  ;;  %s32_s25 = int_to_ptr.vmem [resolvable:$true] %s31_s25 }
   0x5   :  { %p7993_p1 = scmp.lt.u32.totalorder %s7989_s28, %s8696_s1 }
   0x7   :  { %p7995_p2 = pnand %p7993_p1, %p7990_p0 }
   0x9   :  { %7998 = shalt.err (!%p7995_p2)
}
   0xa   :  { %s7999_s10 = scalar_lea.vmem %s32_s25, 1024  ;;  %p8004_p4 = scmp.lt.s32.totalorder %s32_s25, %s32_s25 }
   0xb   :  { %p8000_p3 = scmp.ne.s32.totalorder %s32_s25, %s7999_s10  ;;  %p8005_p5 = scmp.lt.s32.totalorder %s7999_s10, %s7999_s10 }
   0xd   :  { %p8006_p6 = por %p8005_p5, %p8004_p4 }
   0xf   :  { %p8007_p7 = pnand %p8006_p6, %p8000_p3 }
  0x11   :  { %8010 = shalt.err (!%p8007_p7)
}
  0x12   :  { %s8152_s11 = smov 64   ;;  %s8153_s12 = smov 4  }
  0x13   :  { %37 = dma.hbm_to_vmem [thread:$0]  %s8696_s1, 1024, %s32_s25, [#allocation6], %s8152_s11, %s8152_s11, %s8153_s12  }
  0x14   :  { %s8154_s15 = smov [#allocation8]   ;;  %s8011_s19 = scalar_lea.hbm %s8698_s3, 8192 }
  0x15   :  { %s55_s16 = sshll.u32 %s8154_s15, 4  ;;  %p8012_p8 = scmp.ne.s32.totalorder %s8698_s3, %s8011_s19  ;;  %s56_s16 = int_to_ptr.vmem [resolvable:$true] %s55_s16 }
  0x16   :  { %p8015_p9 = scmp.lt.u32.totalorder %s8011_s19, %s8698_s3 }
  0x18   :  { %p8017_p10 = pnand %p8015_p9, %p8012_p8 }
  0x1a   :  { %8020 = shalt.err (!%p8017_p10)
}
  0x1b   :  { %s8021_s24 = scalar_lea.vmem %s56_s16, 8192  ;;  %p8026_p12 = scmp.lt.s32.totalorder %s56_s16, %s56_s16 }
  0x1c   :  { %p8022_p11 = scmp.ne.s32.totalorder %s56_s16, %s8021_s24  ;;  %p8027_p13 = scmp.lt.s32.totalorder %s8021_s24, %s8021_s24 }
  0x1e   :  { %p8028_p0 = por %p8027_p13, %p8026_p12 }
  0x20   :  { %p8029_p1 = pnand %p8028_p0, %p8022_p11 }
  0x22   :  { %8032 = shalt.err (!%p8029_p1)
}
  0x23   :  { %s8155_s1 = smov 256   ;;  %s8156_s25 = smov 16  }
  0x24   :  { %61 = dma.hbm_to_vmem [thread:$0]  %s8698_s3, 8192, %s56_s16, [#allocation9], %s8155_s1, %s8155_s1, %s8156_s25  }
  0x25   :  { %s8157_s28 = smov [#allocation11]   ;;  %s8033_s9 = scalar_lea.hbm %s8700_s5, 49152 }
  0x26   :  { %s79_s29 = sshll.u32 %s8157_s28, 4  ;;  %p8034_p2 = scmp.ne.s32.totalorder %s8700_s5, %s8033_s9  ;;  %s80_s29 = int_to_ptr.vmem [resolvable:$true] %s79_s29 }
  0x27   :  { %p8037_p3 = scmp.lt.u32.totalorder %s8033_s9, %s8700_s5 }
  0x29   :  { %p8039_p4 = pnand %p8037_p3, %p8034_p2 }
  0x2b   :  { %8042 = shalt.err (!%p8039_p4)
}
  0x2c   :  { %s8043_s14 = scalar_lea.vmem %s80_s29, 49152  ;;  %p8048_p6 = scmp.lt.s32.totalorder %s80_s29, %s80_s29 }
  0x2d   :  { %p8044_p5 = scmp.ne.s32.totalorder %s80_s29, %s8043_s14  ;;  %p8049_p7 = scmp.lt.s32.totalorder %s8043_s14, %s8043_s14 }
  0x2f   :  { %p8050_p8 = por %p8049_p7, %p8048_p6 }
  0x31   :  { %p8051_p9 = pnand %p8050_p8, %p8044_p5 }
  0x33   :  { %8054 = shalt.err (!%p8051_p9)
}
  0x34   :  { %s8158_s3 = smov 384   ;;  %s8159_s15 = smov 24  }
  0x35   :  { %85 = dma.hbm_to_vmem [thread:$0]  %s8700_s5, 49152, %s80_s29, [#allocation12], %s8158_s3, %s8158_s3, %s8159_s15  }
  0x36   :  { %s8160_s18 = smov [#allocation3]   ;;  %s8161_s20 = smov [#allocation7]  }
  0x37   :  { %s22_s19 = sshll.u32 %s8160_s18, 4  ;;  %s43_s21 = sshll.u32 %s8161_s20, 4  ;;  %s23_s19 = int_to_ptr.vmem [resolvable:$true] %s22_s19  ;;  %s44_s21 = int_to_ptr.vmem [resolvable:$true] %s43_s21 }
  0x38   :  { %s8055_s24 = scalar_lea.hbm %s8695_s0, 128 }
  0x39   :  { %p8056_p10 = scmp.ne.s32.totalorder %s8695_s0, %s8055_s24  ;;  %p8059_p11 = scmp.lt.u32.totalorder %s8055_s24, %s8695_s0 }
  0x3b   :  { %p8061_p12 = pnand %p8059_p11, %p8056_p10 }
  0x3d   :  { %8064 = shalt.err (!%p8061_p12)
}
  0x3e   :  { %s8065_s5 = scalar_lea.vmem %s23_s19, 128  ;;  %p8070_p0 = scmp.lt.s32.totalorder %s23_s19, %s23_s19 }
  0x3f   :  { %p8066_p13 = scmp.ne.s32.totalorder %s23_s19, %s8065_s5  ;;  %p8071_p1 = scmp.lt.s32.totalorder %s8065_s5, %s8065_s5 }
  0x41   :  { %p8072_p2 = por %p8071_p1, %p8070_p0 }
  0x43   :  { %p8073_p3 = pnand %p8072_p2, %p8066_p13 }
  0x45   :  { %8076 = shalt.err (!%p8073_p3)
}
  0x46   :  { %25 = dma.hbm_to_vmem [thread:$0]  %s8695_s0, 128, %s23_s19, [#allocation4]  }
  0x47   :  { %s8077_s9 = scalar_lea.hbm %s8697_s2, 2048 }
  0x48   :  { %p8078_p4 = scmp.ne.s32.totalorder %s8697_s2, %s8077_s9  ;;  %p8081_p5 = scmp.lt.u32.totalorder %s8077_s9, %s8697_s2 }
  0x4a   :  { %p8083_p6 = pnand %p8081_p5, %p8078_p4 }
  0x4c   :  { %8086 = shalt.err (!%p8083_p6)
}
  0x4d   :  { %s8087_s14 = scalar_lea.vmem %s44_s21, 2048  ;;  %p8092_p8 = scmp.lt.s32.totalorder %s44_s21, %s44_s21 }
  0x4e   :  { %p8088_p7 = scmp.ne.s32.totalorder %s44_s21, %s8087_s14  ;;  %p8093_p9 = scmp.lt.s32.totalorder %s8087_s14, %s8087_s14 }
  0x50   :  { %p8094_p10 = por %p8093_p9, %p8092_p8 }
  0x52   :  { %p8095_p11 = pnand %p8094_p10, %p8088_p7 }
  0x54   :  { %8098 = shalt.err (!%p8095_p11)
}
  0x55   :  { %s8162_s0 = smov 128   ;;  %s8163_s3 = smov 8  }
  0x56   :  { %49 = dma.hbm_to_vmem [thread:$0]  %s8697_s2, 2048, %s44_s21, [#allocation6], %s8162_s0, %s8162_s0, %s8163_s3  }
  0x57   :  { %s8164_s17 = smov [#allocation10]   ;;  %s8099_s22 = scalar_lea.hbm %s8699_s4, 32768 }
  0x58   :  { %s67_s18 = sshll.u32 %s8164_s17, 4  ;;  %p8100_p12 = scmp.ne.s32.totalorder %s8699_s4, %s8099_s22  ;;  %s68_s18 = int_to_ptr.vmem [resolvable:$true] %s67_s18 }
  0x59   :  { %p8103_p13 = scmp.lt.u32.totalorder %s8099_s22, %s8699_s4 }
  0x5b   :  { %p8105_p0 = pnand %p8103_p13, %p8100_p12 }
  0x5d   :  { %8108 = shalt.err (!%p8105_p0)
}
  0x5e   :  { %s8109_s26 = scalar_lea.vmem %s68_s18, 32768  ;;  %p8114_p2 = scmp.lt.s32.totalorder %s68_s18, %s68_s18 }
  0x5f   :  { %p8110_p1 = scmp.ne.s32.totalorder %s68_s18, %s8109_s26  ;;  %p8115_p3 = scmp.lt.s32.totalorder %s8109_s26, %s8109_s26 }
  0x61   :  { %p8116_p4 = por %p8115_p3, %p8114_p2 }
  0x63   :  { %p8117_p5 = pnand %p8116_p4, %p8110_p1 }
  0x65   :  { %8120 = shalt.err (!%p8117_p5)
}
  0x66   :  { %s8165_s2 = smov 512   ;;  %s8166_s21 = smov 32  }
  0x67   :  { %73 = dma.hbm_to_vmem [thread:$0]  %s8699_s4, 32768, %s68_s18, [#allocation9], %s8165_s2, %s8165_s2, %s8166_s21  }
  0x68   :  { %s8167_s28 = smov [#allocation13]   ;;  %s8121_s9 = scalar_lea.hbm %s8701_s6, 816 }
  0x69   :  { %s92_s29 = sshll.u32 %s8167_s28, 4  ;;  %p8122_p6 = scmp.ne.s32.totalorder %s8701_s6, %s8121_s9  ;;  %s93_s29 = int_to_ptr.vmem [resolvable:$true] %s92_s29 }
  0x6a   :  { %p8125_p7 = scmp.lt.u32.totalorder %s8121_s9, %s8701_s6 }
  0x6c   :  { %p8127_p8 = pnand %p8125_p7, %p8122_p6 }
  0x6e   :  { %8130 = shalt.err (!%p8127_p8)
}
  0x6f   :  { %s8131_s14 = scalar_lea.vmem %s93_s29, 816  ;;  %s8135_s4 = scalar_lea.vmem %s93_s29, 832 }
  0x70   :  { %p8132_p9 = scmp.ne.s32.totalorder %s93_s29, %s8131_s14  ;;  %p8136_p10 = scmp.lt.s32.totalorder %s93_s29, %s93_s29 }
  0x71   :  { %p8137_p11 = scmp.lt.s32.totalorder %s8135_s4, %s8131_s14 }
  0x73   :  { %p8138_p12 = por %p8137_p11, %p8136_p10 }
  0x75   :  { %p8139_p13 = pnand %p8138_p12, %p8132_p9 }
  0x77   :  { %8142 = shalt.err (!%p8139_p13)
}
  0x78   :  { %95 = dma.hbm_to_vmem [thread:$0]  %s8701_s6, 816, %s93_s29, [#allocation12]  }
  0x79   :  { %8143 = dma.done.wait [#allocation4], 128  }
  0x7a   :  { %8144 = vsyncadd [#allocation4], 4294967168 }
  0x7b   :  { %8145 = dma.done.wait [#allocation6], 3072  }
  0x7c   :  { %8146 = vsyncadd [#allocation6], 4294964224 }
  0x7d   :  { %8147 = dma.done.wait [#allocation9], 40960  }
  0x7e   :  { %8148 = vsyncadd [#allocation9], 4294926336 }
  0x7f   :  { %8149 = dma.done.wait [#allocation12], 49968  }
  0x80   :  { %8150 = vsyncadd [#allocation12], 4294917328  ;;  %v8168_v0 = vmov 0.0   ;;  %vm8169_vm0 = vmmov 0   ;;  %v7243_v1 = vld [vmem:[#allocation5] sm:$0xff]   ;;  %v7244_v2 = vld [vmem:[#allocation5 + $0x8] sm:$0xff]   ;;  %v260_v53 = vlaneseq }
  0x81   :  { %7138 = vmatprep.subr.bf16.mxu0 %v8168_v0  ;;  %118 = vst [vmem:[#allocation2] sm:$0xff] %v8168_v0  ;;  %7154 = vmatprep.mubr.msk.bf16.mxu0 %vm8169_vm0, %v8168_v0  ;;  %v7245_v3 = vld [vmem:[#allocation5 + $0x10] sm:$0xff]   ;;  %vm120_vm1 = vcmask 818176   ;;  %v7246_v4 = vld [vmem:[#allocation5 + $0x18] sm:$0xff]   ;;  %v7247_v6 = vld [vmem:[#allocation5 + $0x20] sm:$0xff]   ;;  %v8170_v28 = vmov 0  }
  0x82   :  { %7139 = vmatpush3.bf16.msra.mxu0 %v7243_v1  ;;  %v119_v5 = vld [vmem:[#allocation3] sm:$0xff]  ;;  %v7248_v7 = vld [vmem:[#allocation5 + $0x28] sm:$0xff]   ;;  %v7249_v8 = vld [vmem:[#allocation5 + $0x30] sm:$0xff]   ;;  %419 = vmatprep.mubr.bf16.mxu1 %v8170_v28  ;;  %v8296_v54 = vshrl.u32 %v260_v53, 7 }
  0x83   :  { %7140 = vmatprep.subr.bf16.mxu0 %v8168_v0  ;;  %121 = vst.msk [vmem:[#allocation2] sm:$0xff] %vm120_vm1, %v119_v5  ;;  %v7250_v9 = vld [vmem:[#allocation5 + $0x38] sm:$0xff]   ;;  %v7251_v12 = vld [vmem:[#allocation7 + $0x4] ss:$8 sps:$4 sm:$0xff]   ;;  %v7253_v13 = vld [vmem:[#allocation7] ss:$8 sps:$4 sm:$0xff]  }
  0x84   :  { %387 = vmatprep.subr.bf16.mxu1 %v7251_v12  ;;  %v7254_v14 = vld [vmem:[#allocation7 + $0x14] ss:$8 sps:$4 sm:$0xff]   ;;  %v7256_v15 = vld [vmem:[#allocation7 + $0x10] ss:$8 sps:$4 sm:$0xff]   ;;  %v7257_v16 = vld [vmem:[#allocation7 + $0x24] ss:$8 sps:$4 sm:$0xff]  }
  0x85   :  { %388 = vmatpush1.bf16.msra.mxu1 %v7253_v13  ;;  %v7259_v17 = vld [vmem:[#allocation7 + $0x20] ss:$8 sps:$4 sm:$0xff]   ;;  %v7260_v18 = vld [vmem:[#allocation7 + $0x34] ss:$8 sps:$4 sm:$0xff]   ;;  %v7262_v19 = vld [vmem:[#allocation7 + $0x30] ss:$8 sps:$4 sm:$0xff]  }
  0x86   :  { %7141 = vmatpush3.bf16.msra.mxu0 %v7244_v2  ;;  %389 = vmatprep.subr.bf16.mxu1 %v7254_v14  ;;  %v7263_v20 = vld [vmem:[#allocation7 + $0x44] ss:$8 sps:$4 sm:$0xff]   ;;  %v7265_v21 = vld [vmem:[#allocation7 + $0x40] ss:$8 sps:$4 sm:$0xff]   ;;  %v7266_v22 = vld [vmem:[#allocation7 + $0x54] ss:$8 sps:$4 sm:$0xff]  }
  0x87   :  { %7142 = vmatprep.subr.bf16.mxu0 %v8168_v0  ;;  %v7268_v23 = vld [vmem:[#allocation7 + $0x50] ss:$8 sps:$4 sm:$0xff]   ;;  %v7269_v24 = vld [vmem:[#allocation7 + $0x64] ss:$8 sps:$4 sm:$0xff]   ;;  %v7271_v25 = vld [vmem:[#allocation7 + $0x60] ss:$8 sps:$4 sm:$0xff]  }
  0x88   :  { %v7272_v26 = vld [vmem:[#allocation7 + $0x74] ss:$8 sps:$4 sm:$0xff]   ;;  %v7274_v27 = vld [vmem:[#allocation7 + $0x70] ss:$8 sps:$4 sm:$0xff]   ;;  %v6400_v29 = vld [vmem:[#allocation13] ss:$0 sm:$0xff] }
  0x89   :  { %390 = vmatpush1.bf16.msra.mxu1 %v7256_v15  ;;  %v141_v55 = vld [vmem:[#allocation13 + $0x1] sm:$0x1]  ;;  %v8299_v56 = vsub.s32 0, %v8296_v54  ;;  %v142_v59 = vld [vmem:[#allocation13 + $0x2] sm:$0x1] }
  0x8a   :  { %7143 = vmatpush3.bf16.msra.mxu0 %v7245_v3  ;;  %v122_v10 = vld [vmem:[#allocation2] sm:$0xff]  ;;  %391 = vmatprep.subr.bf16.mxu1 %v7257_v16 }
  0x8b   :  { %7144 = vmatprep.subr.bf16.mxu0 %v8168_v0  ;;  %v123_v11 = vpack.c.bf16 %v122_v10, %v122_v10  ;;  %v7277_v5 = vld [vmem:[#allocation8 + $0x4] ss:$16 sps:$4 sm:$0xff]   ;;  %v7281_v10 = vld [vmem:[#allocation8 + $0x40] ss:$16 sps:$4 sm:$0xff]  }
  0x8c   :  { %v7284_v12 = vld [vmem:[#allocation8 + $0x60] ss:$16 sps:$4 sm:$0xff]   ;;  %v7289_v13 = vld [vmem:[#allocation8 + $0x84] ss:$16 sps:$4 sm:$0xff]  }
  0x8d   :  { %392 = vmatpush1.bf16.msra.mxu1 %v7259_v17  ;;  %v7287_v14 = vld [vmem:[#allocation8 + $0x80] ss:$16 sps:$4 sm:$0xff]   ;;  %v7292_v15 = vld [vmem:[#allocation8 + $0xa4] ss:$16 sps:$4 sm:$0xff]  }
  0x8e   :  { %7145 = vmatpush3.bf16.msra.mxu0 %v7246_v4  ;;  %393 = vmatprep.subr.bf16.mxu1 %v7260_v18  ;;  %v7290_v16 = vld [vmem:[#allocation8 + $0xa0] ss:$16 sps:$4 sm:$0xff]   ;;  %v7295_v17 = vld [vmem:[#allocation8 + $0xc4] ss:$16 sps:$4 sm:$0xff]  }
  0x8f   :  { %7146 = vmatprep.subr.bf16.mxu0 %v8168_v0  ;;  %v7293_v18 = vld [vmem:[#allocation8 + $0xc0] ss:$16 sps:$4 sm:$0xff]  }
  0x90   :  { %v7308_v28 = vld [vmem:[#allocation8 + $0x160] ss:$16 sps:$4 sm:$0xff]  }
  0x91   :  { %394 = vmatpush1.bf16.msra.mxu1 %v7262_v19  ;;  %v7298_v19 = vld [vmem:[#allocation8 + $0xe4] ss:$16 sps:$4 sm:$0xff]  }
  0x92   :  { %7147 = vmatpush3.bf16.msra.mxu0 %v7247_v6  ;;  %395 = vmatprep.subr.bf16.mxu1 %v7263_v20  ;;  %v7275_v6 = vld [vmem:[#allocation8] ss:$16 sps:$4 sm:$0xff]  }
  0x93   :  { %7148 = vmatprep.subr.bf16.mxu0 %v8168_v0  ;;  %v7296_v20 = vld [vmem:[#allocation8 + $0xe0] ss:$16 sps:$4 sm:$0xff]  }
  0x95   :  { %396 = vmatpush1.bf16.msra.mxu1 %v7265_v21  ;;  %v7301_v21 = vld [vmem:[#allocation8 + $0x104] ss:$16 sps:$4 sm:$0xff]  }
  0x96   :  { %7149 = vmatpush3.bf16.msra.mxu0 %v7248_v7  ;;  %397 = vmatprep.subr.bf16.mxu1 %v7266_v22  ;;  %v7280_v7 = vld [vmem:[#allocation8 + $0x24] ss:$16 sps:$4 sm:$0xff]   ;;  %v7299_v22 = vld [vmem:[#allocation8 + $0x100] ss:$16 sps:$4 sm:$0xff]  }
  0x97   :  { %7150 = vmatprep.subr.bf16.mxu0 %v8168_v0 }
  0x99   :  { %398 = vmatpush1.bf16.msra.mxu1 %v7268_v23  ;;  %v7304_v23 = vld [vmem:[#allocation8 + $0x124] ss:$16 sps:$4 sm:$0xff]  }
  0x9a   :  { %7151 = vmatpush3.bf16.msra.mxu0 %v7249_v8  ;;  %399 = vmatprep.subr.bf16.mxu1 %v7269_v24  ;;  %v7278_v8 = vld [vmem:[#allocation8 + $0x20] ss:$16 sps:$4 sm:$0xff]  }
  0x9b   :  { %7152 = vmatprep.subr.bf16.mxu0 %v8168_v0  ;;  %v7302_v24 = vld [vmem:[#allocation8 + $0x120] ss:$16 sps:$4 sm:$0xff]  }
  0x9d   :  { %400 = vmatpush1.bf16.msra.mxu1 %v7271_v25  ;;  %v7307_v25 = vld [vmem:[#allocation8 + $0x144] ss:$16 sps:$4 sm:$0xff]  }
  0x9e   :  { %7153 = vmatpush3.bf16.msra.mxu0 %v7250_v9  ;;  %401 = vmatprep.subr.bf16.mxu1 %v7272_v26  ;;  %v7283_v9 = vld [vmem:[#allocation8 + $0x44] ss:$16 sps:$4 sm:$0xff]   ;;  %v7305_v26 = vld [vmem:[#allocation8 + $0x140] ss:$16 sps:$4 sm:$0xff]  }
  0xa1   :  { %7155 = vmatmul.mubr.bf16.vlgmr.msra.gmra.mrb[0].mxu0 %v123_v11  ;;  %402 = vmatpush1.bf16.msra.mxu1 %v7274_v27  ;;  %v7286_v11 = vld [vmem:[#allocation8 + $0x64] ss:$16 sps:$4 sm:$0xff]  }
  0xa2   :  { %948 = vmatprep.subr.bf16.mxu1 %v7277_v5  ;;  %v7310_v27 = vld [vmem:[#allocation8 + $0x164] ss:$16 sps:$4 sm:$0xff]  }
 0x174   :  { %v231_v30 = vpop.f32.mrb[0].mxu0 }
 0x175   :  { %v232_v31 = vadd.f32 %v6400_v29, %v231_v30  ;;  %v7156_v32 = vpop.f32.mrb[1].mxu0  ;;  %v7313_v29 = vld [vmem:[#allocation8 + $0x184] ss:$16 sps:$4 sm:$0xff]   ;;  %v7311_v30 = vld [vmem:[#allocation8 + $0x180] ss:$16 sps:$4 sm:$0xff]  }
 0x176   :  { %v234_v33 = vpop.f32.mrb[2].mxu0  ;;  %v7316_v32 = vld [vmem:[#allocation8 + $0x1a4] ss:$16 sps:$4 sm:$0xff]  }
 0x177   :  { %v237_v34 = vrot.slane %v232_v31, 4  ;;  %v244_v35 = vmul.f32 %v232_v31, %v232_v31  ;;  %v7157_v36 = vpop.f32.mrb[3].mxu0  ;;  %v7319_v33 = vld [vmem:[#allocation8 + $0x1c4] ss:$16 sps:$4 sm:$0xff]  }
 0x178   :  { %v7320_v36 = vld [vmem:[#allocation8 + $0x1e0] ss:$16 sps:$4 sm:$0xff]  }
 0x179   :  { %v238_v37 = vadd.f32 %v237_v34, %v232_v31  ;;  %v245_v38 = vrot.slane %v244_v35, 4  ;;  %v7317_v34 = vld [vmem:[#allocation8 + $0x1c0] ss:$16 sps:$4 sm:$0xff]  }
 0x17b   :  { %v239_v39 = vrot.slane %v238_v37, 2  ;;  %v246_v40 = vadd.f32 %v245_v38, %v244_v35  ;;  %v7322_v35 = vld [vmem:[#allocation8 + $0x1e4] ss:$16 sps:$4 sm:$0xff]  }
 0x17c   :  { %v293_v38 = vld [vmem:[#allocation13 + $0x3] sm:$0x3] }
 0x17d   :  { %v240_v41 = vadd.f32 %v239_v39, %v238_v37  ;;  %v247_v42 = vrot.slane %v246_v40, 2  ;;  %v7325_v37 = vld [vmem:[#allocation8 + $0xc] ss:$16 sps:$4 sm:$0xff]   ;;  %v8304_v39 = vsub.s32 1, %v8296_v54 }
 0x17f   :  { %v241_v43 = vrot.slane %v240_v41, 1  ;;  %v248_v44 = vadd.f32 %v247_v42, %v246_v40  ;;  %v300_v40 = vrot.slane %v293_v38, %v8299_v56 }
 0x181   :  { %v242_v45 = vadd.f32 %v241_v43, %v240_v41  ;;  %v249_v46 = vrot.slane %v248_v44, 1  ;;  %v304_v41 = vrot.slane %v293_v38, %v8304_v39 }
 0x183   :  { %v243_v47 = vmul.f32 0.125, %v242_v45  ;;  %v250_v48 = vadd.f32 %v249_v46, %v248_v44 }
 0x185   :  { %v251_v49 = vmul.f32 0.125, %v250_v48  ;;  %v252_v50 = vmul.f32 %v243_v47, %v243_v47 }
 0x187   :  { %v253_v51 = vsub.f32 %v251_v49, %v252_v50 }
 0x189   :  { %v254_v52 = vadd.f32 1e-05, %v253_v51 }
 0x18b   :  { %7947 = vrsqrt.f32 %v254_v52 }
 0x195   :  { %v7948_v57 = vpop.eup %7947 }
 0x196   :  { %v256_v58 = vmul.f32 %v7948_v57, %v141_v55 }
 0x198   :  { %v257_v60 = vmul.f32 %v256_v58, %v243_v47  ;;  %v263_v61 = vrot.slane %v256_v58, %v8299_v56 }
 0x19a   :  { %v258_v62 = vsub.f32 %v142_v59, %v257_v60  ;;  %v265_v63 = vmul.f32 %v263_v61, %v232_v31  ;;  %v7314_v31 = vld [vmem:[#allocation8 + $0x1a0] ss:$16 sps:$4 sm:$0xff]  }
 0x19c   :  { %v270_v0 = vrot.slane %v258_v62, %v8299_v56 }
 0x19e   :  { %v272_v1 = vadd.f32 %v270_v0, %v265_v63 }
 0x1a0   :  { %vm273_vm2 = vcmp.gt.f32.partialorder %v272_v1, 0.0  ;;  %v274_v2 = vmul.f32 0.2, %v272_v1 }
 0x1a2   :  { %v275_v3 = vsel %vm273_vm2, %v272_v1, %v274_v2 }
 0x1a3   :  { %v276_v4 = vpack.c.bf16 %v275_v3, %v275_v3 }
 0x1a5   :  { %420 = vmatmul.mubr.bf16.vlgmr.msra.gmra.mrb[0].mxu1 %v276_v4 }
 0x1a6   :  { %949 = vmatpush1.bf16.msra.mxu1 %v7275_v6 }
 0x1a7   :  { %950 = vmatprep.subr.bf16.mxu1 %v7280_v7 }
 0x1aa   :  { %951 = vmatpush1.bf16.msra.mxu1 %v7278_v8 }
 0x1ab   :  { %952 = vmatprep.subr.bf16.mxu1 %v7283_v9 }
 0x1ae   :  { %953 = vmatpush1.bf16.msra.mxu1 %v7281_v10 }
 0x1af   :  { %954 = vmatprep.subr.bf16.mxu1 %v7286_v11 }
 0x1b2   :  { %955 = vmatpush1.bf16.msra.mxu1 %v7284_v12 }
 0x1b3   :  { %956 = vmatprep.subr.bf16.mxu1 %v7289_v13 }
 0x1b6   :  { %957 = vmatpush1.bf16.msra.mxu1 %v7287_v14 }
 0x1b7   :  { %958 = vmatprep.subr.bf16.mxu1 %v7292_v15 }
 0x1ba   :  { %959 = vmatpush1.bf16.msra.mxu1 %v7290_v16 }
 0x1bb   :  { %960 = vmatprep.subr.bf16.mxu1 %v7295_v17 }
 0x1be   :  { %961 = vmatpush1.bf16.msra.mxu1 %v7293_v18 }
 0x1bf   :  { %962 = vmatprep.subr.bf16.mxu1 %v7298_v19 }
 0x1c2   :  { %963 = vmatpush1.bf16.msra.mxu1 %v7296_v20 }
 0x1c3   :  { %964 = vmatprep.subr.bf16.mxu1 %v7301_v21 }
 0x1c6   :  { %965 = vmatpush1.bf16.msra.mxu1 %v7299_v22  ;;  %v8171_v22 = vmov 1966171168  }
 0x1c7   :  { %966 = vmatprep.subr.bf16.mxu1 %v7304_v23  ;;  %v470_v23 = vunpack.c.l.s4 %v8171_v22  ;;  %v7370_v22 = vld [vmem:[#allocation8 + $0x1ec] ss:$16 sps:$4 sm:$0xff]  }
 0x1ca   :  { %967 = vmatpush1.bf16.msra.mxu1 %v7302_v24  ;;  %v471_v24 = vunpack.c.0.s8 %v470_v23  ;;  %v7368_v23 = vld [vmem:[#allocation8 + $0x1e8] ss:$16 sps:$4 sm:$0xff]  }
 0x1cb   :  { %968 = vmatprep.subr.bf16.mxu1 %v7307_v25 }
 0x1ce   :  { %969 = vmatpush1.bf16.msra.mxu1 %v7305_v26  ;;  %v8309_v26 = vsub.s32 %v471_v24, %v8296_v54  ;;  %v1236_v24 = vld [vmem:[#allocation10] sm:$0xff] }
 0x1cf   :  { %970 = vmatprep.subr.bf16.mxu1 %v7310_v27 }
 0x1d2   :  { %971 = vmatpush1.bf16.msra.mxu1 %v7308_v28 }
 0x1d3   :  { %972 = vmatprep.subr.bf16.mxu1 %v7313_v29 }
 0x1d6   :  { %973 = vmatpush1.bf16.msra.mxu1 %v7311_v30  ;;  %v294_v30 = vld [vmem:[#allocation13 + $0x5] sm:$0x3] }
 0x1d7   :  { %974 = vmatprep.subr.bf16.mxu1 %v7316_v32 }
 0x1da   :  { %975 = vmatpush1.bf16.msra.mxu1 %v7314_v31 }
 0x1db   :  { %976 = vmatprep.subr.bf16.mxu1 %v7319_v33 }
 0x1de   :  { %977 = vmatpush1.bf16.msra.mxu1 %v7317_v34 }
 0x1df   :  { %978 = vmatprep.subr.bf16.mxu1 %v7322_v35 }
 0x1e2   :  { %979 = vmatpush1.bf16.msra.mxu1 %v7320_v36 }
 0x1e3   :  { %989 = vmatprep.subr.bf16.mxu1 %v7325_v37 }
 0x278   :  { %v421_v42 = vpop.f32.mrb[0].mxu1 }
 0x279   :  { %v422_v43 = vadd.f32 %v421_v42, %v300_v40  ;;  %v423_v44 = vpop.f32.mrb[1].mxu1  ;;  %v295_v42 = vld [vmem:[#allocation13 + $0x7] sm:$0x3] }
 0x27a   :  { %v424_v45 = vadd.f32 %v423_v44, %v304_v41  ;;  %v425_v46 = vpop.f32.mrb[2].mxu1 }
 0x27b   :  { %v428_v47 = vrot.slane %v422_v43, 4  ;;  %v442_v48 = vmul.f32 %v422_v43, %v422_v43  ;;  %v426_v49 = vpop.f32.mrb[3].mxu1 }
 0x27c   :  { %v434_v50 = vrot.slane %v424_v45, 4  ;;  %v443_v51 = vmul.f32 %v424_v45, %v424_v45 }
 0x27d   :  { %v429_v52 = vadd.f32 %v428_v47, %v422_v43  ;;  %v444_v53 = vrot.slane %v442_v48, 4 }
 0x27e   :  { %v435_v55 = vadd.f32 %v434_v50, %v424_v45  ;;  %v450_v57 = vrot.slane %v443_v51, 4 }
 0x27f   :  { %v430_v58 = vrot.slane %v429_v52, 2  ;;  %v445_v59 = vadd.f32 %v444_v53, %v442_v48 }
 0x280   :  { %v436_v60 = vrot.slane %v435_v55, 2  ;;  %v451_v61 = vadd.f32 %v450_v57, %v443_v51 }
 0x281   :  { %v431_v62 = vadd.f32 %v430_v58, %v429_v52  ;;  %v446_v63 = vrot.slane %v445_v59, 2  ;;  %v7328_v58 = vld [vmem:[#allocation8 + $0x2c] ss:$16 sps:$4 sm:$0xff]  }
 0x282   :  { %v437_v0 = vadd.f32 %v436_v60, %v435_v55  ;;  %v452_v1 = vrot.slane %v451_v61, 2  ;;  %v7323_v55 = vld [vmem:[#allocation8 + $0x8] ss:$16 sps:$4 sm:$0xff]   ;;  %v7331_v60 = vld [vmem:[#allocation8 + $0x4c] ss:$16 sps:$4 sm:$0xff]  }
 0x283   :  { %v432_v2 = vrot.slane %v431_v62, 1  ;;  %v447_v3 = vadd.f32 %v446_v63, %v445_v59  ;;  %v7326_v59 = vld [vmem:[#allocation8 + $0x28] ss:$16 sps:$4 sm:$0xff]  }
 0x284   :  { %v438_v4 = vrot.slane %v437_v0, 1  ;;  %v453_v5 = vadd.f32 %v452_v1, %v451_v61  ;;  %v7329_v61 = vld [vmem:[#allocation8 + $0x48] ss:$16 sps:$4 sm:$0xff]  }
 0x285   :  { %v433_v6 = vadd.f32 %v432_v2, %v431_v62  ;;  %v448_v7 = vrot.slane %v447_v3, 1  ;;  %v7334_v62 = vld [vmem:[#allocation8 + $0x6c] ss:$16 sps:$4 sm:$0xff]   ;;  %v7332_v63 = vld [vmem:[#allocation8 + $0x68] ss:$16 sps:$4 sm:$0xff]  }
 0x286   :  { %v439_v8 = vadd.f32 %v438_v4, %v437_v0  ;;  %v454_v9 = vrot.slane %v453_v5, 1  ;;  %v7337_v0 = vld [vmem:[#allocation8 + $0x8c] ss:$16 sps:$4 sm:$0xff]   ;;  %v7335_v1 = vld [vmem:[#allocation8 + $0x88] ss:$16 sps:$4 sm:$0xff]  }
 0x287   :  { %v440_v10 = vmul.f32 0.125, %v433_v6  ;;  %v449_v11 = vadd.f32 %v448_v7, %v447_v3  ;;  %v7340_v2 = vld [vmem:[#allocation8 + $0xac] ss:$16 sps:$4 sm:$0xff]   ;;  %v7338_v3 = vld [vmem:[#allocation8 + $0xa8] ss:$16 sps:$4 sm:$0xff]  }
 0x288   :  { %v441_v12 = vmul.f32 0.125, %v439_v8  ;;  %v455_v13 = vadd.f32 %v454_v9, %v453_v5  ;;  %v7343_v4 = vld [vmem:[#allocation8 + $0xcc] ss:$16 sps:$4 sm:$0xff]   ;;  %v7341_v5 = vld [vmem:[#allocation8 + $0xc8] ss:$16 sps:$4 sm:$0xff]  }
 0x289   :  { %v456_v14 = vmul.f32 0.125, %v449_v11  ;;  %v458_v15 = vmul.f32 %v440_v10, %v440_v10  ;;  %v7346_v6 = vld [vmem:[#allocation8 + $0xec] ss:$16 sps:$4 sm:$0xff]   ;;  %v7344_v7 = vld [vmem:[#allocation8 + $0xe8] ss:$16 sps:$4 sm:$0xff]  }
 0x28a   :  { %v457_v16 = vmul.f32 0.125, %v455_v13  ;;  %v459_v17 = vmul.f32 %v441_v12, %v441_v12  ;;  %v7349_v8 = vld [vmem:[#allocation8 + $0x10c] ss:$16 sps:$4 sm:$0xff]   ;;  %v7347_v9 = vld [vmem:[#allocation8 + $0x108] ss:$16 sps:$4 sm:$0xff]  }
 0x28b   :  { %v460_v18 = vsub.f32 %v456_v14, %v458_v15  ;;  %v7350_v11 = vld [vmem:[#allocation8 + $0x128] ss:$16 sps:$4 sm:$0xff]   ;;  %v7358_v14 = vld [vmem:[#allocation8 + $0x16c] ss:$16 sps:$4 sm:$0xff]  }
 0x28c   :  { %v461_v19 = vsub.f32 %v457_v16, %v459_v17  ;;  %v7353_v13 = vld [vmem:[#allocation8 + $0x148] ss:$16 sps:$4 sm:$0xff]   ;;  %v7361_v16 = vld [vmem:[#allocation8 + $0x18c] ss:$16 sps:$4 sm:$0xff]  }
 0x28d   :  { %v462_v20 = vadd.f32 1e-05, %v460_v18  ;;  %v7356_v15 = vld [vmem:[#allocation8 + $0x168] ss:$16 sps:$4 sm:$0xff]   ;;  %v7364_v18 = vld [vmem:[#allocation8 + $0x1ac] ss:$16 sps:$4 sm:$0xff]  }
 0x28e   :  { %v463_v21 = vadd.f32 1e-05, %v461_v19  ;;  %v7359_v17 = vld [vmem:[#allocation8 + $0x188] ss:$16 sps:$4 sm:$0xff]  }
 0x28f   :  { %7949 = vrsqrt.f32 %v462_v20  ;;  %v7362_v19 = vld [vmem:[#allocation8 + $0x1a8] ss:$16 sps:$4 sm:$0xff]   ;;  %v7367_v20 = vld [vmem:[#allocation8 + $0x1cc] ss:$16 sps:$4 sm:$0xff]  }
 0x290   :  { %7951 = vrsqrt.f32 %v463_v21  ;;  %v7365_v21 = vld [vmem:[#allocation8 + $0x1c8] ss:$16 sps:$4 sm:$0xff]  }
 0x299   :  { %v7950_v25 = vpop.eup %7949 }
 0x29a   :  { %v7952_v27 = vpop.eup %7951 }
 0x29b   :  { %v468_v28 = vcombine.low %v7950_v25, %v7952_v27  ;;  %v1240_v25 = vld [vmem:[#allocation10 + $0x20] sm:$0xff] }
 0x29c   :  { %v1364_v27 = vld [vmem:[#allocation10 + $0x400] sm:$0xff] }
 0x29d   :  { %v475_v29 = vrot.slane %v468_v28, %v8309_v26  ;;  %v6490_v28 = vcombine.high %v1236_v24, %v1240_v25 }
 0x29f   :  { %v482_v31 = vrot.slane %v475_v29, %v8309_v26  ;;  %v1368_v29 = vld [vmem:[#allocation10 + $0x420] sm:$0xff] }
 0x2a1   :  { %v484_v32 = vmul.f32 %v482_v31, %v294_v30  ;;  %v6489_v30 = vcombine.low %v1236_v24, %v1240_v25  ;;  %v6617_v31 = vcombine.low %v1364_v27, %v1368_v29  ;;  %v1424_v24 = vld [vmem:[#allocation10 + $0x5e0] sm:$0xff] }
 0x2a3   :  { %v489_v33 = vrot.slane %v484_v32, %v8299_v56  ;;  %v493_v34 = vrot.slane %v484_v32, %v8304_v39  ;;  %v6618_v32 = vcombine.high %v1364_v27, %v1368_v29  ;;  %v1300_v29 = vld [vmem:[#allocation10 + $0x200] sm:$0xff] }
 0x2a5   :  { %v496_v35 = vmul.f32 %v489_v33, %v440_v10  ;;  %v497_v36 = vmul.f32 %v493_v34, %v441_v12  ;;  %v518_v37 = vmul.f32 %v493_v34, %v424_v45  ;;  %v517_v38 = vmul.f32 %v489_v33, %v422_v43  ;;  %v7352_v10 = vld [vmem:[#allocation8 + $0x12c] ss:$16 sps:$4 sm:$0xff]   ;;  %2857 = vmatprep.subr.bf16.mxu0 %v6618_v32  ;;  %v1244_v33 = vld [vmem:[#allocation10 + $0x40] sm:$0xff] }
 0x2a6   :  { %v7355_v12 = vld [vmem:[#allocation8 + $0x14c] ss:$16 sps:$4 sm:$0xff]   ;;  %v1248_v34 = vld [vmem:[#allocation10 + $0x60] sm:$0xff]  ;;  %2858 = vmatpush1.bf16.msra.mxu0 %v6617_v31 }
 0x2a7   :  { %v500_v40 = vcombine.low %v496_v35, %v497_v36  ;;  %v1372_v35 = vld [vmem:[#allocation10 + $0x440] sm:$0xff]  ;;  %v6498_v36 = vcombine.high %v1244_v33, %v1248_v34 }
 0x2a8   :  { %v1428_v31 = vld [vmem:[#allocation10 + $0x600] sm:$0xff] }
 0x2a9   :  { %v507_v41 = vrot.slane %v500_v40, %v8309_v26 }
 0x2ab   :  { %v514_v44 = vrot.slane %v507_v41, %v8309_v26 }
 0x2ad   :  { %v516_v46 = vsub.f32 %v295_v42, %v514_v44  ;;  %v1252_v42 = vld [vmem:[#allocation10 + $0x80] sm:$0xff] }
 0x2ae   :  { %v1256_v44 = vld [vmem:[#allocation10 + $0xa0] sm:$0xff] }
 0x2af   :  { %v527_v47 = vrot.slane %v516_v46, %v8304_v39  ;;  %v523_v48 = vrot.slane %v516_v46, %v8299_v56  ;;  %v1380_v46 = vld [vmem:[#allocation10 + $0x480] sm:$0xff] }
 0x2b1   :  { %v531_v49 = vadd.f32 %v527_v47, %v518_v37  ;;  %v530_v50 = vadd.f32 %v523_v48, %v517_v38  ;;  %v1376_v37 = vld [vmem:[#allocation10 + $0x460] sm:$0xff]  ;;  %v6497_v38 = vcombine.low %v1244_v33, %v1248_v34  ;;  %v6506_v47 = vcombine.high %v1252_v42, %v1256_v44 }
 0x2b2   :  { %v6625_v40 = vcombine.low %v1372_v35, %v1376_v37  ;;  %v6626_v41 = vcombine.high %v1372_v35, %v1376_v37  ;;  %v1384_v48 = vld [vmem:[#allocation10 + $0x4a0] sm:$0xff] }
 0x2b3   :  { %vm533_vm3 = vcmp.gt.f32.partialorder %v531_v49, 0.0  ;;  %v535_v51 = vmul.f32 0.2, %v531_v49  ;;  %vm532_vm4 = vcmp.gt.f32.partialorder %v530_v50, 0.0  ;;  %v534_v52 = vmul.f32 0.2, %v530_v50 }
 0x2b4   :  { %2859 = vmatprep.subr.bf16.mxu0 %v6626_v41  ;;  %v1432_v33 = vld [vmem:[#allocation10 + $0x620] sm:$0xff] }
 0x2b5   :  { %v537_v53 = vsel %vm533_vm3, %v531_v49, %v535_v51  ;;  %v536_v45 = vsel %vm532_vm4, %v530_v50, %v534_v52  ;;  %2860 = vmatpush1.bf16.msra.mxu0 %v6625_v40  ;;  %v6505_v49 = vcombine.low %v1252_v42, %v1256_v44  ;;  %v6633_v50 = vcombine.low %v1380_v46, %v1384_v48  ;;  %v1260_v52 = vld [vmem:[#allocation10 + $0xc0] sm:$0xff] }
 0x2b6   :  { %v539_v43 = vpack.c.bf16 %v537_v53, %v537_v53  ;;  %v8319_v57 = vpack.c.bf16 %v536_v45, %v536_v45  ;;  %v6634_v51 = vcombine.high %v1380_v46, %v1384_v48  ;;  %v1264_v53 = vld [vmem:[#allocation10 + $0xe0] sm:$0xff]  ;;  %v6681_v35 = vcombine.low %v1428_v31, %v1432_v33 }
 0x2b7   :  { %v1388_v45 = vld [vmem:[#allocation10 + $0x4c0] sm:$0xff] }
 0x2b8   :  { %980 = vmatprep.mubr.bf16.mxu1 %v539_v43  ;;  %2861 = vmatprep.subr.bf16.mxu0 %v6634_v51  ;;  %v1308_v37 = vld [vmem:[#allocation10 + $0x240] sm:$0xff] }
 0x2b9   :  { %981 = vmatmul.mubr.bf16.vlgmr.msra.gmra.mrb[4].mxu1 %v8319_v57  ;;  %2862 = vmatpush1.bf16.msra.mxu0 %v6633_v50  ;;  %v1436_v40 = vld [vmem:[#allocation10 + $0x640] sm:$0xff] }
 0x2ba   :  { %990 = vmatpush1.bf16.msra.mxu1 %v7323_v55  ;;  %1021 = vmatprep.mubr.bf16.mxu1 %v539_v43  ;;  %v6514_v43 = vcombine.high %v1260_v52, %v1264_v53  ;;  %v1392_v55 = vld [vmem:[#allocation10 + $0x4e0] sm:$0xff] }
 0x2bb   :  { %991 = vmatprep.subr.bf16.mxu1 %v7328_v58  ;;  %v6641_v58 = vcombine.low %v1388_v45, %v1392_v55  ;;  %v1440_v42 = vld [vmem:[#allocation10 + $0x660] sm:$0xff] }
 0x2bc   :  { %v6689_v46 = vcombine.low %v1436_v40, %v1440_v42  ;;  %v1316_v48 = vld [vmem:[#allocation10 + $0x280] sm:$0xff] }
 0x2bd   :  { %v1444_v50 = vld [vmem:[#allocation10 + $0x680] sm:$0xff] }
 0x2be   :  { %992 = vmatpush1.bf16.msra.mxu1 %v7326_v59  ;;  %v6642_v59 = vcombine.high %v1388_v45, %v1392_v55  ;;  %v1324_v55 = vld [vmem:[#allocation10 + $0x2c0] sm:$0xff] }
 0x2bf   :  { %993 = vmatprep.subr.bf16.mxu1 %v7331_v60  ;;  %v1268_v60 = vld [vmem:[#allocation10 + $0x100] sm:$0xff] }
 0x2c0   :  { %2863 = vmatprep.subr.bf16.mxu0 %v6642_v59 }
 0x2c1   :  { %2864 = vmatpush1.bf16.msra.mxu0 %v6641_v58  ;;  %v1452_v58 = vld [vmem:[#allocation10 + $0x6c0] sm:$0xff] }
 0x2c2   :  { %994 = vmatpush1.bf16.msra.mxu1 %v7329_v61  ;;  %v1272_v61 = vld [vmem:[#allocation10 + $0x120] sm:$0xff] }
 0x2c3   :  { %995 = vmatprep.subr.bf16.mxu1 %v7334_v62  ;;  %v1396_v62 = vld [vmem:[#allocation10 + $0x500] sm:$0xff] }
 0x2c6   :  { %996 = vmatpush1.bf16.msra.mxu1 %v7332_v63  ;;  %v6522_v63 = vcombine.high %v1268_v60, %v1272_v61 }
 0x2c7   :  { %997 = vmatprep.subr.bf16.mxu1 %v7337_v0  ;;  %v1400_v0 = vld [vmem:[#allocation10 + $0x520] sm:$0xff] }
 0x2ca   :  { %998 = vmatpush1.bf16.msra.mxu1 %v7335_v1  ;;  %v6521_v1 = vcombine.low %v1268_v60, %v1272_v61  ;;  %v1456_v60 = vld [vmem:[#allocation10 + $0x6e0] sm:$0xff] }
 0x2cb   :  { %999 = vmatprep.subr.bf16.mxu1 %v7340_v2  ;;  %v6649_v2 = vcombine.low %v1396_v62, %v1400_v0 }
 0x2ce   :  { %1000 = vmatpush1.bf16.msra.mxu1 %v7338_v3  ;;  %v6650_v3 = vcombine.high %v1396_v62, %v1400_v0  ;;  %v6705_v62 = vcombine.low %v1452_v58, %v1456_v60  ;;  %v1332_v0 = vld [vmem:[#allocation10 + $0x300] sm:$0xff] }
 0x2cf   :  { %1001 = vmatprep.subr.bf16.mxu1 %v7343_v4  ;;  %v1276_v4 = vld [vmem:[#allocation10 + $0x140] sm:$0xff] }
 0x2d0   :  { %2865 = vmatprep.subr.bf16.mxu0 %v6650_v3 }
 0x2d1   :  { %2866 = vmatpush1.bf16.msra.mxu0 %v6649_v2  ;;  %v1460_v2 = vld [vmem:[#allocation10 + $0x700] sm:$0xff] }
 0x2d2   :  { %1002 = vmatpush1.bf16.msra.mxu1 %v7341_v5  ;;  %v1280_v5 = vld [vmem:[#allocation10 + $0x160] sm:$0xff] }
 0x2d3   :  { %1003 = vmatprep.subr.bf16.mxu1 %v7346_v6  ;;  %v1404_v6 = vld [vmem:[#allocation10 + $0x540] sm:$0xff] }
 0x2d6   :  { %1004 = vmatpush1.bf16.msra.mxu1 %v7344_v7  ;;  %v6530_v7 = vcombine.high %v1276_v4, %v1280_v5 }
 0x2d7   :  { %1005 = vmatprep.subr.bf16.mxu1 %v7349_v8  ;;  %v1408_v8 = vld [vmem:[#allocation10 + $0x560] sm:$0xff] }
 0x2da   :  { %1006 = vmatpush1.bf16.msra.mxu1 %v7347_v9  ;;  %v6529_v9 = vcombine.low %v1276_v4, %v1280_v5  ;;  %v1464_v4 = vld [vmem:[#allocation10 + $0x720] sm:$0xff] }
 0x2db   :  { %1007 = vmatprep.subr.bf16.mxu1 %v7352_v10  ;;  %v6657_v10 = vcombine.low %v1404_v6, %v1408_v8 }
 0x2de   :  { %1008 = vmatpush1.bf16.msra.mxu1 %v7350_v11  ;;  %v6658_v11 = vcombine.high %v1404_v6, %v1408_v8  ;;  %v6713_v6 = vcombine.low %v1460_v2, %v1464_v4  ;;  %v1340_v8 = vld [vmem:[#allocation10 + $0x340] sm:$0xff] }
 0x2df   :  { %1009 = vmatprep.subr.bf16.mxu1 %v7355_v12  ;;  %v1284_v12 = vld [vmem:[#allocation10 + $0x180] sm:$0xff] }
 0x2e0   :  { %2867 = vmatprep.subr.bf16.mxu0 %v6658_v11 }
 0x2e1   :  { %2868 = vmatpush1.bf16.msra.mxu0 %v6657_v10  ;;  %v1468_v10 = vld [vmem:[#allocation10 + $0x740] sm:$0xff] }
 0x2e2   :  { %1010 = vmatpush1.bf16.msra.mxu1 %v7353_v13  ;;  %v1288_v13 = vld [vmem:[#allocation10 + $0x1a0] sm:$0xff] }
 0x2e3   :  { %1011 = vmatprep.subr.bf16.mxu1 %v7358_v14  ;;  %v1412_v14 = vld [vmem:[#allocation10 + $0x580] sm:$0xff] }
 0x2e6   :  { %1012 = vmatpush1.bf16.msra.mxu1 %v7356_v15  ;;  %v6538_v15 = vcombine.high %v1284_v12, %v1288_v13 }
 0x2e7   :  { %1013 = vmatprep.subr.bf16.mxu1 %v7361_v16  ;;  %v1416_v16 = vld [vmem:[#allocation10 + $0x5a0] sm:$0xff] }
 0x2ea   :  { %1014 = vmatpush1.bf16.msra.mxu1 %v7359_v17  ;;  %v6537_v17 = vcombine.low %v1284_v12, %v1288_v13  ;;  %v1472_v12 = vld [vmem:[#allocation10 + $0x760] sm:$0xff] }
 0x2eb   :  { %1015 = vmatprep.subr.bf16.mxu1 %v7364_v18  ;;  %v6665_v18 = vcombine.low %v1412_v14, %v1416_v16 }
 0x2ee   :  { %1016 = vmatpush1.bf16.msra.mxu1 %v7362_v19  ;;  %v6666_v19 = vcombine.high %v1412_v14, %v1416_v16  ;;  %v6721_v14 = vcombine.low %v1468_v10, %v1472_v12  ;;  %v8323_v16 = vld [vmem:[#allocation13 + $0x9] sm:$0xf] }
 0x2ef   :  { %1017 = vmatprep.subr.bf16.mxu1 %v7367_v20  ;;  %v1292_v20 = vld [vmem:[#allocation10 + $0x1c0] sm:$0xff] }
 0x2f0   :  { %2869 = vmatprep.subr.bf16.mxu0 %v6666_v19  ;;  %v1476_v19 = vld [vmem:[#allocation10 + $0x780] sm:$0xff] }
 0x2f1   :  { %2870 = vmatpush1.bf16.msra.mxu0 %v6665_v18  ;;  %v1352_v18 = vld [vmem:[#allocation10 + $0x3a0] sm:$0xff] }
 0x2f2   :  { %1018 = vmatpush1.bf16.msra.mxu1 %v7365_v21  ;;  %v1296_v21 = vld [vmem:[#allocation10 + $0x1e0] sm:$0xff] }
 0x2f3   :  { %1019 = vmatprep.subr.bf16.mxu1 %v7370_v22  ;;  %v1420_v22 = vld [vmem:[#allocation10 + $0x5c0] sm:$0xff]  ;;  %v6545_v25 = vcombine.low %v1292_v20, %v1296_v21 }
 0x2f4   :  { %v6673_v27 = vcombine.low %v1420_v22, %v1424_v24 }
 0x2f6   :  { %1020 = vmatpush1.bf16.msra.mxu1 %v7368_v23  ;;  %v6546_v23 = vcombine.high %v1292_v20, %v1296_v21  ;;  %v1480_v21 = vld [vmem:[#allocation10 + $0x7a0] sm:$0xff] }
 0x2f7   :  { %2816 = vmatprep.subr.bf16.mxu1 %v6490_v28  ;;  %v6674_v28 = vcombine.high %v1420_v22, %v1424_v24  ;;  %v6730_v24 = vcombine.high %v1476_v19, %v1480_v21 }
 0x2f9   :  { %1022 = vmatmul.mubr.bf16.vlgmr.msra.gmra.mrb[8].mxu1 %v8319_v57  ;;  %v6513_v57 = vcombine.low %v1260_v52, %v1264_v53  ;;  %2871 = vmatprep.subr.bf16.mxu0 %v6674_v28  ;;  %v1448_v52 = vld [vmem:[#allocation10 + $0x6a0] sm:$0xff] }
 0x2fa   :  { %2817 = vmatpush1.bf16.msra.mxu1 %v6489_v30  ;;  %v1304_v30 = vld [vmem:[#allocation10 + $0x220] sm:$0xff]  ;;  %2872 = vmatpush1.bf16.msra.mxu0 %v6673_v27  ;;  %v6697_v45 = vcombine.low %v1444_v50, %v1448_v52 }
 0x2fb   :  { %2818 = vmatprep.subr.bf16.mxu1 %v6498_v36  ;;  %v6554_v32 = vcombine.high %v1300_v29, %v1304_v30  ;;  %v6553_v34 = vcombine.low %v1300_v29, %v1304_v30  ;;  %v6682_v36 = vcombine.high %v1428_v31, %v1432_v33  ;;  %v1356_v27 = vld [vmem:[#allocation10 + $0x3c0] sm:$0xff]  ;;  %v615_v30 = vrot.slane %v8323_v16, %v8304_v39 }
 0x2fc   :  { %v1360_v28 = vld [vmem:[#allocation10 + $0x3e0] sm:$0xff] }
 0x2fd   :  { %2873 = vmatprep.subr.bf16.mxu0 %v6682_v36  ;;  %v1484_v29 = vld [vmem:[#allocation10 + $0x7c0] sm:$0xff]  ;;  %v6609_v31 = vcombine.low %v1356_v27, %v1360_v28 }
 0x2fe   :  { %2819 = vmatpush1.bf16.msra.mxu1 %v6497_v38  ;;  %v1312_v38 = vld [vmem:[#allocation10 + $0x260] sm:$0xff]  ;;  %2874 = vmatpush1.bf16.msra.mxu0 %v6681_v35 }
 0x2ff   :  { %2820 = vmatprep.subr.bf16.mxu1 %v6506_v47  ;;  %v6562_v41 = vcombine.high %v1308_v37, %v1312_v38  ;;  %v6561_v44 = vcombine.low %v1308_v37, %v1312_v38  ;;  %v6690_v47 = vcombine.high %v1436_v40, %v1440_v42  ;;  %v1488_v33 = vld [vmem:[#allocation10 + $0x7e0] sm:$0xff]  ;;  %v8333_v42 = vld [vmem:[#allocation10 + $0x8] sm:$0xff] }
 0x300   :  { %v6738_v35 = vcombine.high %v1484_v29, %v1488_v33 }
 0x301   :  { %2875 = vmatprep.subr.bf16.mxu0 %v6690_v47 }
 0x302   :  { %2821 = vmatpush1.bf16.msra.mxu1 %v6505_v49  ;;  %v1320_v49 = vld [vmem:[#allocation10 + $0x2a0] sm:$0xff]  ;;  %2876 = vmatpush1.bf16.msra.mxu0 %v6689_v46  ;;  %v8337_v46 = vld [vmem:[#allocation10 + $0x10] sm:$0xff] }
 0x303   :  { %2822 = vmatprep.subr.bf16.mxu1 %v6514_v43  ;;  %v6570_v51 = vcombine.high %v1316_v48, %v1320_v49  ;;  %v6569_v53 = vcombine.low %v1316_v48, %v1320_v49  ;;  %v6698_v43 = vcombine.high %v1444_v50, %v1448_v52 }
 0x305   :  { %2877 = vmatprep.subr.bf16.mxu0 %v6698_v43 }
 0x306   :  { %2823 = vmatpush1.bf16.msra.mxu1 %v6513_v57  ;;  %v1328_v57 = vld [vmem:[#allocation10 + $0x2e0] sm:$0xff]  ;;  %2878 = vmatpush1.bf16.msra.mxu0 %v6697_v45 }
 0x307   :  { %2824 = vmatprep.subr.bf16.mxu1 %v6522_v63  ;;  %v6578_v59 = vcombine.high %v1324_v55, %v1328_v57  ;;  %v6577_v61 = vcombine.low %v1324_v55, %v1328_v57  ;;  %v6706_v63 = vcombine.high %v1452_v58, %v1456_v60 }
 0x309   :  { %2879 = vmatprep.subr.bf16.mxu0 %v6706_v63 }
 0x30a   :  { %2825 = vmatpush1.bf16.msra.mxu1 %v6521_v1  ;;  %v1336_v1 = vld [vmem:[#allocation10 + $0x320] sm:$0xff]  ;;  %2880 = vmatpush1.bf16.msra.mxu0 %v6705_v62 }
 0x30b   :  { %2826 = vmatprep.subr.bf16.mxu1 %v6530_v7  ;;  %v6586_v3 = vcombine.high %v1332_v0, %v1336_v1  ;;  %v6585_v5 = vcombine.low %v1332_v0, %v1336_v1  ;;  %v6714_v7 = vcombine.high %v1460_v2, %v1464_v4 }
 0x30d   :  { %2881 = vmatprep.subr.bf16.mxu0 %v6714_v7 }
 0x30e   :  { %2827 = vmatpush1.bf16.msra.mxu1 %v6529_v9  ;;  %v1344_v9 = vld [vmem:[#allocation10 + $0x360] sm:$0xff]  ;;  %2882 = vmatpush1.bf16.msra.mxu0 %v6713_v6 }
 0x30f   :  { %2828 = vmatprep.subr.bf16.mxu1 %v6538_v15  ;;  %v6594_v11 = vcombine.high %v1340_v8, %v1344_v9  ;;  %v6593_v13 = vcombine.low %v1340_v8, %v1344_v9  ;;  %v6722_v15 = vcombine.high %v1468_v10, %v1472_v12 }
 0x311   :  { %2883 = vmatprep.subr.bf16.mxu0 %v6722_v15 }
 0x312   :  { %2829 = vmatpush1.bf16.msra.mxu1 %v6537_v17  ;;  %v1348_v17 = vld [vmem:[#allocation10 + $0x380] sm:$0xff]  ;;  %2884 = vmatpush1.bf16.msra.mxu0 %v6721_v14 }
 0x313   :  { %2830 = vmatprep.subr.bf16.mxu1 %v6546_v23  ;;  %v6602_v20 = vcombine.high %v1348_v17, %v1352_v18  ;;  %v6601_v22 = vcombine.low %v1348_v17, %v1352_v18  ;;  %v6729_v23 = vcombine.low %v1476_v19, %v1480_v21  ;;  %2885 = vmatprep.subr.bf16.mxu0 %v6730_v24 }
 0x316   :  { %2831 = vmatpush1.bf16.msra.mxu1 %v6545_v25  ;;  %v611_v25 = vrot.slane %v8323_v16, %v8299_v56  ;;  %2886 = vmatpush1.bf16.msra.mxu0 %v6729_v23 }
 0x317   :  { %2832 = vmatprep.subr.bf16.mxu1 %v6554_v32  ;;  %v6610_v32 = vcombine.high %v1356_v27, %v1360_v28  ;;  %2887 = vmatprep.subr.bf16.mxu0 %v6738_v35 }
 0x31a   :  { %2833 = vmatpush1.bf16.msra.mxu1 %v6553_v34  ;;  %v6737_v34 = vcombine.low %v1484_v29, %v1488_v33 }
 0x31b   :  { %2834 = vmatprep.subr.bf16.mxu1 %v6562_v41 }
 0x31c   :  { %2888 = vmatpush1.bf16.msra.mxu0 %v6737_v34 }
 0x31e   :  { %2835 = vmatpush1.bf16.msra.mxu1 %v6561_v44  ;;  %v8335_v44 = vld [vmem:[#allocation10 + $0x28] sm:$0xff] }
 0x31f   :  { %2836 = vmatprep.subr.bf16.mxu1 %v6570_v51  ;;  %v6492_v50 = vcombine.high %v8333_v42, %v8335_v44  ;;  %v8344_v51 = vld [vmem:[#allocation10 + $0x30] sm:$0xff]  ;;  %v6491_v45 = vcombine.low %v8333_v42, %v8335_v44 }
 0x320   :  { %v6493_v43 = vcombine.low %v8337_v46, %v8344_v51  ;;  %v6494_v58 = vcombine.high %v8337_v46, %v8344_v51 }
 0x322   :  { %2837 = vmatpush1.bf16.msra.mxu1 %v6569_v53  ;;  %2980 = vmatprep.subr.bf16.mxu0 %v6494_v58 }
 0x323   :  { %2838 = vmatprep.subr.bf16.mxu1 %v6578_v59 }
 0x326   :  { %2839 = vmatpush1.bf16.msra.mxu1 %v6577_v61 }
 0x327   :  { %2840 = vmatprep.subr.bf16.mxu1 %v6586_v3 }
 0x32a   :  { %2841 = vmatpush1.bf16.msra.mxu1 %v6585_v5 }
 0x32b   :  { %2842 = vmatprep.subr.bf16.mxu1 %v6594_v11 }
 0x32e   :  { %2843 = vmatpush1.bf16.msra.mxu1 %v6593_v13 }
 0x32f   :  { %2844 = vmatprep.subr.bf16.mxu1 %v6602_v20 }
 0x332   :  { %2845 = vmatpush1.bf16.msra.mxu1 %v6601_v22 }
 0x333   :  { %2846 = vmatprep.subr.bf16.mxu1 %v6610_v32 }
 0x336   :  { %2847 = vmatpush1.bf16.msra.mxu1 %v6609_v31  ;;  %v8369_v31 = vsub.s32 3, %v8296_v54 }
 0x337   :  { %2898 = vmatprep.subr.bf16.mxu1 %v6492_v50 }
 0x338   :  { %v623_v33 = vrot.slane %v8323_v16, %v8369_v31 }
 0x38c   :  { %v982_v36 = vpop.f32.mrb[4].mxu1 }
 0x38d   :  { %v8329_v37 = vadd.f32 %v982_v36, %v611_v25  ;;  %v984_v38 = vpop.f32.mrb[5].mxu1 }
 0x38e   :  { %v8331_v40 = vadd.f32 %v984_v38, %v615_v30  ;;  %v986_v41 = vpop.f32.mrb[6].mxu1  ;;  %v8366_v30 = vsub.s32 2, %v8296_v54 }
 0x38f   :  { %v1030_v47 = vrot.slane %v8329_v37, 4  ;;  %v1058_v48 = vmul.f32 %v8329_v37, %v8329_v37  ;;  %v987_v49 = vpop.f32.mrb[7].mxu1 }
 0x390   :  { %v1036_v52 = vrot.slane %v8331_v40, 4  ;;  %v1059_v53 = vmul.f32 %v8331_v40, %v8331_v40  ;;  %v619_v32 = vrot.slane %v8323_v16, %v8366_v30 }
 0x391   :  { %v1031_v55 = vadd.f32 %v1030_v47, %v8329_v37  ;;  %v1062_v57 = vrot.slane %v1058_v48, 4 }
 0x392   :  { %v1037_v59 = vadd.f32 %v1036_v52, %v8331_v40  ;;  %v1068_v60 = vrot.slane %v1059_v53, 4 }
 0x393   :  { %v1032_v61 = vrot.slane %v1031_v55, 2  ;;  %v1063_v62 = vadd.f32 %v1062_v57, %v1058_v48 }
 0x394   :  { %v1038_v63 = vrot.slane %v1037_v59, 2  ;;  %v1069_v0 = vadd.f32 %v1068_v60, %v1059_v53 }
 0x395   :  { %v1033_v1 = vadd.f32 %v1032_v61, %v1031_v55  ;;  %v1064_v2 = vrot.slane %v1063_v62, 2 }
 0x396   :  { %v1039_v3 = vadd.f32 %v1038_v63, %v1037_v59  ;;  %v1070_v4 = vrot.slane %v1069_v0, 2 }
 0x397   :  { %v1034_v5 = vrot.slane %v1033_v1, 1  ;;  %v1065_v6 = vadd.f32 %v1064_v2, %v1063_v62 }
 0x398   :  { %v1040_v7 = vrot.slane %v1039_v3, 1  ;;  %v1071_v8 = vadd.f32 %v1070_v4, %v1069_v0 }
 0x399   :  { %v1035_v9 = vadd.f32 %v1034_v5, %v1033_v1  ;;  %v1066_v10 = vrot.slane %v1065_v6, 1 }
 0x39a   :  { %v1041_v11 = vadd.f32 %v1040_v7, %v1039_v3  ;;  %v1072_v12 = vrot.slane %v1071_v8, 1 }
 0x39b   :  { %v8357_v13 = vmul.f32 0.125, %v1035_v9  ;;  %v1067_v14 = vadd.f32 %v1066_v10, %v1065_v6 }
 0x39c   :  { %v8359_v15 = vmul.f32 0.125, %v1041_v11  ;;  %v1073_v17 = vadd.f32 %v1072_v12, %v1071_v8 }
 0x39d   :  { %v1086_v18 = vmul.f32 0.125, %v1067_v14  ;;  %v1090_v19 = vmul.f32 %v8357_v13, %v8357_v13 }
 0x39e   :  { %v1087_v20 = vmul.f32 0.125, %v1073_v17  ;;  %v1091_v21 = vmul.f32 %v8359_v15, %v8359_v15 }
 0x39f   :  { %v1094_v22 = vsub.f32 %v1086_v18, %v1090_v19 }
 0x3a0   :  { %v1095_v23 = vsub.f32 %v1087_v20, %v1091_v21 }
 0x3a1   :  { %v1098_v24 = vadd.f32 1e-05, %v1094_v22 }
 0x3a2   :  { %v1099_v25 = vadd.f32 1e-05, %v1095_v23 }
 0x3a3   :  { %7953 = vrsqrt.f32 %v1098_v24 }
 0x3a4   :  { %7955 = vrsqrt.f32 %v1099_v25 }
 0x3ad   :  { %v7954_v27 = vpop.eup %7953 }
 0x3ae   :  { %v7956_v28 = vpop.eup %7955 }
 0x3af   :  { %v1110_v29 = vcombine.low %v7954_v27, %v7956_v28 }
 0x3cc   :  { %v1023_v34 = vpop.f32.mrb[8].mxu1 }
 0x3cd   :  { %v8375_v35 = vadd.f32 %v1023_v34, %v619_v32  ;;  %v1025_v36 = vpop.f32.mrb[9].mxu1  ;;  %v1118_v32 = vrot.slane %v1110_v29, %v8309_v26 }
 0x3ce   :  { %v1026_v38 = vadd.f32 %v1025_v36, %v623_v33  ;;  %v1027_v41 = vpop.f32.mrb[10].mxu1  ;;  %v605_v36 = vld [vmem:[#allocation13 + $0xd] sm:$0xf] }
 0x3cf   :  { %v1042_v47 = vrot.slane %v8375_v35, 4  ;;  %v1060_v48 = vmul.f32 %v8375_v35, %v8375_v35  ;;  %v1028_v49 = vpop.f32.mrb[11].mxu1 }
 0x3d0   :  { %v1048_v50 = vrot.slane %v1026_v38, 4  ;;  %v1061_v52 = vmul.f32 %v1026_v38, %v1026_v38 }
 0x3d1   :  { %v1043_v53 = vadd.f32 %v1042_v47, %v8375_v35  ;;  %v1074_v55 = vrot.slane %v1060_v48, 4 }
 0x3d2   :  { %v1049_v57 = vadd.f32 %v1048_v50, %v1026_v38  ;;  %v1080_v58 = vrot.slane %v1061_v52, 4 }
 0x3d3   :  { %v1044_v16 = vrot.slane %v1043_v53, 2  ;;  %v1075_v59 = vadd.f32 %v1074_v55, %v1060_v48 }
 0x3d4   :  { %v1050_v60 = vrot.slane %v1049_v57, 2  ;;  %v1081_v61 = vadd.f32 %v1080_v58, %v1061_v52 }
 0x3d5   :  { %v1045_v62 = vadd.f32 %v1044_v16, %v1043_v53  ;;  %v1076_v63 = vrot.slane %v1075_v59, 2 }
 0x3d6   :  { %v1051_v0 = vadd.f32 %v1050_v60, %v1049_v57  ;;  %v1082_v1 = vrot.slane %v1081_v61, 2 }
 0x3d7   :  { %v1046_v2 = vrot.slane %v1045_v62, 1  ;;  %v1077_v3 = vadd.f32 %v1076_v63, %v1075_v59 }
 0x3d8   :  { %v1052_v4 = vrot.slane %v1051_v0, 1  ;;  %v1083_v5 = vadd.f32 %v1082_v1, %v1081_v61 }
 0x3d9   :  { %v1047_v6 = vadd.f32 %v1046_v2, %v1045_v62  ;;  %v1078_v7 = vrot.slane %v1077_v3, 1  ;;  %v606_v2 = vld [vmem:[#allocation13 + $0x11] sm:$0xf] }
 0x3da   :  { %v1053_v8 = vadd.f32 %v1052_v4, %v1051_v0  ;;  %v1084_v9 = vrot.slane %v1083_v5, 1 }
 0x3db   :  { %v1056_v10 = vmul.f32 0.125, %v1047_v6  ;;  %v1079_v11 = vadd.f32 %v1078_v7, %v1077_v3 }
 0x3dc   :  { %v1057_v12 = vmul.f32 0.125, %v1053_v8  ;;  %v1085_v14 = vadd.f32 %v1084_v9, %v1083_v5  ;;  %v1245_v9 = vld [vmem:[#allocation10 + $0x48] sm:$0xff] }
 0x3dd   :  { %v1088_v17 = vmul.f32 0.125, %v1079_v11  ;;  %v1092_v18 = vmul.f32 %v1056_v10, %v1056_v10 }
 0x3de   :  { %v1089_v19 = vmul.f32 0.125, %v1085_v14  ;;  %v1093_v20 = vmul.f32 %v1057_v12, %v1057_v12 }
 0x3df   :  { %v1096_v21 = vsub.f32 %v1088_v17, %v1092_v18  ;;  %v1249_v17 = vld [vmem:[#allocation10 + $0x68] sm:$0xff]  ;;  %v1246_v18 = vld [vmem:[#allocation10 + $0x50] sm:$0xff] }
 0x3e0   :  { %v1097_v22 = vsub.f32 %v1089_v19, %v1093_v20  ;;  %v1250_v19 = vld [vmem:[#allocation10 + $0x70] sm:$0xff] }
 0x3e1   :  { %v1100_v23 = vadd.f32 1e-05, %v1096_v21 }
 0x3e2   :  { %v1101_v24 = vadd.f32 1e-05, %v1097_v22 }
 0x3e3   :  { %7957 = vrsqrt.f32 %v1100_v23 }
 0x3e4   :  { %7959 = vrsqrt.f32 %v1101_v24 }
 0x3ed   :  { %v7958_v25 = vpop.eup %7957 }
 0x3ee   :  { %v7960_v27 = vpop.eup %7959 }
 0x3ef   :  { %v1111_v28 = vcombine.low %v7958_v25, %v7960_v27  ;;  %v1253_v27 = vld [vmem:[#allocation10 + $0x88] sm:$0xff] }
 0x3f1   :  { %v1125_v33 = vrot.slane %v1111_v28, %v8309_v26  ;;  %v6500_v28 = vcombine.high %v1245_v9, %v1249_v17 }
 0x3f3   :  { %v1126_v34 = vcombine.low %v1118_v32, %v1125_v33  ;;  %v6502_v32 = vcombine.high %v1246_v18, %v1250_v19  ;;  %v1257_v33 = vld [vmem:[#allocation10 + $0xa8] sm:$0xff] }
 0x3f4   :  { %v6507_v42 = vcombine.low %v1253_v27, %v1257_v33 }
 0x3f5   :  { %v1133_v41 = vrot.slane %v1126_v34, %v8309_v26  ;;  %v1254_v34 = vld [vmem:[#allocation10 + $0x90] sm:$0xff] }
 0x3f7   :  { %v1135_v47 = vmul.f32 %v1133_v41, %v605_v36  ;;  %v1258_v36 = vld [vmem:[#allocation10 + $0xb0] sm:$0xff]  ;;  %v6499_v41 = vcombine.low %v1245_v9, %v1249_v17 }
 0x3f8   :  { %v6509_v44 = vcombine.low %v1254_v34, %v1258_v36  ;;  %v1294_v9 = vld [vmem:[#allocation10 + $0x1d0] sm:$0xff] }
 0x3f9   :  { %v1140_v48 = vrot.slane %v1135_v47, %v8299_v56  ;;  %v1144_v49 = vrot.slane %v1135_v47, %v8304_v39  ;;  %v1148_v50 = vrot.slane %v1135_v47, %v8366_v30  ;;  %v1152_v52 = vrot.slane %v1135_v47, %v8369_v31 }
 0x3fa   :  { %v6501_v47 = vcombine.low %v1246_v18, %v1250_v19  ;;  %v1301_v18 = vld [vmem:[#allocation10 + $0x208] sm:$0xff] }
 0x3fb   :  { %v1157_v53 = vmul.f32 %v1140_v48, %v8357_v13  ;;  %v1158_v55 = vmul.f32 %v1144_v49, %v8359_v15  ;;  %v1159_v29 = vmul.f32 %v1148_v50, %v1056_v10  ;;  %v1160_v57 = vmul.f32 %v1152_v52, %v1057_v12  ;;  %v1305_v19 = vld [vmem:[#allocation10 + $0x228] sm:$0xff] }
 0x3fc   :  { %v1194_v58 = vmul.f32 %v1152_v52, %v1026_v38  ;;  %v1192_v16 = vmul.f32 %v1144_v49, %v8331_v40  ;;  %v1191_v59 = vmul.f32 %v1140_v48, %v8329_v37  ;;  %v1193_v60 = vmul.f32 %v1148_v50, %v8375_v35  ;;  %v1261_v50 = vld [vmem:[#allocation10 + $0xc8] sm:$0xff] }
 0x3fd   :  { %v1165_v61 = vcombine.low %v1157_v53, %v1158_v55  ;;  %v1166_v62 = vcombine.low %v1159_v29, %v1160_v57  ;;  %v6508_v48 = vcombine.high %v1253_v27, %v1257_v33  ;;  %v6510_v49 = vcombine.high %v1254_v34, %v1258_v36  ;;  %v1265_v52 = vld [vmem:[#allocation10 + $0xe8] sm:$0xff]  ;;  %v1262_v53 = vld [vmem:[#allocation10 + $0xd0] sm:$0xff] }
 0x3fe   :  { %v1266_v55 = vld [vmem:[#allocation10 + $0xf0] sm:$0xff]  ;;  %v6516_v46 = vcombine.high %v1261_v50, %v1265_v52  ;;  %v1309_v34 = vld [vmem:[#allocation10 + $0x248] sm:$0xff] }
 0x3ff   :  { %v1173_v63 = vrot.slane %v1165_v61, %v8309_v26  ;;  %v1180_v0 = vrot.slane %v1166_v62, %v8309_v26  ;;  %v6518_v51 = vcombine.high %v1262_v53, %v1266_v55  ;;  %v1270_v29 = vld [vmem:[#allocation10 + $0x110] sm:$0xff]  ;;  %v1277_v61 = vld [vmem:[#allocation10 + $0x148] sm:$0xff] }
 0x400   :  { %v1274_v57 = vld [vmem:[#allocation10 + $0x130] sm:$0xff]  ;;  %v1281_v62 = vld [vmem:[#allocation10 + $0x168] sm:$0xff] }
 0x401   :  { %v1181_v1 = vcombine.low %v1173_v63, %v1180_v0  ;;  %v1278_v63 = vld [vmem:[#allocation10 + $0x150] sm:$0xff]  ;;  %v1313_v36 = vld [vmem:[#allocation10 + $0x268] sm:$0xff] }
 0x402   :  { %v1282_v0 = vld [vmem:[#allocation10 + $0x170] sm:$0xff] }
 0x403   :  { %v1188_v13 = vrot.slane %v1181_v1, %v8309_v26 }
 0x405   :  { %v1190_v15 = vsub.f32 %v606_v2, %v1188_v13  ;;  %v6525_v2 = vcombine.low %v1270_v29, %v1274_v57  ;;  %v6532_v13 = vcombine.high %v1277_v61, %v1281_v62 }
 0x407   :  { %v1211_v3 = vrot.slane %v1190_v15, %v8369_v31  ;;  %v1203_v38 = vrot.slane %v1190_v15, %v8304_v39  ;;  %v1199_v40 = vrot.slane %v1190_v15, %v8299_v56  ;;  %v1207_v37 = vrot.slane %v1190_v15, %v8366_v30 }
 0x408   :  { %v6534_v15 = vcombine.high %v1278_v63, %v1282_v0 }
 0x409   :  { %v1219_v35 = vadd.f32 %v1211_v3, %v1194_v58  ;;  %v1217_v4 = vadd.f32 %v1203_v38, %v1192_v16  ;;  %v1216_v5 = vadd.f32 %v1199_v40, %v1191_v59  ;;  %v1218_v6 = vadd.f32 %v1207_v37, %v1193_v60  ;;  %v1285_v3 = vld [vmem:[#allocation10 + $0x188] sm:$0xff]  ;;  %v1286_v40 = vld [vmem:[#allocation10 + $0x190] sm:$0xff] }
 0x40a   :  { %v6515_v58 = vcombine.low %v1261_v50, %v1265_v52  ;;  %v6517_v16 = vcombine.low %v1262_v53, %v1266_v55  ;;  %v6526_v60 = vcombine.high %v1270_v29, %v1274_v57  ;;  %v1289_v38 = vld [vmem:[#allocation10 + $0x1a8] sm:$0xff]  ;;  %v1290_v37 = vld [vmem:[#allocation10 + $0x1b0] sm:$0xff]  ;;  %v6564_v50 = vcombine.high %v1309_v34, %v1313_v36 }
 0x40b   :  { %vm1221_vm5 = vcmp.gt.f32.partialorder %v1217_v4, 0.0  ;;  %v1225_v7 = vmul.f32 0.2, %v1217_v4  ;;  %vm1223_vm6 = vcmp.gt.f32.partialorder %v1219_v35, 0.0  ;;  %v1227_v8 = vmul.f32 0.2, %v1219_v35 }
 0x40c   :  { %vm1220_vm7 = vcmp.gt.f32.partialorder %v1216_v5, 0.0  ;;  %v1224_v10 = vmul.f32 0.2, %v1216_v5  ;;  %vm1222_vm8 = vcmp.gt.f32.partialorder %v1218_v6, 0.0  ;;  %v1226_v11 = vmul.f32 0.2, %v1218_v6 }
 0x40d   :  { %v1229_v12 = vsel %vm1221_vm5, %v1217_v4, %v1225_v7  ;;  %v1231_v14 = vsel %vm1223_vm6, %v1219_v35, %v1227_v8  ;;  %v6531_v35 = vcombine.low %v1277_v61, %v1281_v62  ;;  %v6533_v4 = vcombine.low %v1278_v63, %v1282_v0  ;;  %v1293_v7 = vld [vmem:[#allocation10 + $0x1c8] sm:$0xff] }
 0x40e   :  { %v8400_v20 = vpack.c.bf16 %v1229_v12, %v1229_v12  ;;  %v8402_v21 = vpack.c.bf16 %v1231_v14, %v1231_v14  ;;  %v1228_v22 = vsel %vm1220_vm7, %v1216_v5, %v1224_v10  ;;  %v1230_v23 = vsel %vm1222_vm8, %v1218_v6, %v1226_v11  ;;  %v1297_v8 = vld [vmem:[#allocation10 + $0x1e8] sm:$0xff]  ;;  %v1298_v10 = vld [vmem:[#allocation10 + $0x1f0] sm:$0xff] }
 0x40f   :  { %v8404_v24 = vpack.c.bf16 %v1228_v22, %v1228_v22  ;;  %v8406_v25 = vpack.c.bf16 %v1230_v23, %v1230_v23  ;;  %v6540_v5 = vcombine.high %v1285_v3, %v1289_v38  ;;  %v6542_v6 = vcombine.high %v1286_v40, %v1290_v37  ;;  %v1302_v22 = vld [vmem:[#allocation10 + $0x210] sm:$0xff]  ;;  %v1317_v53 = vld [vmem:[#allocation10 + $0x288] sm:$0xff] }
 0x410   :  { %2848 = vmatprep.mubr.bf16.mxu1 %v8400_v20  ;;  %2889 = vmatprep.mubr.bf16.mxu0 %v8402_v21  ;;  %v6539_v11 = vcombine.low %v1285_v3, %v1289_v38  ;;  %v6541_v12 = vcombine.low %v1286_v40, %v1290_v37  ;;  %v6548_v14 = vcombine.high %v1293_v7, %v1297_v8  ;;  %v1306_v23 = vld [vmem:[#allocation10 + $0x230] sm:$0xff]  ;;  %v1321_v55 = vld [vmem:[#allocation10 + $0x2a8] sm:$0xff] }
 0x411   :  { %2849 = vmatmul.mubr.bf16.vlgmr.msra.gmra.mrb[12].mxu1 %v8404_v24  ;;  %2890 = vmatmul.mubr.bf16.vlgmr.msra.gmra.mrb[4].mxu0 %v8406_v25  ;;  %v6550_v17 = vcombine.high %v1294_v9, %v1298_v10  ;;  %v6547_v27 = vcombine.low %v1293_v7, %v1297_v8  ;;  %v6558_v33 = vcombine.high %v1302_v22, %v1306_v23  ;;  %v1325_v29 = vld [vmem:[#allocation10 + $0x2c8] sm:$0xff] }
 0x412   :  { %2899 = vmatpush1.bf16.msra.mxu1 %v6491_v45  ;;  %2981 = vmatpush1.bf16.msra.mxu0 %v6493_v43  ;;  %v1269_v45 = vld [vmem:[#allocation10 + $0x108] sm:$0xff] }
 0x413   :  { %2930 = vmatprep.mubr.bf16.mxu1 %v8400_v20  ;;  %3012 = vmatprep.mubr.bf16.mxu0 %v8400_v20  ;;  %v1273_v43 = vld [vmem:[#allocation10 + $0x128] sm:$0xff] }
 0x414   :  { %2900 = vmatprep.subr.bf16.mxu1 %v6500_v28  ;;  %2982 = vmatprep.subr.bf16.mxu0 %v6502_v32  ;;  %v6524_v59 = vcombine.high %v1269_v45, %v1273_v43  ;;  %v6523_v1 = vcombine.low %v1269_v45, %v1273_v43  ;;  %v6549_v28 = vcombine.low %v1294_v9, %v1298_v10  ;;  %v1329_v57 = vld [vmem:[#allocation10 + $0x2e8] sm:$0xff] }
 0x415   :  { %v6556_v32 = vcombine.high %v1301_v18, %v1305_v19  ;;  %v6572_v45 = vcombine.high %v1317_v53, %v1321_v55  ;;  %v6580_v61 = vcombine.high %v1325_v29, %v1329_v57  ;;  %v1333_v63 = vld [vmem:[#allocation10 + $0x308] sm:$0xff] }
 0x416   :  { %2901 = vmatpush1.bf16.msra.mxu1 %v6499_v41  ;;  %2983 = vmatpush1.bf16.msra.mxu0 %v6501_v47  ;;  %v1310_v41 = vld [vmem:[#allocation10 + $0x250] sm:$0xff]  ;;  %v1337_v0 = vld [vmem:[#allocation10 + $0x328] sm:$0xff] }
 0x417   :  { %2902 = vmatprep.subr.bf16.mxu1 %v6508_v48  ;;  %2984 = vmatprep.subr.bf16.mxu0 %v6510_v49  ;;  %v1314_v47 = vld [vmem:[#allocation10 + $0x270] sm:$0xff]  ;;  %v6555_v48 = vcombine.low %v1301_v18, %v1305_v19  ;;  %v6557_v49 = vcombine.low %v1302_v22, %v1306_v23  ;;  %v6588_v3 = vcombine.high %v1333_v63, %v1337_v0  ;;  %v1341_v40 = vld [vmem:[#allocation10 + $0x348] sm:$0xff] }
 0x418   :  { %v6566_v52 = vcombine.high %v1310_v41, %v1314_v47  ;;  %v1345_v37 = vld [vmem:[#allocation10 + $0x368] sm:$0xff] }
 0x419   :  { %v6596_v7 = vcombine.high %v1341_v40, %v1345_v37  ;;  %v1349_v9 = vld [vmem:[#allocation10 + $0x388] sm:$0xff] }
 0x41a   :  { %2903 = vmatpush1.bf16.msra.mxu1 %v6507_v42  ;;  %2985 = vmatpush1.bf16.msra.mxu0 %v6509_v44  ;;  %v1318_v42 = vld [vmem:[#allocation10 + $0x290] sm:$0xff]  ;;  %v1353_v10 = vld [vmem:[#allocation10 + $0x3a8] sm:$0xff] }
 0x41b   :  { %2904 = vmatprep.subr.bf16.mxu1 %v6516_v46  ;;  %2986 = vmatprep.subr.bf16.mxu0 %v6518_v51  ;;  %v1322_v44 = vld [vmem:[#allocation10 + $0x2b0] sm:$0xff]  ;;  %v6563_v46 = vcombine.low %v1309_v34, %v1313_v36  ;;  %v6565_v51 = vcombine.low %v1310_v41, %v1314_v47  ;;  %v6604_v18 = vcombine.high %v1349_v9, %v1353_v10  ;;  %v1357_v22 = vld [vmem:[#allocation10 + $0x3c8] sm:$0xff] }
 0x41c   :  { %v6574_v43 = vcombine.high %v1318_v42, %v1322_v44  ;;  %v1361_v23 = vld [vmem:[#allocation10 + $0x3e8] sm:$0xff] }
 0x41d   :  { %v6612_v34 = vcombine.high %v1357_v22, %v1361_v23  ;;  %v1365_v41 = vld [vmem:[#allocation10 + $0x408] sm:$0xff] }
 0x41e   :  { %2905 = vmatpush1.bf16.msra.mxu1 %v6515_v58  ;;  %2987 = vmatpush1.bf16.msra.mxu0 %v6517_v16  ;;  %v1326_v58 = vld [vmem:[#allocation10 + $0x2d0] sm:$0xff]  ;;  %v1369_v47 = vld [vmem:[#allocation10 + $0x428] sm:$0xff] }
 0x41f   :  { %2906 = vmatprep.subr.bf16.mxu1 %v6524_v59  ;;  %2988 = vmatprep.subr.bf16.mxu0 %v6526_v60  ;;  %v1330_v16 = vld [vmem:[#allocation10 + $0x2f0] sm:$0xff]  ;;  %v6571_v59 = vcombine.low %v1317_v53, %v1321_v55  ;;  %v6573_v60 = vcombine.low %v1318_v42, %v1322_v44  ;;  %v6620_v53 = vcombine.high %v1365_v41, %v1369_v47  ;;  %v1373_v42 = vld [vmem:[#allocation10 + $0x448] sm:$0xff] }
 0x420   :  { %v6582_v62 = vcombine.high %v1326_v58, %v1330_v16  ;;  %v1377_v44 = vld [vmem:[#allocation10 + $0x468] sm:$0xff] }
 0x422   :  { %2907 = vmatpush1.bf16.msra.mxu1 %v6523_v1  ;;  %2989 = vmatpush1.bf16.msra.mxu0 %v6525_v2  ;;  %v1334_v1 = vld [vmem:[#allocation10 + $0x310] sm:$0xff] }
 0x423   :  { %2908 = vmatprep.subr.bf16.mxu1 %v6532_v13  ;;  %2990 = vmatprep.subr.bf16.mxu0 %v6534_v15  ;;  %v1338_v2 = vld [vmem:[#allocation10 + $0x330] sm:$0xff]  ;;  %v6579_v13 = vcombine.low %v1325_v29, %v1329_v57  ;;  %v6581_v15 = vcombine.low %v1326_v58, %v1330_v16  ;;  %v6628_v29 = vcombine.high %v1373_v42, %v1377_v44  ;;  %v1381_v58 = vld [vmem:[#allocation10 + $0x488] sm:$0xff] }
 0x424   :  { %v6590_v38 = vcombine.high %v1334_v1, %v1338_v2  ;;  %v1385_v16 = vld [vmem:[#allocation10 + $0x4a8] sm:$0xff] }
 0x426   :  { %2909 = vmatpush1.bf16.msra.mxu1 %v6531_v35  ;;  %2991 = vmatpush1.bf16.msra.mxu0 %v6533_v4  ;;  %v1342_v35 = vld [vmem:[#allocation10 + $0x350] sm:$0xff] }
 0x427   :  { %2910 = vmatprep.subr.bf16.mxu1 %v6540_v5  ;;  %2992 = vmatprep.subr.bf16.mxu0 %v6542_v6  ;;  %v1346_v4 = vld [vmem:[#allocation10 + $0x370] sm:$0xff]  ;;  %v6587_v5 = vcombine.low %v1333_v63, %v1337_v0  ;;  %v6589_v6 = vcombine.low %v1334_v1, %v1338_v2  ;;  %v6636_v63 = vcombine.high %v1381_v58, %v1385_v16  ;;  %v1389_v1 = vld [vmem:[#allocation10 + $0x4c8] sm:$0xff] }
 0x428   :  { %v6598_v8 = vcombine.high %v1342_v35, %v1346_v4  ;;  %v1393_v2 = vld [vmem:[#allocation10 + $0x4e8] sm:$0xff] }
 0x42a   :  { %2911 = vmatpush1.bf16.msra.mxu1 %v6539_v11  ;;  %2993 = vmatpush1.bf16.msra.mxu0 %v6541_v12  ;;  %v1350_v11 = vld [vmem:[#allocation10 + $0x390] sm:$0xff] }
 0x42b   :  { %2912 = vmatprep.subr.bf16.mxu1 %v6548_v14  ;;  %2994 = vmatprep.subr.bf16.mxu0 %v6550_v17  ;;  %v1354_v12 = vld [vmem:[#allocation10 + $0x3b0] sm:$0xff]  ;;  %v6595_v14 = vcombine.low %v1341_v40, %v1345_v37  ;;  %v6597_v17 = vcombine.low %v1342_v35, %v1346_v4  ;;  %v6644_v40 = vcombine.high %v1389_v1, %v1393_v2  ;;  %v1397_v35 = vld [vmem:[#allocation10 + $0x508] sm:$0xff] }
 0x42c   :  { %v6606_v19 = vcombine.high %v1350_v11, %v1354_v12  ;;  %v1401_v4 = vld [vmem:[#allocation10 + $0x528] sm:$0xff] }
 0x42e   :  { %2913 = vmatpush1.bf16.msra.mxu1 %v6547_v27  ;;  %2995 = vmatpush1.bf16.msra.mxu0 %v6549_v28  ;;  %v1358_v27 = vld [vmem:[#allocation10 + $0x3d0] sm:$0xff] }
 0x42f   :  { %2914 = vmatprep.subr.bf16.mxu1 %v6556_v32  ;;  %2996 = vmatprep.subr.bf16.mxu0 %v6558_v33  ;;  %v1362_v28 = vld [vmem:[#allocation10 + $0x3f0] sm:$0xff]  ;;  %v6603_v32 = vcombine.low %v1349_v9, %v1353_v10  ;;  %v6605_v33 = vcombine.low %v1350_v11, %v1354_v12  ;;  %v6652_v9 = vcombine.high %v1397_v35, %v1401_v4  ;;  %v1405_v11 = vld [vmem:[#allocation10 + $0x548] sm:$0xff] }
 0x430   :  { %v6614_v36 = vcombine.high %v1358_v27, %v1362_v28  ;;  %v1409_v12 = vld [vmem:[#allocation10 + $0x568] sm:$0xff] }
 0x432   :  { %2915 = vmatpush1.bf16.msra.mxu1 %v6555_v48  ;;  %2997 = vmatpush1.bf16.msra.mxu0 %v6557_v49  ;;  %v1366_v48 = vld [vmem:[#allocation10 + $0x410] sm:$0xff] }
 0x433   :  { %2916 = vmatprep.subr.bf16.mxu1 %v6564_v50  ;;  %2998 = vmatprep.subr.bf16.mxu0 %v6566_v52  ;;  %v1370_v49 = vld [vmem:[#allocation10 + $0x430] sm:$0xff]  ;;  %v6611_v50 = vcombine.low %v1357_v22, %v1361_v23  ;;  %v6613_v52 = vcombine.low %v1358_v27, %v1362_v28  ;;  %v6660_v22 = vcombine.high %v1405_v11, %v1409_v12  ;;  %v1413_v27 = vld [vmem:[#allocation10 + $0x588] sm:$0xff] }
 0x434   :  { %v6622_v55 = vcombine.high %v1366_v48, %v1370_v49  ;;  %v1417_v28 = vld [vmem:[#allocation10 + $0x5a8] sm:$0xff] }
 0x436   :  { %2917 = vmatpush1.bf16.msra.mxu1 %v6563_v46  ;;  %2999 = vmatpush1.bf16.msra.mxu0 %v6565_v51  ;;  %v1374_v46 = vld [vmem:[#allocation10 + $0x450] sm:$0xff] }
 0x437   :  { %2918 = vmatprep.subr.bf16.mxu1 %v6572_v45  ;;  %3000 = vmatprep.subr.bf16.mxu0 %v6574_v43  ;;  %v1378_v51 = vld [vmem:[#allocation10 + $0x470] sm:$0xff]  ;;  %v6619_v45 = vcombine.low %v1365_v41, %v1369_v47  ;;  %v6621_v43 = vcombine.low %v1366_v48, %v1370_v49  ;;  %v6668_v41 = vcombine.high %v1413_v27, %v1417_v28  ;;  %v1421_v48 = vld [vmem:[#allocation10 + $0x5c8] sm:$0xff] }
 0x438   :  { %v6630_v57 = vcombine.high %v1374_v46, %v1378_v51  ;;  %v1425_v49 = vld [vmem:[#allocation10 + $0x5e8] sm:$0xff] }
 0x43a   :  { %2919 = vmatpush1.bf16.msra.mxu1 %v6571_v59  ;;  %3001 = vmatpush1.bf16.msra.mxu0 %v6573_v60  ;;  %v1382_v59 = vld [vmem:[#allocation10 + $0x490] sm:$0xff] }
 0x43b   :  { %2920 = vmatprep.subr.bf16.mxu1 %v6580_v61  ;;  %3002 = vmatprep.subr.bf16.mxu0 %v6582_v62  ;;  %v1386_v60 = vld [vmem:[#allocation10 + $0x4b0] sm:$0xff]  ;;  %v6627_v61 = vcombine.low %v1373_v42, %v1377_v44  ;;  %v6629_v62 = vcombine.low %v1374_v46, %v1378_v51  ;;  %v6676_v42 = vcombine.high %v1421_v48, %v1425_v49  ;;  %v1429_v46 = vld [vmem:[#allocation10 + $0x608] sm:$0xff] }
 0x43c   :  { %v6638_v0 = vcombine.high %v1382_v59, %v1386_v60  ;;  %v1433_v51 = vld [vmem:[#allocation10 + $0x628] sm:$0xff] }
 0x43e   :  { %2921 = vmatpush1.bf16.msra.mxu1 %v6579_v13  ;;  %3003 = vmatpush1.bf16.msra.mxu0 %v6581_v15  ;;  %v1390_v13 = vld [vmem:[#allocation10 + $0x4d0] sm:$0xff] }
 0x43f   :  { %2922 = vmatprep.subr.bf16.mxu1 %v6588_v3  ;;  %3004 = vmatprep.subr.bf16.mxu0 %v6590_v38  ;;  %v1394_v15 = vld [vmem:[#allocation10 + $0x4f0] sm:$0xff]  ;;  %v6635_v3 = vcombine.low %v1381_v58, %v1385_v16  ;;  %v6637_v38 = vcombine.low %v1382_v59, %v1386_v60  ;;  %v6684_v58 = vcombine.high %v1429_v46, %v1433_v51  ;;  %v1437_v59 = vld [vmem:[#allocation10 + $0x648] sm:$0xff] }
 0x440   :  { %v6646_v37 = vcombine.high %v1390_v13, %v1394_v15  ;;  %v1441_v60 = vld [vmem:[#allocation10 + $0x668] sm:$0xff] }
 0x442   :  { %2923 = vmatpush1.bf16.msra.mxu1 %v6587_v5  ;;  %3005 = vmatpush1.bf16.msra.mxu0 %v6589_v6  ;;  %v1398_v5 = vld [vmem:[#allocation10 + $0x510] sm:$0xff] }
 0x443   :  { %2924 = vmatprep.subr.bf16.mxu1 %v6596_v7  ;;  %3006 = vmatprep.subr.bf16.mxu0 %v6598_v8  ;;  %v1402_v6 = vld [vmem:[#allocation10 + $0x530] sm:$0xff]  ;;  %v6643_v7 = vcombine.low %v1389_v1, %v1393_v2  ;;  %v6645_v8 = vcombine.low %v1390_v13, %v1394_v15  ;;  %v6692_v1 = vcombine.high %v1437_v59, %v1441_v60  ;;  %v1445_v13 = vld [vmem:[#allocation10 + $0x688] sm:$0xff] }
 0x444   :  { %v6654_v10 = vcombine.high %v1398_v5, %v1402_v6  ;;  %v1449_v15 = vld [vmem:[#allocation10 + $0x6a8] sm:$0xff] }
 0x446   :  { %2925 = vmatpush1.bf16.msra.mxu1 %v6595_v14  ;;  %3007 = vmatpush1.bf16.msra.mxu0 %v6597_v17  ;;  %v1406_v14 = vld [vmem:[#allocation10 + $0x550] sm:$0xff] }
 0x447   :  { %2926 = vmatprep.subr.bf16.mxu1 %v6604_v18  ;;  %3008 = vmatprep.subr.bf16.mxu0 %v6606_v19  ;;  %v1410_v17 = vld [vmem:[#allocation10 + $0x570] sm:$0xff]  ;;  %v6651_v18 = vcombine.low %v1397_v35, %v1401_v4  ;;  %v6653_v19 = vcombine.low %v1398_v5, %v1402_v6  ;;  %v6700_v35 = vcombine.high %v1445_v13, %v1449_v15  ;;  %v1453_v5 = vld [vmem:[#allocation10 + $0x6c8] sm:$0xff] }
 0x448   :  { %v6662_v23 = vcombine.high %v1406_v14, %v1410_v17  ;;  %v1457_v6 = vld [vmem:[#allocation10 + $0x6e8] sm:$0xff] }
 0x44a   :  { %2927 = vmatpush1.bf16.msra.mxu1 %v6603_v32  ;;  %3009 = vmatpush1.bf16.msra.mxu0 %v6605_v33  ;;  %v1414_v32 = vld [vmem:[#allocation10 + $0x590] sm:$0xff] }
 0x44b   :  { %2928 = vmatprep.subr.bf16.mxu1 %v6612_v34  ;;  %3010 = vmatprep.subr.bf16.mxu0 %v6614_v36  ;;  %v1418_v33 = vld [vmem:[#allocation10 + $0x5b0] sm:$0xff]  ;;  %v6659_v34 = vcombine.low %v1405_v11, %v1409_v12  ;;  %v6661_v36 = vcombine.low %v1406_v14, %v1410_v17  ;;  %v6708_v11 = vcombine.high %v1453_v5, %v1457_v6  ;;  %v1461_v14 = vld [vmem:[#allocation10 + $0x708] sm:$0xff] }
 0x44c   :  { %v6670_v47 = vcombine.high %v1414_v32, %v1418_v33  ;;  %v1465_v17 = vld [vmem:[#allocation10 + $0x728] sm:$0xff] }
 0x44e   :  { %2929 = vmatpush1.bf16.msra.mxu1 %v6611_v50  ;;  %3011 = vmatpush1.bf16.msra.mxu0 %v6613_v52  ;;  %v1422_v50 = vld [vmem:[#allocation10 + $0x5d0] sm:$0xff] }
 0x44f   :  { %2939 = vmatprep.subr.bf16.mxu1 %v6620_v53  ;;  %3021 = vmatprep.subr.bf16.mxu0 %v6622_v55  ;;  %v1426_v52 = vld [vmem:[#allocation10 + $0x5f0] sm:$0xff]  ;;  %v6667_v53 = vcombine.low %v1413_v27, %v1417_v28  ;;  %v6669_v55 = vcombine.low %v1414_v32, %v1418_v33  ;;  %v6716_v27 = vcombine.high %v1461_v14, %v1465_v17  ;;  %v1469_v32 = vld [vmem:[#allocation10 + $0x748] sm:$0xff] }
 0x450   :  { %v6678_v44 = vcombine.high %v1422_v50, %v1426_v52  ;;  %v1473_v33 = vld [vmem:[#allocation10 + $0x768] sm:$0xff] }
 0x451   :  { %2931 = vmatmul.mubr.bf16.vlgmr.msra.gmra.mrb[16].mxu1 %v8404_v24  ;;  %3013 = vmatmul.mubr.bf16.vlgmr.msra.gmra.mrb[8].mxu0 %v8404_v24 }
 0x452   :  { %2940 = vmatpush1.bf16.msra.mxu1 %v6619_v45  ;;  %2971 = vmatprep.mubr.bf16.mxu1 %v8402_v21  ;;  %v1430_v45 = vld [vmem:[#allocation10 + $0x610] sm:$0xff] }
 0x453   :  { %3022 = vmatpush1.bf16.msra.mxu0 %v6621_v43  ;;  %3053 = vmatprep.mubr.bf16.mxu0 %v8402_v21  ;;  %v1434_v43 = vld [vmem:[#allocation10 + $0x630] sm:$0xff] }
 0x454   :  { %2941 = vmatprep.subr.bf16.mxu1 %v6628_v29  ;;  %3023 = vmatprep.subr.bf16.mxu0 %v6630_v57  ;;  %v6675_v29 = vcombine.low %v1421_v48, %v1425_v49  ;;  %v6677_v57 = vcombine.low %v1422_v50, %v1426_v52  ;;  %v6686_v16 = vcombine.high %v1430_v45, %v1434_v43  ;;  %v1477_v50 = vld [vmem:[#allocation10 + $0x788] sm:$0xff] }
 0x455   :  { %v6724_v48 = vcombine.high %v1469_v32, %v1473_v33  ;;  %v1481_v52 = vld [vmem:[#allocation10 + $0x7a8] sm:$0xff] }
 0x456   :  { %2942 = vmatpush1.bf16.msra.mxu1 %v6627_v61  ;;  %v1438_v61 = vld [vmem:[#allocation10 + $0x650] sm:$0xff] }
 0x457   :  { %3024 = vmatpush1.bf16.msra.mxu0 %v6629_v62  ;;  %2943 = vmatprep.subr.bf16.mxu1 %v6636_v63  ;;  %v1442_v62 = vld [vmem:[#allocation10 + $0x670] sm:$0xff]  ;;  %v6683_v63 = vcombine.low %v1429_v46, %v1433_v51  ;;  %v6732_v46 = vcombine.high %v1477_v50, %v1481_v52 }
 0x458   :  { %3025 = vmatprep.subr.bf16.mxu0 %v6638_v0  ;;  %v6685_v0 = vcombine.low %v1430_v45, %v1434_v43  ;;  %v6694_v2 = vcombine.high %v1438_v61, %v1442_v62  ;;  %v1485_v45 = vld [vmem:[#allocation10 + $0x7c8] sm:$0xff] }
 0x459   :  { %v1489_v43 = vld [vmem:[#allocation10 + $0x7e8] sm:$0xff] }
 0x45a   :  { %2944 = vmatpush1.bf16.msra.mxu1 %v6635_v3  ;;  %v1446_v3 = vld [vmem:[#allocation10 + $0x690] sm:$0xff] }
 0x45b   :  { %3026 = vmatpush1.bf16.msra.mxu0 %v6637_v38  ;;  %2945 = vmatprep.subr.bf16.mxu1 %v6644_v40  ;;  %v1450_v38 = vld [vmem:[#allocation10 + $0x6b0] sm:$0xff]  ;;  %v6691_v40 = vcombine.low %v1437_v59, %v1441_v60  ;;  %v6740_v59 = vcombine.high %v1485_v45, %v1489_v43 }
 0x45c   :  { %3027 = vmatprep.subr.bf16.mxu0 %v6646_v37  ;;  %v6693_v37 = vcombine.low %v1438_v61, %v1442_v62  ;;  %v6702_v4 = vcombine.high %v1446_v3, %v1450_v38  ;;  %v1239_v61 = vld [vmem:[#allocation10 + $0x18] sm:$0xff] }
 0x45d   :  { %v1243_v62 = vld [vmem:[#allocation10 + $0x38] sm:$0xff] }
 0x45e   :  { %2946 = vmatpush1.bf16.msra.mxu1 %v6643_v7  ;;  %v1454_v7 = vld [vmem:[#allocation10 + $0x6d0] sm:$0xff] }
 0x45f   :  { %3028 = vmatpush1.bf16.msra.mxu0 %v6645_v8  ;;  %2947 = vmatprep.subr.bf16.mxu1 %v6652_v9  ;;  %v1458_v8 = vld [vmem:[#allocation10 + $0x6f0] sm:$0xff]  ;;  %v6699_v9 = vcombine.low %v1445_v13, %v1449_v15  ;;  %v1251_v13 = vld [vmem:[#allocation10 + $0x78] sm:$0xff]  ;;  %v6495_v15 = vcombine.low %v1239_v61, %v1243_v62 }
 0x460   :  { %3029 = vmatprep.subr.bf16.mxu0 %v6654_v10  ;;  %v6701_v10 = vcombine.low %v1446_v3, %v1450_v38  ;;  %v6710_v12 = vcombine.high %v1454_v7, %v1458_v8  ;;  %v1255_v38 = vld [vmem:[#allocation10 + $0x98] sm:$0xff] }
 0x462   :  { %2948 = vmatpush1.bf16.msra.mxu1 %v6651_v18  ;;  %v1462_v18 = vld [vmem:[#allocation10 + $0x710] sm:$0xff] }
 0x463   :  { %3030 = vmatpush1.bf16.msra.mxu0 %v6653_v19  ;;  %2949 = vmatprep.subr.bf16.mxu1 %v6660_v22  ;;  %v1466_v19 = vld [vmem:[#allocation10 + $0x730] sm:$0xff]  ;;  %v6707_v22 = vcombine.low %v1453_v5, %v1457_v6  ;;  %v1267_v5 = vld [vmem:[#allocation10 + $0xf8] sm:$0xff] }
 0x464   :  { %3031 = vmatprep.subr.bf16.mxu0 %v6662_v23  ;;  %v6709_v23 = vcombine.low %v1454_v7, %v1458_v8  ;;  %v6718_v28 = vcombine.high %v1462_v18, %v1466_v19  ;;  %v1271_v8 = vld [vmem:[#allocation10 + $0x118] sm:$0xff] }
 0x466   :  { %2950 = vmatpush1.bf16.msra.mxu1 %v6659_v34  ;;  %v1470_v34 = vld [vmem:[#allocation10 + $0x750] sm:$0xff] }
 0x467   :  { %3032 = vmatpush1.bf16.msra.mxu0 %v6661_v36  ;;  %2951 = vmatprep.subr.bf16.mxu1 %v6668_v41  ;;  %v1474_v36 = vld [vmem:[#allocation10 + $0x770] sm:$0xff]  ;;  %v6715_v41 = vcombine.low %v1461_v14, %v1465_v17  ;;  %v1283_v14 = vld [vmem:[#allocation10 + $0x178] sm:$0xff] }
 0x468   :  { %3033 = vmatprep.subr.bf16.mxu0 %v6670_v47  ;;  %v6717_v47 = vcombine.low %v1462_v18, %v1466_v19  ;;  %v6726_v49 = vcombine.high %v1470_v34, %v1474_v36  ;;  %v1287_v18 = vld [vmem:[#allocation10 + $0x198] sm:$0xff] }
 0x469   :  { %v1291_v19 = vld [vmem:[#allocation10 + $0x1b8] sm:$0xff] }
 0x46a   :  { %2952 = vmatpush1.bf16.msra.mxu1 %v6667_v53  ;;  %v1478_v53 = vld [vmem:[#allocation10 + $0x790] sm:$0xff] }
 0x46b   :  { %3034 = vmatpush1.bf16.msra.mxu0 %v6669_v55  ;;  %2953 = vmatprep.subr.bf16.mxu1 %v6676_v42  ;;  %v1482_v55 = vld [vmem:[#allocation10 + $0x7b0] sm:$0xff]  ;;  %v6723_v42 = vcombine.low %v1469_v32, %v1473_v33  ;;  %v6543_v32 = vcombine.low %v1287_v18, %v1291_v19 }
 0x46c   :  { %3035 = vmatprep.subr.bf16.mxu0 %v6678_v44  ;;  %v6725_v44 = vcombine.low %v1470_v34, %v1474_v36  ;;  %v6734_v51 = vcombine.high %v1478_v53, %v1482_v55  ;;  %v1303_v34 = vld [vmem:[#allocation10 + $0x218] sm:$0xff] }
 0x46d   :  { %v1307_v36 = vld [vmem:[#allocation10 + $0x238] sm:$0xff] }
 0x46e   :  { %2954 = vmatpush1.bf16.msra.mxu1 %v6675_v29  ;;  %v1486_v29 = vld [vmem:[#allocation10 + $0x7d0] sm:$0xff] }
 0x46f   :  { %3036 = vmatpush1.bf16.msra.mxu0 %v6677_v57  ;;  %2955 = vmatprep.subr.bf16.mxu1 %v6684_v58  ;;  %v1490_v57 = vld [vmem:[#allocation10 + $0x7f0] sm:$0xff]  ;;  %v6731_v58 = vcombine.low %v1477_v50, %v1481_v52  ;;  %v6559_v50 = vcombine.low %v1303_v34, %v1307_v36 }
 0x470   :  { %3037 = vmatprep.subr.bf16.mxu0 %v6686_v16  ;;  %v6733_v16 = vcombine.low %v1478_v53, %v1482_v55  ;;  %v6742_v60 = vcombine.high %v1486_v29, %v1490_v57  ;;  %v1319_v53 = vld [vmem:[#allocation10 + $0x298] sm:$0xff] }
 0x471   :  { %v1323_v55 = vld [vmem:[#allocation10 + $0x2b8] sm:$0xff] }
 0x472   :  { %2956 = vmatpush1.bf16.msra.mxu1 %v6683_v63  ;;  %v6739_v63 = vcombine.low %v1485_v45, %v1489_v43  ;;  %v6575_v45 = vcombine.low %v1319_v53, %v1323_v55 }
 0x473   :  { %3038 = vmatpush1.bf16.msra.mxu0 %v6685_v0  ;;  %2957 = vmatprep.subr.bf16.mxu1 %v6692_v1  ;;  %v6741_v0 = vcombine.low %v1486_v29, %v1490_v57  ;;  %v6496_v1 = vcombine.high %v1239_v61, %v1243_v62  ;;  %v1335_v29 = vld [vmem:[#allocation10 + $0x318] sm:$0xff] }
 0x474   :  { %3039 = vmatprep.subr.bf16.mxu0 %v6694_v2  ;;  %v1247_v2 = vld [vmem:[#allocation10 + $0x58] sm:$0xff] }
 0x475   :  { %v6504_v3 = vcombine.high %v1247_v2, %v1251_v13  ;;  %v1339_v57 = vld [vmem:[#allocation10 + $0x338] sm:$0xff] }
 0x476   :  { %2958 = vmatpush1.bf16.msra.mxu1 %v6691_v40  ;;  %v1259_v40 = vld [vmem:[#allocation10 + $0xb8] sm:$0xff]  ;;  %v6591_v61 = vcombine.low %v1335_v29, %v1339_v57 }
 0x477   :  { %3040 = vmatpush1.bf16.msra.mxu0 %v6693_v37  ;;  %2959 = vmatprep.subr.bf16.mxu1 %v6700_v35  ;;  %v6503_v37 = vcombine.low %v1247_v2, %v1251_v13  ;;  %v6512_v35 = vcombine.high %v1255_v38, %v1259_v40  ;;  %v6511_v6 = vcombine.low %v1255_v38, %v1259_v40  ;;  %v1359_v13 = vld [vmem:[#allocation10 + $0x3d8] sm:$0xff] }
 0x478   :  { %3041 = vmatprep.subr.bf16.mxu0 %v6702_v4  ;;  %v1263_v4 = vld [vmem:[#allocation10 + $0xd8] sm:$0xff] }
 0x479   :  { %v6520_v7 = vcombine.high %v1263_v4, %v1267_v5  ;;  %v1367_v40 = vld [vmem:[#allocation10 + $0x418] sm:$0xff] }
 0x47a   :  { %2960 = vmatpush1.bf16.msra.mxu1 %v6699_v9  ;;  %v1275_v9 = vld [vmem:[#allocation10 + $0x138] sm:$0xff] }
 0x47b   :  { %3042 = vmatpush1.bf16.msra.mxu0 %v6701_v10  ;;  %2961 = vmatprep.subr.bf16.mxu1 %v6708_v11  ;;  %v6519_v10 = vcombine.low %v1263_v4, %v1267_v5  ;;  %v6528_v11 = vcombine.high %v1271_v8, %v1275_v9  ;;  %v6527_v17 = vcombine.low %v1271_v8, %v1275_v9  ;;  %v1375_v5 = vld [vmem:[#allocation10 + $0x458] sm:$0xff] }
 0x47c   :  { %3043 = vmatprep.subr.bf16.mxu0 %v6710_v12  ;;  %v1279_v12 = vld [vmem:[#allocation10 + $0x158] sm:$0xff] }
 0x47d   :  { %v1383_v9 = vld [vmem:[#allocation10 + $0x498] sm:$0xff] }
 0x47e   :  { %2962 = vmatpush1.bf16.msra.mxu1 %v6707_v22  ;;  %v6535_v22 = vcombine.low %v1279_v12, %v1283_v14 }
 0x47f   :  { %3044 = vmatpush1.bf16.msra.mxu0 %v6709_v23  ;;  %2963 = vmatprep.subr.bf16.mxu1 %v6716_v27  ;;  %v6544_v23 = vcombine.high %v1287_v18, %v1291_v19  ;;  %v1295_v27 = vld [vmem:[#allocation10 + $0x1d8] sm:$0xff] }
 0x480   :  { %3045 = vmatprep.subr.bf16.mxu0 %v6718_v28  ;;  %v1299_v28 = vld [vmem:[#allocation10 + $0x1f8] sm:$0xff] }
 0x481   :  { %v6552_v33 = vcombine.high %v1295_v27, %v1299_v28  ;;  %v1399_v19 = vld [vmem:[#allocation10 + $0x518] sm:$0xff] }
 0x482   :  { %2964 = vmatpush1.bf16.msra.mxu1 %v6715_v41  ;;  %v6551_v41 = vcombine.low %v1295_v27, %v1299_v28  ;;  %v1407_v28 = vld [vmem:[#allocation10 + $0x558] sm:$0xff] }
 0x483   :  { %3046 = vmatpush1.bf16.msra.mxu0 %v6717_v47  ;;  %2965 = vmatprep.subr.bf16.mxu1 %v6724_v48  ;;  %v6560_v47 = vcombine.high %v1303_v34, %v1307_v36  ;;  %v1311_v48 = vld [vmem:[#allocation10 + $0x258] sm:$0xff] }
 0x484   :  { %3047 = vmatprep.subr.bf16.mxu0 %v6726_v49  ;;  %v1315_v49 = vld [vmem:[#allocation10 + $0x278] sm:$0xff] }
 0x485   :  { %v6568_v52 = vcombine.high %v1311_v48, %v1315_v49  ;;  %v1415_v34 = vld [vmem:[#allocation10 + $0x598] sm:$0xff] }
 0x486   :  { %2966 = vmatpush1.bf16.msra.mxu1 %v6723_v42  ;;  %v6567_v42 = vcombine.low %v1311_v48, %v1315_v49  ;;  %v1419_v36 = vld [vmem:[#allocation10 + $0x5b8] sm:$0xff] }
 0x487   :  { %3048 = vmatpush1.bf16.msra.mxu0 %v6725_v44  ;;  %2967 = vmatprep.subr.bf16.mxu1 %v6732_v46  ;;  %v6576_v44 = vcombine.high %v1319_v53, %v1323_v55  ;;  %v1327_v46 = vld [vmem:[#allocation10 + $0x2d8] sm:$0xff]  ;;  %v6672_v49 = vcombine.high %v1415_v34, %v1419_v36 }
 0x488   :  { %3049 = vmatprep.subr.bf16.mxu0 %v6734_v51  ;;  %v1331_v51 = vld [vmem:[#allocation10 + $0x2f8] sm:$0xff] }
 0x489   :  { %v6584_v43 = vcombine.high %v1327_v46, %v1331_v51  ;;  %v1423_v53 = vld [vmem:[#allocation10 + $0x5d8] sm:$0xff] }
 0x48a   :  { %2968 = vmatpush1.bf16.msra.mxu1 %v6731_v58  ;;  %v6583_v58 = vcombine.low %v1327_v46, %v1331_v51  ;;  %v1427_v55 = vld [vmem:[#allocation10 + $0x5f8] sm:$0xff] }
 0x48b   :  { %3050 = vmatpush1.bf16.msra.mxu0 %v6733_v16  ;;  %2969 = vmatprep.subr.bf16.mxu1 %v6740_v59  ;;  %v6592_v16 = vcombine.high %v1335_v29, %v1339_v57  ;;  %v1343_v59 = vld [vmem:[#allocation10 + $0x358] sm:$0xff]  ;;  %v6671_v29 = vcombine.low %v1415_v34, %v1419_v36 }
 0x48c   :  { %3051 = vmatprep.subr.bf16.mxu0 %v6742_v60  ;;  %v1347_v60 = vld [vmem:[#allocation10 + $0x378] sm:$0xff] }
 0x48d   :  { %v6600_v62 = vcombine.high %v1343_v59, %v1347_v60 }
 0x48e   :  { %2970 = vmatpush1.bf16.msra.mxu1 %v6739_v63  ;;  %v1351_v63 = vld [vmem:[#allocation10 + $0x398] sm:$0xff] }
 0x48f   :  { %3052 = vmatpush1.bf16.msra.mxu0 %v6741_v0  ;;  %3062 = vmatprep.subr.bf16.mxu1 %v6496_v1  ;;  %v1355_v0 = vld [vmem:[#allocation10 + $0x3b8] sm:$0xff]  ;;  %v6599_v1 = vcombine.low %v1343_v59, %v1347_v60  ;;  %v6680_v59 = vcombine.high %v1423_v53, %v1427_v55 }
 0x490   :  { %v6608_v2 = vcombine.high %v1351_v63, %v1355_v0 }
 0x491   :  { %2972 = vmatmul.mubr.bf16.vlgmr.msra.gmra.mrb[16].mxu1 %v8406_v25 }
 0x492   :  { %3054 = vmatmul.mubr.bf16.vlgmr.msra.gmra.mrb[8].mxu0 %v8406_v25  ;;  %3063 = vmatpush1.bf16.msra.mxu1 %v6495_v15  ;;  %v1363_v15 = vld [vmem:[#allocation10 + $0x3f8] sm:$0xff] }
 0x493   :  { %3094 = vmatprep.mubr.bf16.mxu1 %v8400_v20  ;;  %3064 = vmatprep.subr.bf16.mxu1 %v6504_v3  ;;  %v6536_v20 = vcombine.high %v1279_v12, %v1283_v14  ;;  %v6607_v3 = vcombine.low %v1351_v63, %v1355_v0  ;;  %v6616_v38 = vcombine.high %v1359_v13, %v1363_v15  ;;  %v1391_v14 = vld [vmem:[#allocation10 + $0x4d8] sm:$0xff] }
 0x496   :  { %3065 = vmatpush1.bf16.msra.mxu1 %v6503_v37  ;;  %v1371_v37 = vld [vmem:[#allocation10 + $0x438] sm:$0xff] }
 0x497   :  { %3066 = vmatprep.subr.bf16.mxu1 %v6512_v35  ;;  %v6615_v35 = vcombine.low %v1359_v13, %v1363_v15  ;;  %v6624_v4 = vcombine.high %v1367_v40, %v1371_v37  ;;  %v6679_v13 = vcombine.low %v1423_v53, %v1427_v55 }
 0x49a   :  { %3067 = vmatpush1.bf16.msra.mxu1 %v6511_v6  ;;  %v1379_v6 = vld [vmem:[#allocation10 + $0x478] sm:$0xff] }
 0x49b   :  { %3068 = vmatprep.subr.bf16.mxu1 %v6520_v7  ;;  %v6623_v7 = vcombine.low %v1367_v40, %v1371_v37  ;;  %v6632_v8 = vcombine.high %v1375_v5, %v1379_v6 }
 0x49e   :  { %3069 = vmatpush1.bf16.msra.mxu1 %v6519_v10  ;;  %v1387_v10 = vld [vmem:[#allocation10 + $0x4b8] sm:$0xff] }
 0x49f   :  { %3070 = vmatprep.subr.bf16.mxu1 %v6528_v11  ;;  %v6631_v11 = vcombine.low %v1375_v5, %v1379_v6  ;;  %v6640_v12 = vcombine.high %v1383_v9, %v1387_v10 }
 0x4a2   :  { %3071 = vmatpush1.bf16.msra.mxu1 %v6527_v17  ;;  %v1395_v17 = vld [vmem:[#allocation10 + $0x4f8] sm:$0xff] }
 0x4a3   :  { %3072 = vmatprep.subr.bf16.mxu1 %v6536_v20  ;;  %v6639_v20 = vcombine.low %v1383_v9, %v1387_v10  ;;  %v6648_v18 = vcombine.high %v1391_v14, %v1395_v17 }
 0x4a6   :  { %3073 = vmatpush1.bf16.msra.mxu1 %v6535_v22  ;;  %v1403_v22 = vld [vmem:[#allocation10 + $0x538] sm:$0xff] }
 0x4a7   :  { %3074 = vmatprep.subr.bf16.mxu1 %v6544_v23  ;;  %v6647_v23 = vcombine.low %v1391_v14, %v1395_v17  ;;  %v6656_v27 = vcombine.high %v1399_v19, %v1403_v22 }
 0x4aa   :  { %3075 = vmatpush1.bf16.msra.mxu1 %v6543_v32  ;;  %v6655_v32 = vcombine.low %v1399_v19, %v1403_v22 }
 0x4ab   :  { %3076 = vmatprep.subr.bf16.mxu1 %v6552_v33 }
 0x4ae   :  { %3077 = vmatpush1.bf16.msra.mxu1 %v6551_v41 }
 0x4af   :  { %3078 = vmatprep.subr.bf16.mxu1 %v6560_v47 }
 0x4b2   :  { %3079 = vmatpush1.bf16.msra.mxu1 %v6559_v50 }
 0x4b3   :  { %3080 = vmatprep.subr.bf16.mxu1 %v6568_v52 }
 0x4b6   :  { %3081 = vmatpush1.bf16.msra.mxu1 %v6567_v42 }
 0x4b7   :  { %3082 = vmatprep.subr.bf16.mxu1 %v6576_v44 }
 0x4ba   :  { %3083 = vmatpush1.bf16.msra.mxu1 %v6575_v45 }
 0x4bb   :  { %3084 = vmatprep.subr.bf16.mxu1 %v6584_v43 }
 0x4be   :  { %3085 = vmatpush1.bf16.msra.mxu1 %v6583_v58 }
 0x4bf   :  { %3086 = vmatprep.subr.bf16.mxu1 %v6592_v16 }
 0x4c2   :  { %3087 = vmatpush1.bf16.msra.mxu1 %v6591_v61  ;;  %v1431_v61 = vld [vmem:[#allocation10 + $0x618] sm:$0xff] }
 0x4c3   :  { %3088 = vmatprep.subr.bf16.mxu1 %v6600_v62  ;;  %v1435_v62 = vld [vmem:[#allocation10 + $0x638] sm:$0xff] }
 0x4c4   :  { %v6687_v9 = vcombine.low %v1431_v61, %v1435_v62 }
 0x4c6   :  { %3089 = vmatpush1.bf16.msra.mxu1 %v6599_v1 }
 0x4c7   :  { %3090 = vmatprep.subr.bf16.mxu1 %v6608_v2 }
 0x4ca   :  { %3091 = vmatpush1.bf16.msra.mxu1 %v6607_v3 }
 0x4cb   :  { %3092 = vmatprep.subr.bf16.mxu1 %v6616_v38  ;;  %v6688_v38 = vcombine.high %v1431_v61, %v1435_v62 }
 0x4ce   :  { %3093 = vmatpush1.bf16.msra.mxu1 %v6615_v35  ;;  %v1439_v35 = vld [vmem:[#allocation10 + $0x658] sm:$0xff] }
 0x4cf   :  { %3103 = vmatprep.subr.bf16.mxu1 %v6624_v4  ;;  %v1443_v4 = vld [vmem:[#allocation10 + $0x678] sm:$0xff] }
 0x4d1   :  { %3095 = vmatmul.mubr.bf16.vlgmr.msra.gmra.mrb[20].mxu1 %v8404_v24  ;;  %v1411_v24 = vld [vmem:[#allocation10 + $0x578] sm:$0xff] }
 0x4d2   :  { %3104 = vmatpush1.bf16.msra.mxu1 %v6623_v7  ;;  %3135 = vmatprep.mubr.bf16.mxu1 %v8402_v21  ;;  %v8429_v21 = vld [vmem:[#allocation13 + $0x15] sm:$0xff]  ;;  %v6664_v33 = vcombine.high %v1407_v28, %v1411_v24  ;;  %v6663_v47 = vcombine.low %v1407_v28, %v1411_v24  ;;  %v6695_v28 = vcombine.low %v1439_v35, %v1443_v4 }
 0x4d3   :  { %3105 = vmatprep.subr.bf16.mxu1 %v6632_v8  ;;  %v1499_v41 = vrot.slane %v8429_v21, %v8299_v56  ;;  %v1503_v48 = vrot.slane %v8429_v21, %v8304_v39 }
 0x4d6   :  { %3106 = vmatpush1.bf16.msra.mxu1 %v6631_v11 }
 0x4d7   :  { %3107 = vmatprep.subr.bf16.mxu1 %v6640_v12  ;;  %v6696_v12 = vcombine.high %v1439_v35, %v1443_v4 }
 0x4da   :  { %3108 = vmatpush1.bf16.msra.mxu1 %v6639_v20  ;;  %v1447_v20 = vld [vmem:[#allocation10 + $0x698] sm:$0xff] }
 0x4db   :  { %3109 = vmatprep.subr.bf16.mxu1 %v6648_v18  ;;  %v1451_v18 = vld [vmem:[#allocation10 + $0x6b8] sm:$0xff] }
 0x4dc   :  { %v6703_v53 = vcombine.low %v1447_v20, %v1451_v18 }
 0x4de   :  { %3110 = vmatpush1.bf16.msra.mxu1 %v6647_v23 }
 0x4df   :  { %3111 = vmatprep.subr.bf16.mxu1 %v6656_v27 }
 0x4e2   :  { %3112 = vmatpush1.bf16.msra.mxu1 %v6655_v32 }
 0x4e3   :  { %3113 = vmatprep.subr.bf16.mxu1 %v6664_v33  ;;  %v6704_v33 = vcombine.high %v1447_v20, %v1451_v18 }
 0x4e4   :  { %v2850_v50 = vpop.f32.mrb[12].mxu1  ;;  %v2891_v52 = vpop.f32.mrb[4].mxu0 }
 0x4e5   :  { %v2851_v42 = vadd.f32 %v2850_v50, %v1499_v41  ;;  %v2852_v44 = vpop.f32.mrb[13].mxu1  ;;  %v2893_v46 = vpop.f32.mrb[5].mxu0  ;;  %v1455_v41 = vld [vmem:[#allocation10 + $0x6d8] sm:$0xff] }
 0x4e6   :  { %v2853_v51 = vadd.f32 %v2852_v44, %v1503_v48  ;;  %3114 = vmatpush1.bf16.msra.mxu1 %v6663_v47  ;;  %v2854_v45 = vpop.f32.mrb[14].mxu1  ;;  %v2895_v43 = vpop.f32.mrb[6].mxu0  ;;  %v1459_v47 = vld [vmem:[#allocation10 + $0x6f8] sm:$0xff] }
 0x4e7   :  { %v8435_v57 = vadd.f32 %v2891_v52, %v2851_v42  ;;  %v2855_v58 = vpop.f32.mrb[15].mxu1  ;;  %v2896_v16 = vpop.f32.mrb[7].mxu0  ;;  %3115 = vmatprep.subr.bf16.mxu1 %v6672_v49  ;;  %v6712_v44 = vcombine.high %v1455_v41, %v1459_v47  ;;  %v1463_v45 = vld [vmem:[#allocation10 + $0x718] sm:$0xff] }
 0x4e8   :  { %v8437_v60 = vadd.f32 %v2893_v46, %v2853_v51  ;;  %v1467_v43 = vld [vmem:[#allocation10 + $0x738] sm:$0xff]  ;;  %v6711_v16 = vcombine.low %v1455_v41, %v1459_v47 }
 0x4e9   :  { %v3144_v63 = vrot.slane %v8435_v57, 4  ;;  %v3200_v0 = vmul.f32 %v8435_v57, %v8435_v57  ;;  %v6720_v61 = vcombine.high %v1463_v45, %v1467_v43 }
 0x4ea   :  { %v3150_v1 = vrot.slane %v8437_v60, 4  ;;  %v3201_v2 = vmul.f32 %v8437_v60, %v8437_v60  ;;  %3116 = vmatpush1.bf16.msra.mxu1 %v6671_v29 }
 0x4eb   :  { %v3145_v15 = vadd.f32 %v3144_v63, %v8435_v57  ;;  %v3208_v3 = vrot.slane %v3200_v0, 4  ;;  %3117 = vmatprep.subr.bf16.mxu1 %v6680_v59  ;;  %v1471_v63 = vld [vmem:[#allocation10 + $0x758] sm:$0xff] }
 0x4ec   :  { %v3151_v40 = vadd.f32 %v3150_v1, %v8437_v60  ;;  %v3214_v37 = vrot.slane %v3201_v2, 4  ;;  %v6719_v1 = vcombine.low %v1463_v45, %v1467_v43  ;;  %v7374_v45 = vld [vmem:[#allocation11 + $0x8] ss:$24 sps:$4 sm:$0xff]  }
 0x4ed   :  { %v3146_v5 = vrot.slane %v3145_v15, 2  ;;  %v3209_v6 = vadd.f32 %v3208_v3, %v3200_v0  ;;  %v1475_v0 = vld [vmem:[#allocation10 + $0x778] sm:$0xff] }
 0x4ee   :  { %v3152_v7 = vrot.slane %v3151_v40, 2  ;;  %v3215_v8 = vadd.f32 %v3214_v37, %v3201_v2  ;;  %3118 = vmatpush1.bf16.msra.mxu1 %v6679_v13  ;;  %v6728_v2 = vcombine.high %v1471_v63, %v1475_v0  ;;  %v1479_v13 = vld [vmem:[#allocation10 + $0x798] sm:$0xff]  ;;  %v6727_v3 = vcombine.low %v1471_v63, %v1475_v0 }
 0x4ef   :  { %v3147_v10 = vadd.f32 %v3146_v5, %v3145_v15  ;;  %v3210_v11 = vrot.slane %v3209_v6, 2  ;;  %3119 = vmatprep.subr.bf16.mxu1 %v6688_v38  ;;  %v1483_v15 = vld [vmem:[#allocation10 + $0x7b8] sm:$0xff] }
 0x4f0   :  { %v3153_v14 = vadd.f32 %v3152_v7, %v3151_v40  ;;  %v3216_v17 = vrot.slane %v3215_v8, 2  ;;  %v6736_v38 = vcombine.high %v1479_v13, %v1483_v15  ;;  %v1487_v40 = vld [vmem:[#allocation10 + $0x7d8] sm:$0xff]  ;;  %v6735_v35 = vcombine.low %v1479_v13, %v1483_v15 }
 0x4f1   :  { %v3148_v19 = vrot.slane %v3147_v10, 1  ;;  %v3211_v22 = vadd.f32 %v3210_v11, %v3209_v6  ;;  %v1491_v37 = vld [vmem:[#allocation10 + $0x7f8] sm:$0xff] }
 0x4f2   :  { %v3154_v23 = vrot.slane %v3153_v14, 1  ;;  %v3217_v27 = vadd.f32 %v3216_v17, %v3215_v8  ;;  %3120 = vmatpush1.bf16.msra.mxu1 %v6687_v9  ;;  %v6744_v5 = vcombine.high %v1487_v40, %v1491_v37  ;;  %v6743_v8 = vcombine.low %v1487_v40, %v1491_v37  ;;  %v7382_v63 = vld [vmem:[#allocation11 + $0x3c] ss:$24 sps:$4 sm:$0xff]   ;;  %v7380_v13 = vld [vmem:[#allocation11 + $0x38] ss:$24 sps:$4 sm:$0xff]  }
 0x4f3   :  { %v3149_v24 = vadd.f32 %v3148_v19, %v3147_v10  ;;  %v3212_v32 = vrot.slane %v3211_v22, 1  ;;  %3121 = vmatprep.subr.bf16.mxu1 %v6696_v12  ;;  %v1507_v9 = vrot.slane %v8429_v21, %v8366_v30  ;;  %v1511_v10 = vrot.slane %v8429_v21, %v8369_v31 }
 0x4f4   :  { %v3155_v34 = vadd.f32 %v3154_v23, %v3153_v14  ;;  %v3218_v36 = vrot.slane %v3217_v27, 1 }
 0x4f5   :  { %v8447_v48 = vmul.f32 0.125, %v3149_v24  ;;  %v3213_v49 = vadd.f32 %v3212_v32, %v3211_v22 }
 0x4f6   :  { %v8449_v50 = vmul.f32 0.125, %v3155_v34  ;;  %v3219_v52 = vadd.f32 %v3218_v36, %v3217_v27  ;;  %3122 = vmatpush1.bf16.msra.mxu1 %v6695_v28 }
 0x4f7   :  { %v3256_v55 = vmul.f32 0.125, %v3213_v49  ;;  %v3264_v42 = vmul.f32 %v8447_v48, %v8447_v48  ;;  %3123 = vmatprep.subr.bf16.mxu1 %v6704_v33 }
 0x4f8   :  { %v3257_v46 = vmul.f32 0.125, %v3219_v52  ;;  %v3265_v51 = vmul.f32 %v8449_v50, %v8449_v50 }
 0x4f9   :  { %v3272_v29 = vsub.f32 %v3256_v55, %v3264_v42  ;;  %v7373_v55 = vld [vmem:[#allocation11 + $0x4] ss:$24 sps:$4 sm:$0xff]  }
 0x4fa   :  { %v3273_v58 = vsub.f32 %v3257_v46, %v3265_v51  ;;  %3124 = vmatpush1.bf16.msra.mxu1 %v6703_v53  ;;  %v7376_v42 = vld [vmem:[#allocation11 + $0xc] ss:$24 sps:$4 sm:$0xff]   ;;  %v7371_v51 = vld [vmem:[#allocation11] ss:$24 sps:$4 sm:$0xff]   ;;  %5888 = vmatprep.subr.bf16.mxu0 %v7373_v55  ;;  %v7401_v55 = vld [vmem:[#allocation11 + $0xf0] ss:$24 sps:$4 sm:$0xff]  }
 0x4fb   :  { %v3280_v59 = vadd.f32 1e-05, %v3272_v29  ;;  %3125 = vmatprep.subr.bf16.mxu1 %v6712_v44  ;;  %5889 = vmatpush1.bf16.msra.mxu0 %v7371_v51 }
 0x4fc   :  { %v3281_v62 = vadd.f32 1e-05, %v3273_v58 }
 0x4fd   :  { %7961 = vrsqrt.f32 %v3280_v59 }
 0x4fe   :  { %7963 = vrsqrt.f32 %v3281_v62  ;;  %3126 = vmatpush1.bf16.msra.mxu1 %v6711_v16  ;;  %v7379_v62 = vld [vmem:[#allocation11 + $0x34] ss:$24 sps:$4 sm:$0xff]  }
 0x4ff   :  { %3127 = vmatprep.subr.bf16.mxu1 %v6720_v61  ;;  %5890 = vmatprep.subr.bf16.mxu0 %v7379_v62  ;;  %v7416_v62 = vld [vmem:[#allocation11 + $0x158] ss:$24 sps:$4 sm:$0xff]  }
 0x502   :  { %3128 = vmatpush1.bf16.msra.mxu1 %v6719_v1 }
 0x503   :  { %3129 = vmatprep.subr.bf16.mxu1 %v6728_v2  ;;  %v7377_v2 = vld [vmem:[#allocation11 + $0x30] ss:$24 sps:$4 sm:$0xff]  }
 0x504   :  { %5891 = vmatpush1.bf16.msra.mxu0 %v7377_v2  ;;  %v7421_v2 = vld [vmem:[#allocation11 + $0x184] ss:$24 sps:$4 sm:$0xff]  }
 0x506   :  { %3130 = vmatpush1.bf16.msra.mxu1 %v6727_v3 }
 0x507   :  { %v8455_v4 = vpop.eup %7961  ;;  %3131 = vmatprep.subr.bf16.mxu1 %v6736_v38 }
 0x508   :  { %v8457_v6 = vpop.eup %7963 }
 0x509   :  { %v3304_v7 = vcombine.low %v8455_v4, %v8457_v6  ;;  %v7427_v4 = vld [vmem:[#allocation11 + $0x1b4] ss:$24 sps:$4 sm:$0xff]  }
 0x50a   :  { %3132 = vmatpush1.bf16.msra.mxu1 %v6735_v35  ;;  %v7430_v6 = vld [vmem:[#allocation11 + $0x1bc] ss:$24 sps:$4 sm:$0xff]  }
 0x50b   :  { %3133 = vmatprep.subr.bf16.mxu1 %v6744_v5  ;;  %v7385_v5 = vld [vmem:[#allocation11 + $0x64] ss:$24 sps:$4 sm:$0xff]  }
 0x50c   :  { %5892 = vmatprep.subr.bf16.mxu0 %v7385_v5  ;;  %v7436_v5 = vld [vmem:[#allocation11 + $0x1ec] ss:$24 sps:$4 sm:$0xff]  }
 0x50e   :  { %3134 = vmatpush1.bf16.msra.mxu1 %v6743_v8  ;;  %v7388_v8 = vld [vmem:[#allocation11 + $0x6c] ss:$24 sps:$4 sm:$0xff]  }
 0x50f   :  { %6052 = vmatprep.subr.bf16.mxu1 %v7376_v42  ;;  %v7404_v42 = vld [vmem:[#allocation11 + $0xf8] ss:$24 sps:$4 sm:$0xff]  }
 0x511   :  { %3136 = vmatmul.mubr.bf16.vlgmr.msra.gmra.mrb[20].mxu1 %v8406_v25 }
 0x512   :  { %6053 = vmatpush1.bf16.msra.mxu1 %v7374_v45  ;;  %v7407_v45 = vld [vmem:[#allocation11 + $0x120] ss:$24 sps:$4 sm:$0xff]  }
 0x513   :  { %6054 = vmatprep.subr.bf16.mxu1 %v7382_v63  ;;  %v8494_v63 = vrot.slane %v3304_v7, %v8309_v26  ;;  %v7425_v7 = vld [vmem:[#allocation11 + $0x1b0] ss:$24 sps:$4 sm:$0xff]  }
 0x516   :  { %6055 = vmatpush1.bf16.msra.mxu1 %v7380_v13  ;;  %v7424_v13 = vld [vmem:[#allocation11 + $0x18c] ss:$24 sps:$4 sm:$0xff]  }
 0x517   :  { %6056 = vmatprep.subr.bf16.mxu1 %v7388_v8  ;;  %v7431_v8 = vld [vmem:[#allocation11 + $0x1e0] ss:$24 sps:$4 sm:$0xff]  }
 0x564   :  { %v2973_v11 = vpop.f32.mrb[16].mxu1 }
 0x565   :  { %v8466_v12 = vadd.f32 %v2973_v11, %v1507_v9  ;;  %v8468_v14 = vpop.f32.mrb[8].mxu0  ;;  %v2975_v17 = vpop.f32.mrb[17].mxu1  ;;  %v7383_v11 = vld [vmem:[#allocation11 + $0x60] ss:$24 sps:$4 sm:$0xff]  }
 0x566   :  { %v8470_v20 = vadd.f32 %v2975_v17, %v1511_v10  ;;  %v8472_v18 = vpop.f32.mrb[9].mxu0  ;;  %v2977_v19 = vpop.f32.mrb[18].mxu1  ;;  %v7386_v17 = vld [vmem:[#allocation11 + $0x68] ss:$24 sps:$4 sm:$0xff]   ;;  %5893 = vmatpush1.bf16.msra.mxu0 %v7383_v11  ;;  %v7442_v11 = vld [vmem:[#allocation11 + $0x21c] ss:$24 sps:$4 sm:$0xff]  }
 0x567   :  { %v3156_v22 = vrot.slane %v8466_v12, 4  ;;  %v3202_v25 = vmul.f32 %v8466_v12, %v8466_v12  ;;  %v3059_v23 = vpop.f32.mrb[10].mxu0  ;;  %v2978_v27 = vpop.f32.mrb[19].mxu1  ;;  %6057 = vmatpush1.bf16.msra.mxu1 %v7386_v17  ;;  %v7437_v17 = vld [vmem:[#allocation11 + $0x210] ss:$24 sps:$4 sm:$0xff]  }
 0x568   :  { %v3162_v28 = vrot.slane %v8470_v20, 4  ;;  %v3203_v24 = vmul.f32 %v8470_v20, %v8470_v20  ;;  %v3060_v32 = vpop.f32.mrb[11].mxu0  ;;  %v7391_v27 = vld [vmem:[#allocation11 + $0x94] ss:$24 sps:$4 sm:$0xff]  }
 0x569   :  { %v3157_v33 = vadd.f32 %v8466_v12, %v3156_v22  ;;  %v3220_v34 = vrot.slane %v3202_v25, 4  ;;  %v7389_v32 = vld [vmem:[#allocation11 + $0x90] ss:$24 sps:$4 sm:$0xff]   ;;  %5894 = vmatprep.subr.bf16.mxu0 %v7391_v27 }
 0x56a   :  { %v3163_v36 = vadd.f32 %v8470_v20, %v3162_v28  ;;  %v3226_v41 = vrot.slane %v3203_v24, 4  ;;  %v7394_v28 = vld [vmem:[#allocation11 + $0x9c] ss:$24 sps:$4 sm:$0xff]   ;;  %5895 = vmatpush1.bf16.msra.mxu0 %v7389_v32  ;;  %v7446_v27 = vld [vmem:[#allocation11 + $0x248] ss:$24 sps:$4 sm:$0xff]  }
 0x56b   :  { %v3158_v47 = vrot.slane %v3157_v33, 2  ;;  %v3221_v49 = vadd.f32 %v3220_v34, %v3202_v25  ;;  %6058 = vmatprep.subr.bf16.mxu1 %v7394_v28  ;;  %v7451_v28 = vld [vmem:[#allocation11 + $0x274] ss:$24 sps:$4 sm:$0xff]   ;;  %v7449_v32 = vld [vmem:[#allocation11 + $0x270] ss:$24 sps:$4 sm:$0xff]  }
 0x56c   :  { %v3164_v52 = vrot.slane %v3163_v36, 2  ;;  %v3227_v53 = vadd.f32 %v3226_v41, %v3203_v24  ;;  %v7400_v41 = vld [vmem:[#allocation11 + $0xcc] ss:$24 sps:$4 sm:$0xff]  }
 0x56d   :  { %v3159_v44 = vadd.f32 %v3158_v47, %v3157_v33  ;;  %v3222_v46 = vrot.slane %v3221_v49, 2  ;;  %v7392_v33 = vld [vmem:[#allocation11 + $0x98] ss:$24 sps:$4 sm:$0xff]  }
 0x56e   :  { %v3165_v43 = vadd.f32 %v3164_v52, %v3163_v36  ;;  %v3228_v29 = vrot.slane %v3227_v53, 2  ;;  %6059 = vmatpush1.bf16.msra.mxu1 %v7392_v33  ;;  %v7397_v36 = vld [vmem:[#allocation11 + $0xc4] ss:$24 sps:$4 sm:$0xff]   ;;  %v7395_v47 = vld [vmem:[#allocation11 + $0xc0] ss:$24 sps:$4 sm:$0xff]  }
 0x56f   :  { %v3160_v58 = vrot.slane %v3159_v44, 1  ;;  %v3223_v16 = vadd.f32 %v3222_v46, %v3221_v49  ;;  %v7398_v49 = vld [vmem:[#allocation11 + $0xc8] ss:$24 sps:$4 sm:$0xff]   ;;  %5896 = vmatprep.subr.bf16.mxu0 %v7397_v36  ;;  %6060 = vmatprep.subr.bf16.mxu1 %v7400_v41  ;;  %v7403_v52 = vld [vmem:[#allocation11 + $0xf4] ss:$24 sps:$4 sm:$0xff]  }
 0x570   :  { %v3166_v59 = vrot.slane %v3165_v43, 1  ;;  %v3229_v61 = vadd.f32 %v3228_v29, %v3227_v53  ;;  %5897 = vmatpush1.bf16.msra.mxu0 %v7395_v47  ;;  %v7406_v53 = vld [vmem:[#allocation11 + $0xfc] ss:$24 sps:$4 sm:$0xff]   ;;  %v7412_v46 = vld [vmem:[#allocation11 + $0x12c] ss:$24 sps:$4 sm:$0xff]  }
 0x571   :  { %v3161_v0 = vadd.f32 %v3160_v58, %v3159_v44  ;;  %v3224_v1 = vrot.slane %v3223_v16, 1  ;;  %5898 = vmatprep.subr.bf16.mxu0 %v7403_v52  ;;  %v7409_v44 = vld [vmem:[#allocation11 + $0x124] ss:$24 sps:$4 sm:$0xff]   ;;  %v7452_v33 = vld [vmem:[#allocation11 + $0x278] ss:$24 sps:$4 sm:$0xff]  }
 0x572   :  { %v3167_v15 = vadd.f32 %v3166_v59, %v3165_v43  ;;  %v3230_v3 = vrot.slane %v3229_v61, 1  ;;  %6061 = vmatpush1.bf16.msra.mxu1 %v7398_v49  ;;  %v7410_v43 = vld [vmem:[#allocation11 + $0x128] ss:$24 sps:$4 sm:$0xff]   ;;  %v7418_v59 = vld [vmem:[#allocation11 + $0x15c] ss:$24 sps:$4 sm:$0xff]  }
 0x573   :  { %v8482_v38 = vmul.f32 0.125, %v3161_v0  ;;  %v3225_v40 = vadd.f32 %v3224_v1, %v3223_v16  ;;  %6062 = vmatprep.subr.bf16.mxu1 %v7406_v53  ;;  %v7415_v16 = vld [vmem:[#allocation11 + $0x154] ss:$24 sps:$4 sm:$0xff]   ;;  %v7455_v41 = vld [vmem:[#allocation11 + $0x2a0] ss:$24 sps:$4 sm:$0xff]  }
 0x574   :  { %v8484_v37 = vmul.f32 0.125, %v3167_v15  ;;  %v3231_v35 = vadd.f32 %v3230_v3, %v3229_v61  ;;  %5899 = vmatpush1.bf16.msra.mxu0 %v7401_v55  ;;  %v7413_v61 = vld [vmem:[#allocation11 + $0x150] ss:$24 sps:$4 sm:$0xff]   ;;  %v7419_v15 = vld [vmem:[#allocation11 + $0x180] ss:$24 sps:$4 sm:$0xff]  }
 0x575   :  { %v3258_v9 = vmul.f32 0.125, %v3225_v40  ;;  %v3266_v10 = vmul.f32 %v8482_v38, %v8482_v38  ;;  %5900 = vmatprep.subr.bf16.mxu0 %v7409_v44  ;;  %v7422_v3 = vld [vmem:[#allocation11 + $0x188] ss:$24 sps:$4 sm:$0xff]   ;;  %v7428_v40 = vld [vmem:[#allocation11 + $0x1b8] ss:$24 sps:$4 sm:$0xff]  }
 0x576   :  { %v3259_v19 = vmul.f32 0.125, %v3231_v35  ;;  %v3267_v22 = vmul.f32 %v8484_v37, %v8484_v37  ;;  %6063 = vmatpush1.bf16.msra.mxu1 %v7404_v42  ;;  %v7433_v35 = vld [vmem:[#allocation11 + $0x1e4] ss:$24 sps:$4 sm:$0xff]   ;;  %v7458_v47 = vld [vmem:[#allocation11 + $0x2a8] ss:$24 sps:$4 sm:$0xff]  }
 0x577   :  { %v3274_v25 = vsub.f32 %v3258_v9, %v3266_v10  ;;  %6064 = vmatprep.subr.bf16.mxu1 %v7412_v46  ;;  %v7434_v9 = vld [vmem:[#allocation11 + $0x1e8] ss:$24 sps:$4 sm:$0xff]   ;;  %v7439_v10 = vld [vmem:[#allocation11 + $0x214] ss:$24 sps:$4 sm:$0xff]   ;;  %v7464_v55 = vld [vmem:[#allocation11 + $0x2d8] ss:$24 sps:$4 sm:$0xff]  }
 0x578   :  { %v3275_v23 = vsub.f32 %v3259_v19, %v3267_v22  ;;  %5901 = vmatpush1.bf16.msra.mxu0 %v7407_v45  ;;  %v7440_v19 = vld [vmem:[#allocation11 + $0x218] ss:$24 sps:$4 sm:$0xff]   ;;  %v7445_v22 = vld [vmem:[#allocation11 + $0x244] ss:$24 sps:$4 sm:$0xff]   ;;  %v7463_v49 = vld [vmem:[#allocation11 + $0x2d4] ss:$24 sps:$4 sm:$0xff]  }
 0x579   :  { %v3282_v24 = vadd.f32 1e-05, %v3274_v25  ;;  %5902 = vmatprep.subr.bf16.mxu0 %v7415_v16  ;;  %v7448_v25 = vld [vmem:[#allocation11 + $0x24c] ss:$24 sps:$4 sm:$0xff]   ;;  %v7466_v52 = vld [vmem:[#allocation11 + $0x2dc] ss:$24 sps:$4 sm:$0xff]  }
 0x57a   :  { %v3283_v34 = vadd.f32 1e-05, %v3275_v23  ;;  %6065 = vmatpush1.bf16.msra.mxu1 %v7410_v43  ;;  %v7443_v23 = vld [vmem:[#allocation11 + $0x240] ss:$24 sps:$4 sm:$0xff]   ;;  %v7460_v36 = vld [vmem:[#allocation11 + $0x2ac] ss:$24 sps:$4 sm:$0xff]  }
 0x57b   :  { %7965 = vrsqrt.f32 %v3282_v24  ;;  %6066 = vmatprep.subr.bf16.mxu1 %v7418_v59  ;;  %v7454_v24 = vld [vmem:[#allocation11 + $0x27c] ss:$24 sps:$4 sm:$0xff]   ;;  %v7461_v53 = vld [vmem:[#allocation11 + $0x2d0] ss:$24 sps:$4 sm:$0xff]   ;;  %v7472_v44 = vld [vmem:[#allocation11 + $0x30c] ss:$24 sps:$4 sm:$0xff]  }
 0x57c   :  { %7967 = vrsqrt.f32 %v3283_v34  ;;  %5903 = vmatpush1.bf16.msra.mxu0 %v7413_v61  ;;  %v7457_v34 = vld [vmem:[#allocation11 + $0x2a4] ss:$24 sps:$4 sm:$0xff]   ;;  %v8502_v46 = vsub.s32 4, %v8296_v54 }
 0x57d   :  { %5904 = vmatprep.subr.bf16.mxu0 %v7421_v2  ;;  %v7469_v42 = vld [vmem:[#allocation11 + $0x304] ss:$24 sps:$4 sm:$0xff]  }
 0x57e   :  { %6067 = vmatpush1.bf16.msra.mxu1 %v7416_v62  ;;  %v1515_v45 = vrot.slane %v8429_v21, %v8502_v46 }
 0x57f   :  { %6068 = vmatprep.subr.bf16.mxu1 %v7424_v13 }
 0x580   :  { %5905 = vmatpush1.bf16.msra.mxu0 %v7419_v15 }
 0x581   :  { %5906 = vmatprep.subr.bf16.mxu0 %v7427_v4 }
 0x582   :  { %6069 = vmatpush1.bf16.msra.mxu1 %v7422_v3 }
 0x583   :  { %6070 = vmatprep.subr.bf16.mxu1 %v7430_v6 }
 0x584   :  { %5907 = vmatpush1.bf16.msra.mxu0 %v7425_v7 }
 0x585   :  { %v7966_v51 = vpop.eup %7965  ;;  %5908 = vmatprep.subr.bf16.mxu0 %v7433_v35 }
 0x586   :  { %v7968_v29 = vpop.eup %7967  ;;  %6071 = vmatpush1.bf16.msra.mxu1 %v7428_v40 }
 0x587   :  { %v3305_v58 = vcombine.low %v7966_v51, %v7968_v29  ;;  %6072 = vmatprep.subr.bf16.mxu1 %v7436_v5  ;;  %v8505_v51 = vsub.s32 5, %v8296_v54  ;;  %v8512_v29 = vadd.f32 %v8468_v14, %v1515_v45 }
 0x588   :  { %5909 = vmatpush1.bf16.msra.mxu0 %v7431_v8  ;;  %v8526_v8 = vsub.s32 6, %v8296_v54 }
 0x589   :  { %v8497_v0 = vrot.slane %v3305_v58, %v8309_v26  ;;  %5910 = vmatprep.subr.bf16.mxu0 %v7439_v10  ;;  %v1519_v43 = vrot.slane %v8429_v21, %v8505_v51  ;;  %v3168_v16 = vrot.slane %v8512_v29, 4  ;;  %v3204_v59 = vmul.f32 %v8512_v29, %v8512_v29 }
 0x58a   :  { %6073 = vmatpush1.bf16.msra.mxu1 %v7434_v9  ;;  %v8529_v9 = vsub.s32 7, %v8296_v54 }
 0x58b   :  { %v3336_v1 = vcombine.low %v8494_v63, %v8497_v0  ;;  %6074 = vmatprep.subr.bf16.mxu1 %v7442_v11  ;;  %v8515_v58 = vadd.f32 %v8472_v18, %v1519_v43  ;;  %v3169_v2 = vadd.f32 %v8512_v29, %v3168_v16  ;;  %v3232_v13 = vrot.slane %v3204_v59, 4 }
 0x58c   :  { %5911 = vmatpush1.bf16.msra.mxu0 %v7437_v17 }
 0x58d   :  { %5912 = vmatprep.subr.bf16.mxu0 %v7445_v22  ;;  %v3174_v61 = vrot.slane %v8515_v58, 4  ;;  %v3205_v62 = vmul.f32 %v8515_v58, %v8515_v58  ;;  %v3170_v3 = vrot.slane %v3169_v2, 2  ;;  %v3233_v4 = vadd.f32 %v3232_v13, %v3204_v59 }
 0x58e   :  { %6075 = vmatpush1.bf16.msra.mxu1 %v7440_v19  ;;  %v1523_v22 = vrot.slane %v8429_v21, %v8526_v8 }
 0x58f   :  { %6076 = vmatprep.subr.bf16.mxu1 %v7448_v25  ;;  %v3175_v15 = vadd.f32 %v8515_v58, %v3174_v61  ;;  %v3238_v14 = vrot.slane %v3205_v62, 4  ;;  %v3171_v7 = vadd.f32 %v3170_v3, %v3169_v2  ;;  %v3234_v40 = vrot.slane %v3233_v4, 2 }
 0x590   :  { %5913 = vmatpush1.bf16.msra.mxu0 %v7443_v23  ;;  %v1527_v25 = vrot.slane %v8429_v21, %v8529_v9 }
 0x591   :  { %5914 = vmatprep.subr.bf16.mxu0 %v7451_v28  ;;  %v3176_v18 = vrot.slane %v3175_v15, 2  ;;  %v3239_v6 = vadd.f32 %v3238_v14, %v3205_v62  ;;  %v3172_v10 = vrot.slane %v3171_v7, 1  ;;  %v3235_v11 = vadd.f32 %v3234_v40, %v3233_v4 }
 0x592   :  { %6077 = vmatpush1.bf16.msra.mxu1 %v7446_v27 }
 0x593   :  { %6078 = vmatprep.subr.bf16.mxu1 %v7454_v24  ;;  %v3177_v35 = vadd.f32 %v3176_v18, %v3175_v15  ;;  %v3240_v5 = vrot.slane %v3239_v6, 2  ;;  %v3173_v23 = vadd.f32 %v3172_v10, %v3171_v7  ;;  %v3236_v27 = vrot.slane %v3235_v11, 1 }
 0x594   :  { %5915 = vmatpush1.bf16.msra.mxu0 %v7449_v32 }
 0x595   :  { %5916 = vmatprep.subr.bf16.mxu0 %v7457_v34  ;;  %v3178_v17 = vrot.slane %v3177_v35, 1  ;;  %v3241_v19 = vadd.f32 %v3240_v5, %v3239_v6 }
 0x596   :  { %6079 = vmatpush1.bf16.msra.mxu1 %v7452_v33 }
 0x597   :  { %6080 = vmatprep.subr.bf16.mxu1 %v7460_v36  ;;  %v3179_v28 = vadd.f32 %v3178_v17, %v3177_v35  ;;  %v3242_v24 = vrot.slane %v3241_v19, 1 }
 0x598   :  { %5917 = vmatpush1.bf16.msra.mxu0 %v7455_v41  ;;  %v8539_v41 = vmul.f32 0.125, %v3173_v23 }
 0x599   :  { %5918 = vmatprep.subr.bf16.mxu0 %v7463_v49 }
 0x59a   :  { %6081 = vmatpush1.bf16.msra.mxu1 %v7458_v47  ;;  %v3237_v47 = vadd.f32 %v3236_v27, %v3235_v11  ;;  %v3268_v62 = vmul.f32 %v8539_v41, %v8539_v41 }
 0x59b   :  { %6082 = vmatprep.subr.bf16.mxu1 %v7466_v52 }
 0x59c   :  { %5919 = vmatpush1.bf16.msra.mxu0 %v7461_v53  ;;  %v8544_v53 = vmul.f32 0.125, %v3179_v28  ;;  %v3260_v61 = vmul.f32 0.125, %v3237_v47 }
 0x59d   :  { %5929 = vmatprep.subr.bf16.mxu0 %v7469_v42 }
 0x59e   :  { %6083 = vmatpush1.bf16.msra.mxu1 %v7464_v55  ;;  %v3243_v55 = vadd.f32 %v3242_v24, %v3241_v19  ;;  %v3269_v14 = vmul.f32 %v8544_v53, %v8544_v53  ;;  %v3276_v35 = vsub.f32 %v3260_v61, %v3268_v62 }
 0x59f   :  { %6093 = vmatprep.subr.bf16.mxu1 %v7472_v44 }
 0x5a0   :  { %v3261_v15 = vmul.f32 0.125, %v3243_v55  ;;  %v3284_v28 = vadd.f32 1e-05, %v3276_v35 }
 0x5a2   :  { %v3277_v11 = vsub.f32 %v3261_v15, %v3269_v14  ;;  %7969 = vrsqrt.f32 %v3284_v28 }
 0x5e4   :  { %v3137_v32 = vpop.f32.mrb[20].mxu1 }
 0x5e5   :  { %v8535_v33 = vadd.f32 %v3137_v32, %v1523_v22  ;;  %v3139_v34 = vpop.f32.mrb[21].mxu1 }
 0x5e6   :  { %v8537_v54 = vadd.f32 %v3139_v34, %v1527_v25  ;;  %v3141_v36 = vpop.f32.mrb[22].mxu1  ;;  %v3285_v34 = vadd.f32 1e-05, %v3277_v11 }
 0x5e7   :  { %v3180_v49 = vrot.slane %v8535_v33, 4  ;;  %v3206_v52 = vmul.f32 %v8535_v33, %v8535_v33  ;;  %v3142_v21 = vpop.f32.mrb[23].mxu1 }
 0x5e8   :  { %v3186_v42 = vrot.slane %v8537_v54, 4  ;;  %v3207_v44 = vmul.f32 %v8537_v54, %v8537_v54  ;;  %7971 = vrsqrt.f32 %v3285_v34 }
 0x5e9   :  { %v3181_v45 = vadd.f32 %v8535_v33, %v3180_v49  ;;  %v3244_v43 = vrot.slane %v3206_v52, 4 }
 0x5ea   :  { %v3187_v16 = vadd.f32 %v8537_v54, %v3186_v42  ;;  %v3250_v59 = vrot.slane %v3207_v44, 4 }
 0x5eb   :  { %v3182_v2 = vrot.slane %v3181_v45, 2  ;;  %v3245_v13 = vadd.f32 %v3244_v43, %v3206_v52 }
 0x5ec   :  { %v3188_v3 = vrot.slane %v3187_v16, 2  ;;  %v3251_v4 = vadd.f32 %v3250_v59, %v3207_v44 }
 0x5ed   :  { %v3183_v18 = vadd.f32 %v3182_v2, %v3181_v45  ;;  %v3246_v6 = vrot.slane %v3245_v13, 2 }
 0x5ee   :  { %v3189_v7 = vadd.f32 %v3188_v3, %v3187_v16  ;;  %v3252_v40 = vrot.slane %v3251_v4, 2  ;;  %v7970_v16 = vpop.eup %7969 }
 0x5ef   :  { %v3184_v5 = vrot.slane %v3183_v18, 1  ;;  %v3247_v10 = vadd.f32 %v3246_v6, %v3245_v13  ;;  %v1493_v6 = vld [vmem:[#allocation13 + $0x1d] sm:$0xff] }
 0x5f0   :  { %v3190_v17 = vrot.slane %v3189_v7, 1  ;;  %v3253_v19 = vadd.f32 %v3252_v40, %v3251_v4  ;;  %v3344_v4 = vrot.slane %v3336_v1, %v8309_v26 }
 0x5f1   :  { %v3185_v22 = vadd.f32 %v3184_v5, %v3183_v18  ;;  %v3248_v25 = vrot.slane %v3247_v10, 1 }
 0x5f2   :  { %v3191_v23 = vadd.f32 %v3190_v17, %v3189_v7  ;;  %v3254_v27 = vrot.slane %v3253_v19, 1  ;;  %v7972_v59 = vpop.eup %7971 }
 0x5f3   :  { %v3198_v24 = vmul.f32 0.125, %v3185_v22  ;;  %v3249_v32 = vadd.f32 %v3248_v25, %v3247_v10  ;;  %v3306_v62 = vcombine.low %v7970_v16, %v7972_v59 }
 0x5f4   :  { %v3199_v36 = vmul.f32 0.125, %v3191_v23  ;;  %v3255_v47 = vadd.f32 %v3254_v27, %v3253_v19 }
 0x5f5   :  { %v3262_v49 = vmul.f32 0.125, %v3249_v32  ;;  %v3270_v52 = vmul.f32 %v3198_v24, %v3198_v24  ;;  %v3328_v15 = vrot.slane %v3306_v62, %v8309_v26 }
 0x5f6   :  { %v3263_v21 = vmul.f32 0.125, %v3255_v47  ;;  %v3271_v55 = vmul.f32 %v3199_v36, %v3199_v36 }
 0x5f7   :  { %v3278_v42 = vsub.f32 %v3262_v49, %v3270_v52 }
 0x5f8   :  { %v3279_v44 = vsub.f32 %v3263_v21, %v3271_v55 }
 0x5f9   :  { %v3286_v45 = vadd.f32 1e-05, %v3278_v42 }
 0x5fa   :  { %v3287_v43 = vadd.f32 1e-05, %v3279_v44 }
 0x5fb   :  { %7973 = vrsqrt.f32 %v3286_v45 }
 0x5fc   :  { %7975 = vrsqrt.f32 %v3287_v43 }
 0x605   :  { %v7974_v61 = vpop.eup %7973 }
 0x606   :  { %v7976_v2 = vpop.eup %7975 }
 0x607   :  { %v3307_v13 = vcombine.low %v7974_v61, %v7976_v2 }
 0x609   :  { %v3335_v14 = vrot.slane %v3307_v13, %v8309_v26 }
 0x60b   :  { %v3337_v3 = vcombine.low %v3328_v15, %v3335_v14 }
 0x60d   :  { %v3351_v18 = vrot.slane %v3337_v3, %v8309_v26 }
 0x60f   :  { %v3352_v7 = vcombine.low %v3344_v4, %v3351_v18 }
 0x611   :  { %v3354_v40 = vmul.f32 %v3352_v7, %v1493_v6 }
 0x613   :  { %v3375_v35 = vrot.slane %v3354_v40, %v8502_v46  ;;  %v3379_v5 = vrot.slane %v3354_v40, %v8505_v51  ;;  %v3383_v10 = vrot.slane %v3354_v40, %v8526_v8  ;;  %v3387_v11 = vrot.slane %v3354_v40, %v8529_v9 }
 0x614   :  { %v3359_v17 = vrot.slane %v3354_v40, %v8299_v56  ;;  %v3363_v19 = vrot.slane %v3354_v40, %v8304_v39  ;;  %v3367_v63 = vrot.slane %v3354_v40, %v8366_v30  ;;  %v3371_v0 = vrot.slane %v3354_v40, %v8369_v31 }
 0x615   :  { %v3400_v1 = vmul.f32 %v3375_v35, %v8539_v41  ;;  %v3401_v22 = vmul.f32 %v3379_v5, %v8544_v53  ;;  %v3402_v25 = vmul.f32 %v3383_v10, %v3198_v24  ;;  %v3403_v23 = vmul.f32 %v3387_v11, %v3199_v36 }
 0x616   :  { %v3470_v27 = vmul.f32 %v8537_v54, %v3387_v11  ;;  %v3396_v28 = vmul.f32 %v3359_v17, %v8447_v48  ;;  %v3397_v32 = vmul.f32 %v3363_v19, %v8449_v50  ;;  %v3398_v34 = vmul.f32 %v3367_v63, %v8482_v38  ;;  %v7467_v11 = vld [vmem:[#allocation11 + $0x300] ss:$24 sps:$4 sm:$0xff]  }
 0x617   :  { %v3414_v47 = vcombine.low %v3400_v1, %v3401_v22  ;;  %v3415_v49 = vcombine.low %v3402_v25, %v3403_v23  ;;  %v3399_v52 = vmul.f32 %v3371_v0, %v8484_v37  ;;  %v3464_v21 = vmul.f32 %v3363_v19, %v8437_v60  ;;  %v7478_v1 = vld [vmem:[#allocation11 + $0x33c] ss:$24 sps:$4 sm:$0xff]   ;;  %v7473_v25 = vld [vmem:[#allocation11 + $0x330] ss:$24 sps:$4 sm:$0xff]  }
 0x618   :  { %v3412_v55 = vcombine.low %v3396_v28, %v3397_v32  ;;  %v3463_v41 = vmul.f32 %v3359_v17, %v8435_v57  ;;  %v3466_v53 = vmul.f32 %v8470_v20, %v3371_v0  ;;  %v3469_v38 = vmul.f32 %v8535_v33, %v3383_v10  ;;  %v1494_v57 = vld [vmem:[#allocation13 + $0x25] sm:$0xff]  ;;  %v7476_v23 = vld [vmem:[#allocation11 + $0x338] ss:$24 sps:$4 sm:$0xff]  }
 0x619   :  { %v3436_v24 = vrot.slane %v3414_v47, %v8309_v26  ;;  %v3443_v54 = vrot.slane %v3415_v49, %v8309_v26  ;;  %v3413_v48 = vcombine.low %v3398_v34, %v3399_v52  ;;  %v3465_v43 = vmul.f32 %v8466_v12, %v3367_v63  ;;  %v7470_v17 = vld [vmem:[#allocation11 + $0x308] ss:$24 sps:$4 sm:$0xff]   ;;  %v7475_v0 = vld [vmem:[#allocation11 + $0x334] ss:$24 sps:$4 sm:$0xff]  }
 0x61a   :  { %v3422_v50 = vrot.slane %v3412_v55, %v8309_v26  ;;  %v3468_v16 = vmul.f32 %v8515_v58, %v3379_v5  ;;  %v3467_v59 = vmul.f32 %v8512_v29, %v3375_v35  ;;  %v7484_v28 = vld [vmem:[#allocation11 + $0x36c] ss:$24 sps:$4 sm:$0xff]   ;;  %v7479_v32 = vld [vmem:[#allocation11 + $0x360] ss:$24 sps:$4 sm:$0xff]   ;;  %v7490_v49 = vld [vmem:[#allocation11 + $0x39c] ss:$24 sps:$4 sm:$0xff]  }
 0x61b   :  { %v3445_v36 = vcombine.low %v3436_v24, %v3443_v54  ;;  %v3429_v42 = vrot.slane %v3413_v48, %v8309_v26  ;;  %v7482_v34 = vld [vmem:[#allocation11 + $0x368] ss:$24 sps:$4 sm:$0xff]   ;;  %v7487_v47 = vld [vmem:[#allocation11 + $0x394] ss:$24 sps:$4 sm:$0xff]   ;;  %v7493_v55 = vld [vmem:[#allocation11 + $0x3c4] ss:$24 sps:$4 sm:$0xff]  }
 0x61c   :  { %v7485_v52 = vld [vmem:[#allocation11 + $0x390] ss:$24 sps:$4 sm:$0xff]   ;;  %v7499_v54 = vld [vmem:[#allocation11 + $0x3f4] ss:$24 sps:$4 sm:$0xff]  }
 0x61d   :  { %v3459_v37 = vrot.slane %v3445_v36, %v8309_v26  ;;  %v3444_v60 = vcombine.low %v3422_v50, %v3429_v42  ;;  %v7494_v24 = vld [vmem:[#allocation11 + $0x3c8] ss:$24 sps:$4 sm:$0xff]   ;;  %v7502_v48 = vld [vmem:[#allocation11 + $0x3fc] ss:$24 sps:$4 sm:$0xff]   ;;  %v7508_v42 = vld [vmem:[#allocation11 + $0x42c] ss:$24 sps:$4 sm:$0xff]  }
 0x61e   :  { %v7497_v50 = vld [vmem:[#allocation11 + $0x3f0] ss:$24 sps:$4 sm:$0xff]   ;;  %v7505_v36 = vld [vmem:[#allocation11 + $0x424] ss:$24 sps:$4 sm:$0xff]  }
 0x61f   :  { %v3452_v44 = vrot.slane %v3444_v60, %v8309_v26  ;;  %v7506_v60 = vld [vmem:[#allocation11 + $0x428] ss:$24 sps:$4 sm:$0xff]  }
 0x621   :  { %v3460_v45 = vcombine.low %v3452_v44, %v3459_v37  ;;  %v7503_v37 = vld [vmem:[#allocation11 + $0x420] ss:$24 sps:$4 sm:$0xff]   ;;  %v7511_v44 = vld [vmem:[#allocation11 + $0x454] ss:$24 sps:$4 sm:$0xff]  }
 0x623   :  { %v3462_v20 = vsub.f32 %v1494_v57, %v3460_v45  ;;  %v7514_v57 = vld [vmem:[#allocation11 + $0x45c] ss:$24 sps:$4 sm:$0xff]   ;;  %v7509_v45 = vld [vmem:[#allocation11 + $0x450] ss:$24 sps:$4 sm:$0xff]  }
 0x625   :  { %v3479_v61 = vrot.slane %v3462_v20, %v8304_v39  ;;  %v3475_v33 = vrot.slane %v3462_v20, %v8299_v56  ;;  %v3487_v62 = vrot.slane %v3462_v20, %v8369_v31  ;;  %v3483_v2 = vrot.slane %v3462_v20, %v8366_v30 }
 0x626   :  { %v3495_v13 = vrot.slane %v3462_v20, %v8505_v51  ;;  %v3491_v26 = vrot.slane %v3462_v20, %v8502_v46  ;;  %v3503_v15 = vrot.slane %v3462_v20, %v8529_v9  ;;  %v3499_v12 = vrot.slane %v3462_v20, %v8526_v8  ;;  %v7512_v20 = vld [vmem:[#allocation11 + $0x458] ss:$24 sps:$4 sm:$0xff]  }
 0x627   :  { %v3513_v14 = vadd.f32 %v3479_v61, %v3464_v21  ;;  %v3512_v58 = vadd.f32 %v3475_v33, %v3463_v41  ;;  %v3515_v3 = vadd.f32 %v3487_v62, %v3466_v53  ;;  %v8598_v29 = vadd.f32 %v3483_v2, %v3465_v43  ;;  %v7488_v21 = vld [vmem:[#allocation11 + $0x398] ss:$24 sps:$4 sm:$0xff]   ;;  %v7496_v41 = vld [vmem:[#allocation11 + $0x3cc] ss:$24 sps:$4 sm:$0xff]   ;;  %v7518_v61 = vld [vmem:[#allocation11 + $0x488] ss:$24 sps:$4 sm:$0xff]  }
 0x628   :  { %v8600_v4 = vadd.f32 %v3495_v13, %v3468_v16  ;;  %v8602_v18 = vadd.f32 %v3491_v26, %v3467_v59  ;;  %v8604_v6 = vadd.f32 %v3503_v15, %v3470_v27  ;;  %v8606_v7 = vadd.f32 %v3499_v12, %v3469_v38  ;;  %v7481_v27 = vld [vmem:[#allocation11 + $0x364] ss:$24 sps:$4 sm:$0xff]   ;;  %v7491_v53 = vld [vmem:[#allocation11 + $0x3c0] ss:$24 sps:$4 sm:$0xff]   ;;  %v7523_v33 = vld [vmem:[#allocation11 + $0x4b4] ss:$24 sps:$4 sm:$0xff]  }
 0x629   :  { %vm3521_vm9 = vcmp.gt.f32.partialorder %v3513_v14, 0.0  ;;  %v3529_v40 = vmul.f32 0.2, %v3513_v14  ;;  %vm3520_vm10 = vcmp.gt.f32.partialorder %v3512_v58, 0.0  ;;  %v3528_v35 = vmul.f32 0.2, %v3512_v58 }
 0x62a   :  { %vm3523_vm11 = vcmp.gt.f32.partialorder %v3515_v3, 0.0  ;;  %v3531_v9 = vmul.f32 0.2, %v3515_v3  ;;  %v7500_v38 = vld [vmem:[#allocation11 + $0x3f8] ss:$24 sps:$4 sm:$0xff]   ;;  %vm3522_vm12 = vcmp.gt.f32.partialorder %v8598_v29, 0.0 }
 0x62b   :  { %v3537_v8 = vsel %vm3521_vm9, %v3513_v14, %v3529_v40  ;;  %v3536_v5 = vsel %vm3520_vm10, %v3512_v58, %v3528_v35  ;;  %v7517_v43 = vld [vmem:[#allocation11 + $0x484] ss:$24 sps:$4 sm:$0xff]   ;;  %v7515_v59 = vld [vmem:[#allocation11 + $0x480] ss:$24 sps:$4 sm:$0xff]   ;;  %v7521_v2 = vld [vmem:[#allocation11 + $0x4b0] ss:$24 sps:$4 sm:$0xff]  }
 0x62c   :  { %v8608_v10 = vpack.c.bf16 %v3537_v8, %v3537_v8  ;;  %v8610_v19 = vpack.c.bf16 %v3536_v5, %v3536_v5  ;;  %v3539_v63 = vsel %vm3523_vm11, %v3515_v3, %v3531_v9  ;;  %v7520_v16 = vld [vmem:[#allocation11 + $0x48c] ss:$24 sps:$4 sm:$0xff]   ;;  %v7526_v62 = vld [vmem:[#allocation11 + $0x4bc] ss:$24 sps:$4 sm:$0xff]   ;;  %v7524_v13 = vld [vmem:[#allocation11 + $0x4b8] ss:$24 sps:$4 sm:$0xff]  }
 0x62d   :  { %v8616_v22 = vpack.c.bf16 %v3539_v63, %v3539_v63  ;;  %v7529_v26 = vld [vmem:[#allocation11 + $0x4e4] ss:$24 sps:$4 sm:$0xff]   ;;  %v7527_v12 = vld [vmem:[#allocation11 + $0x4e0] ss:$24 sps:$4 sm:$0xff]   ;;  %v7535_v58 = vld [vmem:[#allocation11 + $0x514] ss:$24 sps:$4 sm:$0xff]  }
 0x62e   :  { %5920 = vmatprep.mubr.bf16.mxu0 %v8608_v10  ;;  %6084 = vmatprep.mubr.bf16.mxu1 %v8608_v10  ;;  %v7532_v15 = vld [vmem:[#allocation11 + $0x4ec] ss:$24 sps:$4 sm:$0xff]   ;;  %v7530_v14 = vld [vmem:[#allocation11 + $0x4e8] ss:$24 sps:$4 sm:$0xff]   ;;  %v7538_v3 = vld [vmem:[#allocation11 + $0x51c] ss:$24 sps:$4 sm:$0xff]  }
 0x62f   :  { %5921 = vmatmul.mubr.bf16.vlgmr.msra.gmra.mrb[12].mxu0 %v8610_v19  ;;  %6085 = vmatmul.mubr.bf16.vlgmr.msra.gmra.mrb[24].mxu1 %v8610_v19  ;;  %v7533_v40 = vld [vmem:[#allocation11 + $0x510] ss:$24 sps:$4 sm:$0xff]   ;;  %v7541_v9 = vld [vmem:[#allocation11 + $0x544] ss:$24 sps:$4 sm:$0xff]   ;;  %v7539_v5 = vld [vmem:[#allocation11 + $0x540] ss:$24 sps:$4 sm:$0xff]  }
 0x630   :  { %5930 = vmatpush1.bf16.msra.mxu0 %v7467_v11  ;;  %6094 = vmatpush1.bf16.msra.mxu1 %v7470_v17  ;;  %v7536_v35 = vld [vmem:[#allocation11 + $0x518] ss:$24 sps:$4 sm:$0xff]   ;;  %v7544_v8 = vld [vmem:[#allocation11 + $0x54c] ss:$24 sps:$4 sm:$0xff]   ;;  %v7542_v11 = vld [vmem:[#allocation11 + $0x548] ss:$24 sps:$4 sm:$0xff]  }
 0x631   :  { %5961 = vmatprep.mubr.bf16.mxu0 %v8616_v22  ;;  %6125 = vmatprep.mubr.bf16.mxu1 %v8616_v22  ;;  %v7547_v17 = vld [vmem:[#allocation11 + $0x574] ss:$24 sps:$4 sm:$0xff]   ;;  %vm3525_vm13 = vcmp.gt.f32.partialorder %v8600_v4, 0.0  ;;  %vm3524_vm14 = vcmp.gt.f32.partialorder %v8602_v18, 0.0  ;;  %vm3527_vm15 = vcmp.gt.f32.partialorder %v8604_v6, 0.0  ;;  %vm3526_vm0 = vcmp.gt.f32.partialorder %v8606_v7, 0.0 }
 0x632   :  { %5931 = vmatprep.subr.bf16.mxu0 %v7475_v0  ;;  %6095 = vmatprep.subr.bf16.mxu1 %v7478_v1  ;;  %v7550_v63 = vld [vmem:[#allocation11 + $0x57c] ss:$24 sps:$4 sm:$0xff]   ;;  %v7545_v0 = vld [vmem:[#allocation11 + $0x570] ss:$24 sps:$4 sm:$0xff]  }
 0x633   :  { %v7548_v1 = vld [vmem:[#allocation11 + $0x578] ss:$24 sps:$4 sm:$0xff]  }
 0x634   :  { %5932 = vmatpush1.bf16.msra.mxu0 %v7473_v25  ;;  %6096 = vmatpush1.bf16.msra.mxu1 %v7476_v23  ;;  %v7553_v25 = vld [vmem:[#allocation11 + $0x5a4] ss:$24 sps:$4 sm:$0xff]  }
 0x635   :  { %5933 = vmatprep.subr.bf16.mxu0 %v7481_v27  ;;  %6097 = vmatprep.subr.bf16.mxu1 %v7484_v28  ;;  %v7556_v23 = vld [vmem:[#allocation11 + $0x5ac] ss:$24 sps:$4 sm:$0xff]   ;;  %v7551_v27 = vld [vmem:[#allocation11 + $0x5a0] ss:$24 sps:$4 sm:$0xff]  }
 0x636   :  { %v7554_v28 = vld [vmem:[#allocation11 + $0x5a8] ss:$24 sps:$4 sm:$0xff]  }
 0x638   :  { %5934 = vmatpush1.bf16.msra.mxu0 %v7479_v32  ;;  %6098 = vmatpush1.bf16.msra.mxu1 %v7482_v34  ;;  %v7559_v32 = vld [vmem:[#allocation11 + $0x5d4] ss:$24 sps:$4 sm:$0xff]  }
 0x639   :  { %5935 = vmatprep.subr.bf16.mxu0 %v7487_v47  ;;  %6099 = vmatprep.subr.bf16.mxu1 %v7490_v49  ;;  %v7562_v34 = vld [vmem:[#allocation11 + $0x5dc] ss:$24 sps:$4 sm:$0xff]   ;;  %v3530_v47 = vmul.f32 0.2, %v8598_v29  ;;  %v3533_v49 = vmul.f32 0.2, %v8600_v4 }
 0x63c   :  { %5936 = vmatpush1.bf16.msra.mxu0 %v7485_v52  ;;  %6100 = vmatpush1.bf16.msra.mxu1 %v7488_v21  ;;  %v7557_v52 = vld [vmem:[#allocation11 + $0x5d0] ss:$24 sps:$4 sm:$0xff]  }
 0x63d   :  { %5937 = vmatprep.subr.bf16.mxu0 %v7493_v55  ;;  %6101 = vmatprep.subr.bf16.mxu1 %v7496_v41  ;;  %v7560_v21 = vld [vmem:[#allocation11 + $0x5d8] ss:$24 sps:$4 sm:$0xff]   ;;  %v7565_v55 = vld [vmem:[#allocation11 + $0x604] ss:$24 sps:$4 sm:$0xff]  }
 0x63e   :  { %v7568_v41 = vld [vmem:[#allocation11 + $0x60c] ss:$24 sps:$4 sm:$0xff]  }
 0x640   :  { %5938 = vmatpush1.bf16.msra.mxu0 %v7491_v53  ;;  %6102 = vmatpush1.bf16.msra.mxu1 %v7494_v24  ;;  %v3538_v53 = vsel %vm3522_vm12, %v8598_v29, %v3530_v47  ;;  %v3541_v24 = vsel %vm3525_vm13, %v8600_v4, %v3533_v49  ;;  %v7569_v29 = vld [vmem:[#allocation11 + $0x630] ss:$24 sps:$4 sm:$0xff]   ;;  %v7631_v47 = vld [vmem:[#allocation11 + $0x814] ss:$24 sps:$4 sm:$0xff]  }
 0x641   :  { %5939 = vmatprep.subr.bf16.mxu0 %v7499_v54  ;;  %6103 = vmatprep.subr.bf16.mxu1 %v7502_v48  ;;  %v7563_v54 = vld [vmem:[#allocation11 + $0x600] ss:$24 sps:$4 sm:$0xff]   ;;  %v8626_v48 = vpack.c.bf16 %v3538_v53, %v3538_v53  ;;  %v7634_v49 = vld [vmem:[#allocation11 + $0x81c] ss:$24 sps:$4 sm:$0xff]  }
 0x642   :  { %v7572_v4 = vld [vmem:[#allocation11 + $0x638] ss:$24 sps:$4 sm:$0xff]  }
 0x643   :  { %v7635_v53 = vld [vmem:[#allocation11 + $0x840] ss:$24 sps:$4 sm:$0xff]  }
 0x644   :  { %5940 = vmatpush1.bf16.msra.mxu0 %v7497_v50  ;;  %6104 = vmatpush1.bf16.msra.mxu1 %v7500_v38  ;;  %v7566_v50 = vld [vmem:[#allocation11 + $0x608] ss:$24 sps:$4 sm:$0xff]   ;;  %v8628_v38 = vpack.c.bf16 %v3541_v24, %v3541_v24 }
 0x645   :  { %5941 = vmatprep.subr.bf16.mxu0 %v7505_v36  ;;  %6105 = vmatprep.subr.bf16.mxu1 %v7508_v42  ;;  %v7571_v36 = vld [vmem:[#allocation11 + $0x634] ss:$24 sps:$4 sm:$0xff]   ;;  %v7638_v24 = vld [vmem:[#allocation11 + $0x848] ss:$24 sps:$4 sm:$0xff]  }
 0x646   :  { %v7574_v42 = vld [vmem:[#allocation11 + $0x63c] ss:$24 sps:$4 sm:$0xff]  }
 0x648   :  { %5942 = vmatpush1.bf16.msra.mxu0 %v7503_v37  ;;  %6106 = vmatpush1.bf16.msra.mxu1 %v7506_v60  ;;  %v7577_v37 = vld [vmem:[#allocation11 + $0x664] ss:$24 sps:$4 sm:$0xff]  }
 0x649   :  { %5943 = vmatprep.subr.bf16.mxu0 %v7511_v44  ;;  %6107 = vmatprep.subr.bf16.mxu1 %v7514_v57  ;;  %v7580_v60 = vld [vmem:[#allocation11 + $0x66c] ss:$24 sps:$4 sm:$0xff]   ;;  %v7575_v44 = vld [vmem:[#allocation11 + $0x660] ss:$24 sps:$4 sm:$0xff]  }
 0x64a   :  { %v7578_v57 = vld [vmem:[#allocation11 + $0x668] ss:$24 sps:$4 sm:$0xff]  }
 0x64c   :  { %5944 = vmatpush1.bf16.msra.mxu0 %v7509_v45  ;;  %6108 = vmatpush1.bf16.msra.mxu1 %v7512_v20  ;;  %v7583_v45 = vld [vmem:[#allocation11 + $0x694] ss:$24 sps:$4 sm:$0xff]  }
 0x64d   :  { %5945 = vmatprep.subr.bf16.mxu0 %v7517_v43  ;;  %6109 = vmatprep.subr.bf16.mxu1 %v7520_v16  ;;  %v7586_v20 = vld [vmem:[#allocation11 + $0x69c] ss:$24 sps:$4 sm:$0xff]   ;;  %v7581_v43 = vld [vmem:[#allocation11 + $0x690] ss:$24 sps:$4 sm:$0xff]  }
 0x64e   :  { %v7584_v16 = vld [vmem:[#allocation11 + $0x698] ss:$24 sps:$4 sm:$0xff]  }
 0x650   :  { %5946 = vmatpush1.bf16.msra.mxu0 %v7515_v59  ;;  %6110 = vmatpush1.bf16.msra.mxu1 %v7518_v61  ;;  %v7589_v59 = vld [vmem:[#allocation11 + $0x6c4] ss:$24 sps:$4 sm:$0xff]  }
 0x651   :  { %5947 = vmatprep.subr.bf16.mxu0 %v7523_v33  ;;  %6111 = vmatprep.subr.bf16.mxu1 %v7526_v62  ;;  %v7592_v61 = vld [vmem:[#allocation11 + $0x6cc] ss:$24 sps:$4 sm:$0xff]   ;;  %v7587_v33 = vld [vmem:[#allocation11 + $0x6c0] ss:$24 sps:$4 sm:$0xff]  }
 0x652   :  { %v7590_v62 = vld [vmem:[#allocation11 + $0x6c8] ss:$24 sps:$4 sm:$0xff]  }
 0x654   :  { %5948 = vmatpush1.bf16.msra.mxu0 %v7521_v2  ;;  %6112 = vmatpush1.bf16.msra.mxu1 %v7524_v13  ;;  %v7595_v2 = vld [vmem:[#allocation11 + $0x6f4] ss:$24 sps:$4 sm:$0xff]  }
 0x655   :  { %5949 = vmatprep.subr.bf16.mxu0 %v7529_v26  ;;  %6113 = vmatprep.subr.bf16.mxu1 %v7532_v15  ;;  %v7598_v13 = vld [vmem:[#allocation11 + $0x6fc] ss:$24 sps:$4 sm:$0xff]   ;;  %v7593_v26 = vld [vmem:[#allocation11 + $0x6f0] ss:$24 sps:$4 sm:$0xff]  }
 0x656   :  { %v7596_v15 = vld [vmem:[#allocation11 + $0x6f8] ss:$24 sps:$4 sm:$0xff]  }
 0x658   :  { %5950 = vmatpush1.bf16.msra.mxu0 %v7527_v12  ;;  %6114 = vmatpush1.bf16.msra.mxu1 %v7530_v14  ;;  %v7601_v12 = vld [vmem:[#allocation11 + $0x724] ss:$24 sps:$4 sm:$0xff]  }
 0x659   :  { %5951 = vmatprep.subr.bf16.mxu0 %v7535_v58  ;;  %6115 = vmatprep.subr.bf16.mxu1 %v7538_v3  ;;  %v7604_v14 = vld [vmem:[#allocation11 + $0x72c] ss:$24 sps:$4 sm:$0xff]   ;;  %v7599_v58 = vld [vmem:[#allocation11 + $0x720] ss:$24 sps:$4 sm:$0xff]  }
 0x65a   :  { %v7602_v3 = vld [vmem:[#allocation11 + $0x728] ss:$24 sps:$4 sm:$0xff]  }
 0x65c   :  { %5952 = vmatpush1.bf16.msra.mxu0 %v7533_v40  ;;  %6116 = vmatpush1.bf16.msra.mxu1 %v7536_v35  ;;  %v7607_v40 = vld [vmem:[#allocation11 + $0x754] ss:$24 sps:$4 sm:$0xff]  }
 0x65d   :  { %5953 = vmatprep.subr.bf16.mxu0 %v7541_v9  ;;  %6117 = vmatprep.subr.bf16.mxu1 %v7544_v8  ;;  %v7610_v35 = vld [vmem:[#allocation11 + $0x75c] ss:$24 sps:$4 sm:$0xff]   ;;  %v7605_v9 = vld [vmem:[#allocation11 + $0x750] ss:$24 sps:$4 sm:$0xff]  }
 0x65e   :  { %v7608_v8 = vld [vmem:[#allocation11 + $0x758] ss:$24 sps:$4 sm:$0xff]  }
 0x660   :  { %5954 = vmatpush1.bf16.msra.mxu0 %v7539_v5  ;;  %6118 = vmatpush1.bf16.msra.mxu1 %v7542_v11  ;;  %v7613_v5 = vld [vmem:[#allocation11 + $0x784] ss:$24 sps:$4 sm:$0xff]  }
 0x661   :  { %5955 = vmatprep.subr.bf16.mxu0 %v7547_v17  ;;  %6119 = vmatprep.subr.bf16.mxu1 %v7550_v63  ;;  %v7616_v11 = vld [vmem:[#allocation11 + $0x78c] ss:$24 sps:$4 sm:$0xff]   ;;  %v7611_v17 = vld [vmem:[#allocation11 + $0x780] ss:$24 sps:$4 sm:$0xff]  }
 0x662   :  { %v7614_v63 = vld [vmem:[#allocation11 + $0x788] ss:$24 sps:$4 sm:$0xff]  }
 0x664   :  { %5956 = vmatpush1.bf16.msra.mxu0 %v7545_v0  ;;  %6120 = vmatpush1.bf16.msra.mxu1 %v7548_v1  ;;  %v7619_v0 = vld [vmem:[#allocation11 + $0x7b4] ss:$24 sps:$4 sm:$0xff]  }
 0x665   :  { %5957 = vmatprep.subr.bf16.mxu0 %v7553_v25  ;;  %6121 = vmatprep.subr.bf16.mxu1 %v7556_v23  ;;  %v7622_v1 = vld [vmem:[#allocation11 + $0x7bc] ss:$24 sps:$4 sm:$0xff]   ;;  %v7617_v25 = vld [vmem:[#allocation11 + $0x7b0] ss:$24 sps:$4 sm:$0xff]  }
 0x666   :  { %v7620_v23 = vld [vmem:[#allocation11 + $0x7b8] ss:$24 sps:$4 sm:$0xff]  }
 0x668   :  { %5958 = vmatpush1.bf16.msra.mxu0 %v7551_v27  ;;  %6122 = vmatpush1.bf16.msra.mxu1 %v7554_v28  ;;  %v7625_v27 = vld [vmem:[#allocation11 + $0x7e4] ss:$24 sps:$4 sm:$0xff]  }
 0x669   :  { %5959 = vmatprep.subr.bf16.mxu0 %v7559_v32  ;;  %6123 = vmatprep.subr.bf16.mxu1 %v7562_v34  ;;  %v7628_v28 = vld [vmem:[#allocation11 + $0x7ec] ss:$24 sps:$4 sm:$0xff]   ;;  %v7623_v32 = vld [vmem:[#allocation11 + $0x7e0] ss:$24 sps:$4 sm:$0xff]  }
 0x66a   :  { %v7626_v34 = vld [vmem:[#allocation11 + $0x7e8] ss:$24 sps:$4 sm:$0xff]  }
 0x66c   :  { %5960 = vmatpush1.bf16.msra.mxu0 %v7557_v52  ;;  %6124 = vmatpush1.bf16.msra.mxu1 %v7560_v21  ;;  %v7629_v52 = vld [vmem:[#allocation11 + $0x810] ss:$24 sps:$4 sm:$0xff]  }
 0x66d   :  { %5970 = vmatprep.subr.bf16.mxu0 %v7565_v55  ;;  %6134 = vmatprep.subr.bf16.mxu1 %v7568_v41  ;;  %v7632_v21 = vld [vmem:[#allocation11 + $0x818] ss:$24 sps:$4 sm:$0xff]   ;;  %v7637_v55 = vld [vmem:[#allocation11 + $0x844] ss:$24 sps:$4 sm:$0xff]  }
 0x66e   :  { %v7640_v41 = vld [vmem:[#allocation11 + $0x84c] ss:$24 sps:$4 sm:$0xff]  }
 0x66f   :  { %5962 = vmatmul.mubr.bf16.vlgmr.msra.gmra.mrb[12].mxu0 %v8626_v48  ;;  %6126 = vmatmul.mubr.bf16.vlgmr.msra.gmra.mrb[24].mxu1 %v8626_v48 }
 0x670   :  { %5971 = vmatpush1.bf16.msra.mxu0 %v7563_v54  ;;  %6002 = vmatprep.mubr.bf16.mxu0 %v8628_v38  ;;  %v7643_v54 = vld [vmem:[#allocation11 + $0x874] ss:$24 sps:$4 sm:$0xff]  }
 0x671   :  { %6135 = vmatpush1.bf16.msra.mxu1 %v7566_v50  ;;  %6166 = vmatprep.mubr.bf16.mxu1 %v8628_v38  ;;  %v7646_v50 = vld [vmem:[#allocation11 + $0x87c] ss:$24 sps:$4 sm:$0xff]  }
 0x672   :  { %5972 = vmatprep.subr.bf16.mxu0 %v7571_v36  ;;  %6136 = vmatprep.subr.bf16.mxu1 %v7574_v42  ;;  %v7641_v36 = vld [vmem:[#allocation11 + $0x870] ss:$24 sps:$4 sm:$0xff]  }
 0x673   :  { %v7644_v42 = vld [vmem:[#allocation11 + $0x878] ss:$24 sps:$4 sm:$0xff]  }
 0x674   :  { %5973 = vmatpush1.bf16.msra.mxu0 %v7569_v29  ;;  %v7649_v29 = vld [vmem:[#allocation11 + $0x8a4] ss:$24 sps:$4 sm:$0xff]  }
 0x675   :  { %6137 = vmatpush1.bf16.msra.mxu1 %v7572_v4  ;;  %5974 = vmatprep.subr.bf16.mxu0 %v7577_v37  ;;  %v7652_v4 = vld [vmem:[#allocation11 + $0x8ac] ss:$24 sps:$4 sm:$0xff]   ;;  %v7647_v37 = vld [vmem:[#allocation11 + $0x8a0] ss:$24 sps:$4 sm:$0xff]  }
 0x676   :  { %6138 = vmatprep.subr.bf16.mxu1 %v7580_v60  ;;  %v7650_v60 = vld [vmem:[#allocation11 + $0x8a8] ss:$24 sps:$4 sm:$0xff]  }
 0x678   :  { %5975 = vmatpush1.bf16.msra.mxu0 %v7575_v44  ;;  %v7655_v44 = vld [vmem:[#allocation11 + $0x8d4] ss:$24 sps:$4 sm:$0xff]  }
 0x679   :  { %6139 = vmatpush1.bf16.msra.mxu1 %v7578_v57  ;;  %5976 = vmatprep.subr.bf16.mxu0 %v7583_v45  ;;  %v7658_v57 = vld [vmem:[#allocation11 + $0x8dc] ss:$24 sps:$4 sm:$0xff]   ;;  %v3532_v45 = vmul.f32 0.2, %v8602_v18 }
 0x67a   :  { %6140 = vmatprep.subr.bf16.mxu1 %v7586_v20  ;;  %v7653_v20 = vld [vmem:[#allocation11 + $0x8d0] ss:$24 sps:$4 sm:$0xff]  }
 0x67c   :  { %5977 = vmatpush1.bf16.msra.mxu0 %v7581_v43  ;;  %v3535_v43 = vmul.f32 0.2, %v8604_v6 }
 0x67d   :  { %6141 = vmatpush1.bf16.msra.mxu1 %v7584_v16  ;;  %5978 = vmatprep.subr.bf16.mxu0 %v7589_v59  ;;  %v7656_v16 = vld [vmem:[#allocation11 + $0x8d8] ss:$24 sps:$4 sm:$0xff]   ;;  %v7661_v59 = vld [vmem:[#allocation11 + $0x904] ss:$24 sps:$4 sm:$0xff]  }
 0x67e   :  { %6142 = vmatprep.subr.bf16.mxu1 %v7592_v61  ;;  %v3540_v61 = vsel %vm3524_vm14, %v8602_v18, %v3532_v45  ;;  %v7665_v18 = vld [vmem:[#allocation11 + $0x930] ss:$24 sps:$4 sm:$0xff]   ;;  %v7727_v45 = vld [vmem:[#allocation11 + $0xb14] ss:$24 sps:$4 sm:$0xff]  }
 0x680   :  { %5979 = vmatpush1.bf16.msra.mxu0 %v7587_v33  ;;  %v7664_v33 = vld [vmem:[#allocation11 + $0x90c] ss:$24 sps:$4 sm:$0xff]  }
 0x681   :  { %6143 = vmatpush1.bf16.msra.mxu1 %v7590_v62  ;;  %5980 = vmatprep.subr.bf16.mxu0 %v7595_v2  ;;  %v7659_v62 = vld [vmem:[#allocation11 + $0x900] ss:$24 sps:$4 sm:$0xff]   ;;  %v3543_v2 = vsel %vm3527_vm15, %v8604_v6, %v3535_v43  ;;  %v7725_v43 = vld [vmem:[#allocation11 + $0xb10] ss:$24 sps:$4 sm:$0xff]  }
 0x682   :  { %6144 = vmatprep.subr.bf16.mxu1 %v7598_v13  ;;  %v8640_v13 = vpack.c.bf16 %v3540_v61, %v3540_v61  ;;  %v7668_v6 = vld [vmem:[#allocation11 + $0x938] ss:$24 sps:$4 sm:$0xff]   ;;  %v7736_v61 = vld [vmem:[#allocation11 + $0xb4c] ss:$24 sps:$4 sm:$0xff]  }
 0x684   :  { %5981 = vmatpush1.bf16.msra.mxu0 %v7593_v26  ;;  %v7662_v26 = vld [vmem:[#allocation11 + $0x908] ss:$24 sps:$4 sm:$0xff]  }
 0x685   :  { %6145 = vmatpush1.bf16.msra.mxu1 %v7596_v15  ;;  %5982 = vmatprep.subr.bf16.mxu0 %v7601_v12  ;;  %v7667_v15 = vld [vmem:[#allocation11 + $0x934] ss:$24 sps:$4 sm:$0xff]   ;;  %v8643_v12 = vpack.c.bf16 %v3543_v2, %v3543_v2 }
 0x686   :  { %6146 = vmatprep.subr.bf16.mxu1 %v7604_v14  ;;  %v7670_v14 = vld [vmem:[#allocation11 + $0x93c] ss:$24 sps:$4 sm:$0xff]  }
 0x687   :  { %v7739_v2 = vld [vmem:[#allocation11 + $0xb74] ss:$24 sps:$4 sm:$0xff]  }
 0x688   :  { %5983 = vmatpush1.bf16.msra.mxu0 %v7599_v58  ;;  %v7673_v58 = vld [vmem:[#allocation11 + $0x964] ss:$24 sps:$4 sm:$0xff]  }
 0x689   :  { %6147 = vmatpush1.bf16.msra.mxu1 %v7602_v3  ;;  %5984 = vmatprep.subr.bf16.mxu0 %v7607_v40  ;;  %v7676_v3 = vld [vmem:[#allocation11 + $0x96c] ss:$24 sps:$4 sm:$0xff]   ;;  %v7671_v40 = vld [vmem:[#allocation11 + $0x960] ss:$24 sps:$4 sm:$0xff]  }
 0x68a   :  { %6148 = vmatprep.subr.bf16.mxu1 %v7610_v35  ;;  %v7674_v35 = vld [vmem:[#allocation11 + $0x968] ss:$24 sps:$4 sm:$0xff]  }
 0x68c   :  { %5985 = vmatpush1.bf16.msra.mxu0 %v7605_v9  ;;  %v7679_v9 = vld [vmem:[#allocation11 + $0x994] ss:$24 sps:$4 sm:$0xff]  }
 0x68d   :  { %6149 = vmatpush1.bf16.msra.mxu1 %v7608_v8  ;;  %5986 = vmatprep.subr.bf16.mxu0 %v7613_v5  ;;  %v7682_v8 = vld [vmem:[#allocation11 + $0x99c] ss:$24 sps:$4 sm:$0xff]   ;;  %v7677_v5 = vld [vmem:[#allocation11 + $0x990] ss:$24 sps:$4 sm:$0xff]  }
 0x68e   :  { %6150 = vmatprep.subr.bf16.mxu1 %v7616_v11  ;;  %v7680_v11 = vld [vmem:[#allocation11 + $0x998] ss:$24 sps:$4 sm:$0xff]  }
 0x690   :  { %5987 = vmatpush1.bf16.msra.mxu0 %v7611_v17  ;;  %v7685_v17 = vld [vmem:[#allocation11 + $0x9c4] ss:$24 sps:$4 sm:$0xff]  }
 0x691   :  { %6151 = vmatpush1.bf16.msra.mxu1 %v7614_v63  ;;  %5988 = vmatprep.subr.bf16.mxu0 %v7619_v0  ;;  %v7688_v63 = vld [vmem:[#allocation11 + $0x9cc] ss:$24 sps:$4 sm:$0xff]   ;;  %v7683_v0 = vld [vmem:[#allocation11 + $0x9c0] ss:$24 sps:$4 sm:$0xff]  }
 0x692   :  { %6152 = vmatprep.subr.bf16.mxu1 %v7622_v1  ;;  %v7686_v1 = vld [vmem:[#allocation11 + $0x9c8] ss:$24 sps:$4 sm:$0xff]  }
 0x694   :  { %5989 = vmatpush1.bf16.msra.mxu0 %v7617_v25  ;;  %v7691_v25 = vld [vmem:[#allocation11 + $0x9f4] ss:$24 sps:$4 sm:$0xff]  }
 0x695   :  { %6153 = vmatpush1.bf16.msra.mxu1 %v7620_v23  ;;  %5990 = vmatprep.subr.bf16.mxu0 %v7625_v27  ;;  %v7694_v23 = vld [vmem:[#allocation11 + $0x9fc] ss:$24 sps:$4 sm:$0xff]   ;;  %v7689_v27 = vld [vmem:[#allocation11 + $0x9f0] ss:$24 sps:$4 sm:$0xff]  }
 0x696   :  { %6154 = vmatprep.subr.bf16.mxu1 %v7628_v28  ;;  %v7692_v28 = vld [vmem:[#allocation11 + $0x9f8] ss:$24 sps:$4 sm:$0xff]  }
 0x698   :  { %5991 = vmatpush1.bf16.msra.mxu0 %v7623_v32  ;;  %v7697_v32 = vld [vmem:[#allocation11 + $0xa24] ss:$24 sps:$4 sm:$0xff]  }
 0x699   :  { %6155 = vmatpush1.bf16.msra.mxu1 %v7626_v34  ;;  %5992 = vmatprep.subr.bf16.mxu0 %v7631_v47  ;;  %v7700_v34 = vld [vmem:[#allocation11 + $0xa2c] ss:$24 sps:$4 sm:$0xff]   ;;  %v7695_v47 = vld [vmem:[#allocation11 + $0xa20] ss:$24 sps:$4 sm:$0xff]  }
 0x69a   :  { %6156 = vmatprep.subr.bf16.mxu1 %v7634_v49  ;;  %v7698_v49 = vld [vmem:[#allocation11 + $0xa28] ss:$24 sps:$4 sm:$0xff]  }
 0x69c   :  { %5993 = vmatpush1.bf16.msra.mxu0 %v7629_v52  ;;  %v7703_v52 = vld [vmem:[#allocation11 + $0xa54] ss:$24 sps:$4 sm:$0xff]  }
 0x69d   :  { %6157 = vmatpush1.bf16.msra.mxu1 %v7632_v21  ;;  %5994 = vmatprep.subr.bf16.mxu0 %v7637_v55  ;;  %v7706_v21 = vld [vmem:[#allocation11 + $0xa5c] ss:$24 sps:$4 sm:$0xff]   ;;  %v7701_v55 = vld [vmem:[#allocation11 + $0xa50] ss:$24 sps:$4 sm:$0xff]  }
 0x69e   :  { %6158 = vmatprep.subr.bf16.mxu1 %v7640_v41  ;;  %v7704_v41 = vld [vmem:[#allocation11 + $0xa58] ss:$24 sps:$4 sm:$0xff]  }
 0x6a0   :  { %5995 = vmatpush1.bf16.msra.mxu0 %v7635_v53  ;;  %v7709_v53 = vld [vmem:[#allocation11 + $0xa84] ss:$24 sps:$4 sm:$0xff]  }
 0x6a1   :  { %6159 = vmatpush1.bf16.msra.mxu1 %v7638_v24  ;;  %5996 = vmatprep.subr.bf16.mxu0 %v7643_v54  ;;  %v7712_v24 = vld [vmem:[#allocation11 + $0xa8c] ss:$24 sps:$4 sm:$0xff]   ;;  %v7707_v54 = vld [vmem:[#allocation11 + $0xa80] ss:$24 sps:$4 sm:$0xff]  }
 0x6a2   :  { %6160 = vmatprep.subr.bf16.mxu1 %v7646_v50  ;;  %v7710_v50 = vld [vmem:[#allocation11 + $0xa88] ss:$24 sps:$4 sm:$0xff]  }
 0x6a4   :  { %5997 = vmatpush1.bf16.msra.mxu0 %v7641_v36  ;;  %v7715_v36 = vld [vmem:[#allocation11 + $0xab4] ss:$24 sps:$4 sm:$0xff]  }
 0x6a5   :  { %6161 = vmatpush1.bf16.msra.mxu1 %v7644_v42  ;;  %5998 = vmatprep.subr.bf16.mxu0 %v7649_v29  ;;  %v7718_v42 = vld [vmem:[#allocation11 + $0xabc] ss:$24 sps:$4 sm:$0xff]   ;;  %v7713_v29 = vld [vmem:[#allocation11 + $0xab0] ss:$24 sps:$4 sm:$0xff]  }
 0x6a6   :  { %6162 = vmatprep.subr.bf16.mxu1 %v7652_v4  ;;  %v7716_v4 = vld [vmem:[#allocation11 + $0xab8] ss:$24 sps:$4 sm:$0xff]  }
 0x6a8   :  { %5999 = vmatpush1.bf16.msra.mxu0 %v7647_v37  ;;  %v7721_v37 = vld [vmem:[#allocation11 + $0xae4] ss:$24 sps:$4 sm:$0xff]  }
 0x6a9   :  { %6163 = vmatpush1.bf16.msra.mxu1 %v7650_v60  ;;  %6000 = vmatprep.subr.bf16.mxu0 %v7655_v44  ;;  %v7724_v60 = vld [vmem:[#allocation11 + $0xaec] ss:$24 sps:$4 sm:$0xff]   ;;  %v7719_v44 = vld [vmem:[#allocation11 + $0xae0] ss:$24 sps:$4 sm:$0xff]  }
 0x6aa   :  { %6164 = vmatprep.subr.bf16.mxu1 %v7658_v57  ;;  %v7722_v57 = vld [vmem:[#allocation11 + $0xae8] ss:$24 sps:$4 sm:$0xff]  }
 0x6ac   :  { %6001 = vmatpush1.bf16.msra.mxu0 %v7653_v20  ;;  %v7730_v20 = vld [vmem:[#allocation11 + $0xb1c] ss:$24 sps:$4 sm:$0xff]  }
 0x6ad   :  { %6165 = vmatpush1.bf16.msra.mxu1 %v7656_v16  ;;  %6011 = vmatprep.subr.bf16.mxu0 %v7661_v59  ;;  %v7728_v16 = vld [vmem:[#allocation11 + $0xb18] ss:$24 sps:$4 sm:$0xff]   ;;  %v7733_v59 = vld [vmem:[#allocation11 + $0xb44] ss:$24 sps:$4 sm:$0xff]  }
 0x6ae   :  { %6175 = vmatprep.subr.bf16.mxu1 %v7664_v33  ;;  %v7731_v33 = vld [vmem:[#allocation11 + $0xb40] ss:$24 sps:$4 sm:$0xff]  }
 0x6af   :  { %6003 = vmatmul.mubr.bf16.vlgmr.msra.gmra.mrb[12].mxu0 %v8640_v13 }
 0x6b0   :  { %6167 = vmatmul.mubr.bf16.vlgmr.msra.gmra.mrb[24].mxu1 %v8640_v13  ;;  %6012 = vmatpush1.bf16.msra.mxu0 %v7659_v62  ;;  %v7734_v62 = vld [vmem:[#allocation11 + $0xb48] ss:$24 sps:$4 sm:$0xff]  }
 0x6b1   :  { %6043 = vmatprep.mubr.bf16.mxu0 %v8643_v12  ;;  %6176 = vmatpush1.bf16.msra.mxu1 %v7662_v26  ;;  %v7742_v26 = vld [vmem:[#allocation11 + $0xb7c] ss:$24 sps:$4 sm:$0xff]  }
 0x6b2   :  { %6207 = vmatprep.mubr.bf16.mxu1 %v8643_v12  ;;  %6013 = vmatprep.subr.bf16.mxu0 %v7667_v15  ;;  %v7737_v15 = vld [vmem:[#allocation11 + $0xb70] ss:$24 sps:$4 sm:$0xff]  }
 0x6b3   :  { %6177 = vmatprep.subr.bf16.mxu1 %v7670_v14  ;;  %v7740_v14 = vld [vmem:[#allocation11 + $0xb78] ss:$24 sps:$4 sm:$0xff]  }
 0x6b4   :  { %6014 = vmatpush1.bf16.msra.mxu0 %v7665_v18  ;;  %v7745_v18 = vld [vmem:[#allocation11 + $0xba4] ss:$24 sps:$4 sm:$0xff]  }
 0x6b5   :  { %6178 = vmatpush1.bf16.msra.mxu1 %v7668_v6  ;;  %6015 = vmatprep.subr.bf16.mxu0 %v7673_v58  ;;  %v7748_v6 = vld [vmem:[#allocation11 + $0xbac] ss:$24 sps:$4 sm:$0xff]   ;;  %v7743_v58 = vld [vmem:[#allocation11 + $0xba0] ss:$24 sps:$4 sm:$0xff]  }
 0x6b6   :  { %6179 = vmatprep.subr.bf16.mxu1 %v7676_v3  ;;  %v7746_v3 = vld [vmem:[#allocation11 + $0xba8] ss:$24 sps:$4 sm:$0xff]  }
 0x6b8   :  { %6016 = vmatpush1.bf16.msra.mxu0 %v7671_v40  ;;  %v7751_v40 = vld [vmem:[#allocation11 + $0xbd4] ss:$24 sps:$4 sm:$0xff]  }
 0x6b9   :  { %6180 = vmatpush1.bf16.msra.mxu1 %v7674_v35  ;;  %6017 = vmatprep.subr.bf16.mxu0 %v7679_v9  ;;  %v7754_v35 = vld [vmem:[#allocation11 + $0xbdc] ss:$24 sps:$4 sm:$0xff]   ;;  %v3534_v9 = vmul.f32 0.2, %v8606_v7 }
 0x6ba   :  { %6181 = vmatprep.subr.bf16.mxu1 %v7682_v8  ;;  %v7749_v8 = vld [vmem:[#allocation11 + $0xbd0] ss:$24 sps:$4 sm:$0xff]  }
 0x6bc   :  { %6018 = vmatpush1.bf16.msra.mxu0 %v7677_v5  ;;  %v7752_v5 = vld [vmem:[#allocation11 + $0xbd8] ss:$24 sps:$4 sm:$0xff]  }
 0x6bd   :  { %6182 = vmatpush1.bf16.msra.mxu1 %v7680_v11  ;;  %6019 = vmatprep.subr.bf16.mxu0 %v7685_v17  ;;  %v7757_v11 = vld [vmem:[#allocation11 + $0x14] ss:$24 sps:$4 sm:$0xff]   ;;  %v3542_v17 = vsel %vm3526_vm0, %v8606_v7, %v3534_v9  ;;  %v7766_v7 = vld [vmem:[#allocation11 + $0xa4] ss:$24 sps:$4 sm:$0xff]   ;;  %v7827_v9 = vld [vmem:[#allocation11 + $0x490] ss:$24 sps:$4 sm:$0xff]  }
 0x6be   :  { %6183 = vmatprep.subr.bf16.mxu1 %v7688_v63  ;;  %v7755_v63 = vld [vmem:[#allocation11 + $0x10] ss:$24 sps:$4 sm:$0xff]  }
 0x6c0   :  { %6020 = vmatpush1.bf16.msra.mxu0 %v7683_v0  ;;  %v8651_v0 = vpack.c.bf16 %v3542_v17, %v3542_v17  ;;  %v7833_v17 = vld [vmem:[#allocation11 + $0x4f0] ss:$24 sps:$4 sm:$0xff]  }
 0x6c1   :  { %6184 = vmatpush1.bf16.msra.mxu1 %v7686_v1  ;;  %6021 = vmatprep.subr.bf16.mxu0 %v7691_v25  ;;  %v7760_v1 = vld [vmem:[#allocation11 + $0x44] ss:$24 sps:$4 sm:$0xff]   ;;  %v7758_v25 = vld [vmem:[#allocation11 + $0x40] ss:$24 sps:$4 sm:$0xff]  }
 0x6c2   :  { %6185 = vmatprep.subr.bf16.mxu1 %v7694_v23  ;;  %v7763_v23 = vld [vmem:[#allocation11 + $0x74] ss:$24 sps:$4 sm:$0xff]  }
 0x6c4   :  { %6022 = vmatpush1.bf16.msra.mxu0 %v7689_v27  ;;  %v7761_v27 = vld [vmem:[#allocation11 + $0x70] ss:$24 sps:$4 sm:$0xff]  }
 0x6c5   :  { %6186 = vmatpush1.bf16.msra.mxu1 %v7692_v28  ;;  %6023 = vmatprep.subr.bf16.mxu0 %v7697_v32  ;;  %v7764_v28 = vld [vmem:[#allocation11 + $0xa0] ss:$24 sps:$4 sm:$0xff]   ;;  %v7769_v32 = vld [vmem:[#allocation11 + $0xd4] ss:$24 sps:$4 sm:$0xff]  }
 0x6c6   :  { %6187 = vmatprep.subr.bf16.mxu1 %v7700_v34  ;;  %v7767_v34 = vld [vmem:[#allocation11 + $0xd0] ss:$24 sps:$4 sm:$0xff]  }
 0x6c8   :  { %6024 = vmatpush1.bf16.msra.mxu0 %v7695_v47  ;;  %v7772_v47 = vld [vmem:[#allocation11 + $0x104] ss:$24 sps:$4 sm:$0xff]  }
 0x6c9   :  { %6188 = vmatpush1.bf16.msra.mxu1 %v7698_v49  ;;  %6025 = vmatprep.subr.bf16.mxu0 %v7703_v52  ;;  %v7770_v49 = vld [vmem:[#allocation11 + $0x100] ss:$24 sps:$4 sm:$0xff]   ;;  %v7775_v52 = vld [vmem:[#allocation11 + $0x134] ss:$24 sps:$4 sm:$0xff]  }
 0x6ca   :  { %6189 = vmatprep.subr.bf16.mxu1 %v7706_v21  ;;  %v7778_v21 = vld [vmem:[#allocation11 + $0x164] ss:$24 sps:$4 sm:$0xff]  }
 0x6cc   :  { %6026 = vmatpush1.bf16.msra.mxu0 %v7701_v55  ;;  %v7776_v55 = vld [vmem:[#allocation11 + $0x160] ss:$24 sps:$4 sm:$0xff]  }
 0x6cd   :  { %6190 = vmatpush1.bf16.msra.mxu1 %v7704_v41  ;;  %6027 = vmatprep.subr.bf16.mxu0 %v7709_v53  ;;  %v7781_v41 = vld [vmem:[#allocation11 + $0x194] ss:$24 sps:$4 sm:$0xff]   ;;  %v7779_v53 = vld [vmem:[#allocation11 + $0x190] ss:$24 sps:$4 sm:$0xff]  }
 0x6ce   :  { %6191 = vmatprep.subr.bf16.mxu1 %v7712_v24  ;;  %v7784_v24 = vld [vmem:[#allocation11 + $0x1c4] ss:$24 sps:$4 sm:$0xff]  }
 0x6d0   :  { %6028 = vmatpush1.bf16.msra.mxu0 %v7707_v54  ;;  %v7782_v54 = vld [vmem:[#allocation11 + $0x1c0] ss:$24 sps:$4 sm:$0xff]  }
 0x6d1   :  { %6192 = vmatpush1.bf16.msra.mxu1 %v7710_v50  ;;  %6029 = vmatprep.subr.bf16.mxu0 %v7715_v36  ;;  %v7787_v50 = vld [vmem:[#allocation11 + $0x1f4] ss:$24 sps:$4 sm:$0xff]   ;;  %v7785_v36 = vld [vmem:[#allocation11 + $0x1f0] ss:$24 sps:$4 sm:$0xff]  }
 0x6d2   :  { %6193 = vmatprep.subr.bf16.mxu1 %v7718_v42  ;;  %v7790_v42 = vld [vmem:[#allocation11 + $0x224] ss:$24 sps:$4 sm:$0xff]  }
 0x6d4   :  { %6030 = vmatpush1.bf16.msra.mxu0 %v7713_v29  ;;  %v7788_v29 = vld [vmem:[#allocation11 + $0x220] ss:$24 sps:$4 sm:$0xff]  }
 0x6d5   :  { %6194 = vmatpush1.bf16.msra.mxu1 %v7716_v4  ;;  %6031 = vmatprep.subr.bf16.mxu0 %v7721_v37  ;;  %v7793_v4 = vld [vmem:[#allocation11 + $0x254] ss:$24 sps:$4 sm:$0xff]   ;;  %v7791_v37 = vld [vmem:[#allocation11 + $0x250] ss:$24 sps:$4 sm:$0xff]  }
 0x6d6   :  { %6195 = vmatprep.subr.bf16.mxu1 %v7724_v60  ;;  %v7796_v60 = vld [vmem:[#allocation11 + $0x284] ss:$24 sps:$4 sm:$0xff]  }
 0x6d8   :  { %6032 = vmatpush1.bf16.msra.mxu0 %v7719_v44  ;;  %v7794_v44 = vld [vmem:[#allocation11 + $0x280] ss:$24 sps:$4 sm:$0xff]  }
 0x6d9   :  { %6196 = vmatpush1.bf16.msra.mxu1 %v7722_v57  ;;  %6033 = vmatprep.subr.bf16.mxu0 %v7727_v45  ;;  %v7799_v57 = vld [vmem:[#allocation11 + $0x2b4] ss:$24 sps:$4 sm:$0xff]   ;;  %v7797_v45 = vld [vmem:[#allocation11 + $0x2b0] ss:$24 sps:$4 sm:$0xff]  }
 0x6da   :  { %6197 = vmatprep.subr.bf16.mxu1 %v7730_v20  ;;  %v7802_v20 = vld [vmem:[#allocation11 + $0x2e4] ss:$24 sps:$4 sm:$0xff]  }
 0x6dc   :  { %6034 = vmatpush1.bf16.msra.mxu0 %v7725_v43  ;;  %v7800_v43 = vld [vmem:[#allocation11 + $0x2e0] ss:$24 sps:$4 sm:$0xff]  }
 0x6dd   :  { %6198 = vmatpush1.bf16.msra.mxu1 %v7728_v16  ;;  %6035 = vmatprep.subr.bf16.mxu0 %v7733_v59  ;;  %v7805_v16 = vld [vmem:[#allocation11 + $0x314] ss:$24 sps:$4 sm:$0xff]   ;;  %v7803_v59 = vld [vmem:[#allocation11 + $0x310] ss:$24 sps:$4 sm:$0xff]  }
 0x6de   :  { %6199 = vmatprep.subr.bf16.mxu1 %v7736_v61  ;;  %v7808_v61 = vld [vmem:[#allocation11 + $0x344] ss:$24 sps:$4 sm:$0xff]  }
 0x6e0   :  { %6036 = vmatpush1.bf16.msra.mxu0 %v7731_v33  ;;  %v7806_v33 = vld [vmem:[#allocation11 + $0x340] ss:$24 sps:$4 sm:$0xff]  }
 0x6e1   :  { %6200 = vmatpush1.bf16.msra.mxu1 %v7734_v62  ;;  %6037 = vmatprep.subr.bf16.mxu0 %v7739_v2  ;;  %v7811_v62 = vld [vmem:[#allocation11 + $0x374] ss:$24 sps:$4 sm:$0xff]   ;;  %v7809_v2 = vld [vmem:[#allocation11 + $0x370] ss:$24 sps:$4 sm:$0xff]  }
 0x6e2   :  { %6201 = vmatprep.subr.bf16.mxu1 %v7742_v26  ;;  %v7814_v26 = vld [vmem:[#allocation11 + $0x3a4] ss:$24 sps:$4 sm:$0xff]  }
 0x6e4   :  { %6038 = vmatpush1.bf16.msra.mxu0 %v7737_v15  ;;  %v7812_v15 = vld [vmem:[#allocation11 + $0x3a0] ss:$24 sps:$4 sm:$0xff]  }
 0x6e5   :  { %6202 = vmatpush1.bf16.msra.mxu1 %v7740_v14  ;;  %6039 = vmatprep.subr.bf16.mxu0 %v7745_v18  ;;  %v7817_v14 = vld [vmem:[#allocation11 + $0x3d4] ss:$24 sps:$4 sm:$0xff]   ;;  %v7815_v18 = vld [vmem:[#allocation11 + $0x3d0] ss:$24 sps:$4 sm:$0xff]  }
 0x6e6   :  { %6203 = vmatprep.subr.bf16.mxu1 %v7748_v6  ;;  %v7820_v6 = vld [vmem:[#allocation11 + $0x404] ss:$24 sps:$4 sm:$0xff]  }
 0x6e8   :  { %6040 = vmatpush1.bf16.msra.mxu0 %v7743_v58  ;;  %v7823_v58 = vld [vmem:[#allocation11 + $0x434] ss:$24 sps:$4 sm:$0xff]  }
 0x6e9   :  { %6204 = vmatpush1.bf16.msra.mxu1 %v7746_v3  ;;  %6041 = vmatprep.subr.bf16.mxu0 %v7751_v40  ;;  %v7826_v3 = vld [vmem:[#allocation11 + $0x464] ss:$24 sps:$4 sm:$0xff]   ;;  %v7824_v40 = vld [vmem:[#allocation11 + $0x460] ss:$24 sps:$4 sm:$0xff]  }
 0x6ea   :  { %6205 = vmatprep.subr.bf16.mxu1 %v7754_v35  ;;  %v7829_v35 = vld [vmem:[#allocation11 + $0x494] ss:$24 sps:$4 sm:$0xff]  }
 0x6ec   :  { %6042 = vmatpush1.bf16.msra.mxu0 %v7749_v8  ;;  %v7832_v8 = vld [vmem:[#allocation11 + $0x4c4] ss:$24 sps:$4 sm:$0xff]  }
 0x6ed   :  { %6206 = vmatpush1.bf16.msra.mxu1 %v7752_v5  ;;  %6216 = vmatprep.subr.bf16.mxu0 %v7757_v11  ;;  %v7830_v5 = vld [vmem:[#allocation11 + $0x4c0] ss:$24 sps:$4 sm:$0xff]   ;;  %v7835_v11 = vld [vmem:[#allocation11 + $0x4f4] ss:$24 sps:$4 sm:$0xff]  }
 0x6ef   :  { %6044 = vmatmul.mubr.bf16.vlgmr.msra.gmra.mrb[12].mxu0 %v8651_v0 }
 0x6f0   :  { %6208 = vmatmul.mubr.bf16.vlgmr.msra.gmra.mrb[24].mxu1 %v8651_v0  ;;  %6217 = vmatpush1.bf16.msra.mxu0 %v7755_v63  ;;  %v7838_v63 = vld [vmem:[#allocation11 + $0x524] ss:$24 sps:$4 sm:$0xff]  }
 0x6f1   :  { %6248 = vmatprep.mubr.bf16.mxu0 %v8608_v10  ;;  %6218 = vmatprep.subr.bf16.mxu0 %v7760_v1  ;;  %v7773_v10 = vld [vmem:[#allocation11 + $0x130] ss:$24 sps:$4 sm:$0xff]   ;;  %v7836_v1 = vld [vmem:[#allocation11 + $0x520] ss:$24 sps:$4 sm:$0xff]  }
 0x6f4   :  { %6219 = vmatpush1.bf16.msra.mxu0 %v7758_v25  ;;  %v7841_v25 = vld [vmem:[#allocation11 + $0x554] ss:$24 sps:$4 sm:$0xff]  }
 0x6f5   :  { %6220 = vmatprep.subr.bf16.mxu0 %v7763_v23  ;;  %v7839_v23 = vld [vmem:[#allocation11 + $0x550] ss:$24 sps:$4 sm:$0xff]  }
 0x6f8   :  { %6221 = vmatpush1.bf16.msra.mxu0 %v7761_v27  ;;  %v7844_v27 = vld [vmem:[#allocation11 + $0x584] ss:$24 sps:$4 sm:$0xff]  }
 0x6f9   :  { %6222 = vmatprep.subr.bf16.mxu0 %v7766_v7  ;;  %v7842_v7 = vld [vmem:[#allocation11 + $0x580] ss:$24 sps:$4 sm:$0xff]  }
 0x6fc   :  { %6223 = vmatpush1.bf16.msra.mxu0 %v7764_v28  ;;  %v7847_v28 = vld [vmem:[#allocation11 + $0x5b4] ss:$24 sps:$4 sm:$0xff]  }
 0x6fd   :  { %6224 = vmatprep.subr.bf16.mxu0 %v7769_v32  ;;  %v7845_v32 = vld [vmem:[#allocation11 + $0x5b0] ss:$24 sps:$4 sm:$0xff]  }
 0x700   :  { %6225 = vmatpush1.bf16.msra.mxu0 %v7767_v34  ;;  %v7850_v34 = vld [vmem:[#allocation11 + $0x5e4] ss:$24 sps:$4 sm:$0xff]  }
 0x701   :  { %6226 = vmatprep.subr.bf16.mxu0 %v7772_v47  ;;  %v7848_v47 = vld [vmem:[#allocation11 + $0x5e0] ss:$24 sps:$4 sm:$0xff]  }
 0x704   :  { %6227 = vmatpush1.bf16.msra.mxu0 %v7770_v49  ;;  %v7853_v49 = vld [vmem:[#allocation11 + $0x614] ss:$24 sps:$4 sm:$0xff]  }
 0x705   :  { %6228 = vmatprep.subr.bf16.mxu0 %v7775_v52  ;;  %v7851_v52 = vld [vmem:[#allocation11 + $0x610] ss:$24 sps:$4 sm:$0xff]  }
 0x708   :  { %6229 = vmatpush1.bf16.msra.mxu0 %v7773_v10  ;;  %v7856_v10 = vld [vmem:[#allocation11 + $0x644] ss:$24 sps:$4 sm:$0xff]  }
 0x709   :  { %6230 = vmatprep.subr.bf16.mxu0 %v7778_v21  ;;  %v7854_v21 = vld [vmem:[#allocation11 + $0x640] ss:$24 sps:$4 sm:$0xff]  }
 0x70c   :  { %6231 = vmatpush1.bf16.msra.mxu0 %v7776_v55  ;;  %v7859_v55 = vld [vmem:[#allocation11 + $0x674] ss:$24 sps:$4 sm:$0xff]  }
 0x70d   :  { %6232 = vmatprep.subr.bf16.mxu0 %v7781_v41  ;;  %v7857_v41 = vld [vmem:[#allocation11 + $0x670] ss:$24 sps:$4 sm:$0xff]  }
 0x710   :  { %6233 = vmatpush1.bf16.msra.mxu0 %v7779_v53  ;;  %v7862_v53 = vld [vmem:[#allocation11 + $0x6a4] ss:$24 sps:$4 sm:$0xff]  }
 0x711   :  { %6234 = vmatprep.subr.bf16.mxu0 %v7784_v24  ;;  %v7860_v24 = vld [vmem:[#allocation11 + $0x6a0] ss:$24 sps:$4 sm:$0xff]  }
 0x714   :  { %6235 = vmatpush1.bf16.msra.mxu0 %v7782_v54  ;;  %v7865_v54 = vld [vmem:[#allocation11 + $0x6d4] ss:$24 sps:$4 sm:$0xff]  }
 0x715   :  { %6236 = vmatprep.subr.bf16.mxu0 %v7787_v50  ;;  %v7863_v50 = vld [vmem:[#allocation11 + $0x6d0] ss:$24 sps:$4 sm:$0xff]  }
 0x718   :  { %6237 = vmatpush1.bf16.msra.mxu0 %v7785_v36  ;;  %v7868_v36 = vld [vmem:[#allocation11 + $0x704] ss:$24 sps:$4 sm:$0xff]  }
 0x719   :  { %6238 = vmatprep.subr.bf16.mxu0 %v7790_v42  ;;  %v7871_v42 = vld [vmem:[#allocation11 + $0x734] ss:$24 sps:$4 sm:$0xff]  }
 0x71c   :  { %6239 = vmatpush1.bf16.msra.mxu0 %v7788_v29  ;;  %v7874_v29 = vld [vmem:[#allocation11 + $0x764] ss:$24 sps:$4 sm:$0xff]  }
 0x71d   :  { %6240 = vmatprep.subr.bf16.mxu0 %v7793_v4  ;;  %v7872_v4 = vld [vmem:[#allocation11 + $0x760] ss:$24 sps:$4 sm:$0xff]  }
 0x720   :  { %6241 = vmatpush1.bf16.msra.mxu0 %v7791_v37  ;;  %v7877_v37 = vld [vmem:[#allocation11 + $0x794] ss:$24 sps:$4 sm:$0xff]  }
 0x721   :  { %6242 = vmatprep.subr.bf16.mxu0 %v7796_v60  ;;  %v7875_v60 = vld [vmem:[#allocation11 + $0x790] ss:$24 sps:$4 sm:$0xff]  }
 0x724   :  { %6243 = vmatpush1.bf16.msra.mxu0 %v7794_v44  ;;  %v7880_v44 = vld [vmem:[#allocation11 + $0x7c4] ss:$24 sps:$4 sm:$0xff]  }
 0x725   :  { %6244 = vmatprep.subr.bf16.mxu0 %v7799_v57  ;;  %v7878_v57 = vld [vmem:[#allocation11 + $0x7c0] ss:$24 sps:$4 sm:$0xff]  }
 0x728   :  { %6245 = vmatpush1.bf16.msra.mxu0 %v7797_v45  ;;  %v7883_v45 = vld [vmem:[#allocation11 + $0x7f4] ss:$24 sps:$4 sm:$0xff]  }
 0x729   :  { %6246 = vmatprep.subr.bf16.mxu0 %v7802_v20  ;;  %v7881_v20 = vld [vmem:[#allocation11 + $0x7f0] ss:$24 sps:$4 sm:$0xff]  }
 0x72c   :  { %6247 = vmatpush1.bf16.msra.mxu0 %v7800_v43  ;;  %v7886_v43 = vld [vmem:[#allocation11 + $0x824] ss:$24 sps:$4 sm:$0xff]  }
 0x72d   :  { %6257 = vmatprep.subr.bf16.mxu0 %v7805_v16  ;;  %v7884_v16 = vld [vmem:[#allocation11 + $0x820] ss:$24 sps:$4 sm:$0xff]  }
 0x72f   :  { %6249 = vmatmul.mubr.bf16.vlgmr.msra.gmra.mrb[16].mxu0 %v8610_v19  ;;  %v7818_v19 = vld [vmem:[#allocation11 + $0x400] ss:$24 sps:$4 sm:$0xff]  }
 0x730   :  { %6258 = vmatpush1.bf16.msra.mxu0 %v7803_v59  ;;  %6289 = vmatprep.mubr.bf16.mxu0 %v8616_v22  ;;  %v7821_v22 = vld [vmem:[#allocation11 + $0x430] ss:$24 sps:$4 sm:$0xff]   ;;  %v7889_v59 = vld [vmem:[#allocation11 + $0x854] ss:$24 sps:$4 sm:$0xff]  }
 0x731   :  { %6259 = vmatprep.subr.bf16.mxu0 %v7808_v61  ;;  %v7887_v61 = vld [vmem:[#allocation11 + $0x850] ss:$24 sps:$4 sm:$0xff]  }
 0x734   :  { %6260 = vmatpush1.bf16.msra.mxu0 %v7806_v33  ;;  %v7892_v33 = vld [vmem:[#allocation11 + $0x884] ss:$24 sps:$4 sm:$0xff]  }
 0x735   :  { %6261 = vmatprep.subr.bf16.mxu0 %v7811_v62  ;;  %v7890_v62 = vld [vmem:[#allocation11 + $0x880] ss:$24 sps:$4 sm:$0xff]  }
 0x738   :  { %6262 = vmatpush1.bf16.msra.mxu0 %v7809_v2  ;;  %v7895_v2 = vld [vmem:[#allocation11 + $0x8b4] ss:$24 sps:$4 sm:$0xff]  }
 0x739   :  { %6263 = vmatprep.subr.bf16.mxu0 %v7814_v26  ;;  %v7893_v26 = vld [vmem:[#allocation11 + $0x8b0] ss:$24 sps:$4 sm:$0xff]  }
 0x73c   :  { %6264 = vmatpush1.bf16.msra.mxu0 %v7812_v15  ;;  %v7898_v15 = vld [vmem:[#allocation11 + $0x8e4] ss:$24 sps:$4 sm:$0xff]  }
 0x73d   :  { %6265 = vmatprep.subr.bf16.mxu0 %v7817_v14  ;;  %v7896_v14 = vld [vmem:[#allocation11 + $0x8e0] ss:$24 sps:$4 sm:$0xff]  }
 0x740   :  { %6266 = vmatpush1.bf16.msra.mxu0 %v7815_v18  ;;  %v7901_v18 = vld [vmem:[#allocation11 + $0x914] ss:$24 sps:$4 sm:$0xff]  }
 0x741   :  { %6267 = vmatprep.subr.bf16.mxu0 %v7820_v6  ;;  %v7899_v6 = vld [vmem:[#allocation11 + $0x910] ss:$24 sps:$4 sm:$0xff]  }
 0x744   :  { %6268 = vmatpush1.bf16.msra.mxu0 %v7818_v19  ;;  %v7904_v19 = vld [vmem:[#allocation11 + $0x944] ss:$24 sps:$4 sm:$0xff]  }
 0x745   :  { %6269 = vmatprep.subr.bf16.mxu0 %v7823_v58  ;;  %v7902_v58 = vld [vmem:[#allocation11 + $0x940] ss:$24 sps:$4 sm:$0xff]  }
 0x748   :  { %6270 = vmatpush1.bf16.msra.mxu0 %v7821_v22  ;;  %v7907_v22 = vld [vmem:[#allocation11 + $0x974] ss:$24 sps:$4 sm:$0xff]  }
 0x749   :  { %6271 = vmatprep.subr.bf16.mxu0 %v7826_v3  ;;  %v7905_v3 = vld [vmem:[#allocation11 + $0x970] ss:$24 sps:$4 sm:$0xff]  }
 0x74c   :  { %6272 = vmatpush1.bf16.msra.mxu0 %v7824_v40  ;;  %v7910_v40 = vld [vmem:[#allocation11 + $0x9a4] ss:$24 sps:$4 sm:$0xff]  }
 0x74d   :  { %6273 = vmatprep.subr.bf16.mxu0 %v7829_v35  ;;  %v7908_v35 = vld [vmem:[#allocation11 + $0x9a0] ss:$24 sps:$4 sm:$0xff]  }
 0x750   :  { %6274 = vmatpush1.bf16.msra.mxu0 %v7827_v9  ;;  %v7913_v9 = vld [vmem:[#allocation11 + $0x9d4] ss:$24 sps:$4 sm:$0xff]  }
 0x751   :  { %6275 = vmatprep.subr.bf16.mxu0 %v7832_v8  ;;  %v7911_v8 = vld [vmem:[#allocation11 + $0x9d0] ss:$24 sps:$4 sm:$0xff]  }
 0x754   :  { %6276 = vmatpush1.bf16.msra.mxu0 %v7830_v5  ;;  %v8662_v5 = vld [vmem:[#allocation13 + $0x2d] sm:$0x3f] }
 0x755   :  { %6277 = vmatprep.subr.bf16.mxu0 %v7835_v11  ;;  %v3949_v11 = vrot.slane %v8662_v5, %v8366_v30 }
 0x758   :  { %6278 = vmatpush1.bf16.msra.mxu0 %v7833_v17  ;;  %v3945_v17 = vrot.slane %v8662_v5, %v8304_v39 }
 0x759   :  { %6279 = vmatprep.subr.bf16.mxu0 %v7838_v63  ;;  %v7914_v63 = vld [vmem:[#allocation11 + $0xa00] ss:$24 sps:$4 sm:$0xff]  }
 0x75c   :  { %6280 = vmatpush1.bf16.msra.mxu0 %v7836_v1  ;;  %v3953_v1 = vrot.slane %v8662_v5, %v8369_v31 }
 0x75d   :  { %6281 = vmatprep.subr.bf16.mxu0 %v7841_v25  ;;  %v7919_v25 = vld [vmem:[#allocation11 + $0xa34] ss:$24 sps:$4 sm:$0xff]  }
 0x760   :  { %6282 = vmatpush1.bf16.msra.mxu0 %v7839_v23 }
 0x761   :  { %6283 = vmatprep.subr.bf16.mxu0 %v7844_v27 }
 0x764   :  { %6284 = vmatpush1.bf16.msra.mxu0 %v7842_v7 }
 0x765   :  { %6285 = vmatprep.subr.bf16.mxu0 %v7847_v28 }
 0x768   :  { %6286 = vmatpush1.bf16.msra.mxu0 %v7845_v32 }
 0x769   :  { %6287 = vmatprep.subr.bf16.mxu0 %v7850_v34 }
 0x76c   :  { %6288 = vmatpush1.bf16.msra.mxu0 %v7848_v47 }
 0x76d   :  { %6298 = vmatprep.subr.bf16.mxu0 %v7853_v49  ;;  %v7917_v49 = vld [vmem:[#allocation11 + $0xa30] ss:$24 sps:$4 sm:$0xff]  }
 0x76f   :  { %6290 = vmatmul.mubr.bf16.vlgmr.msra.gmra.mrb[16].mxu0 %v8626_v48  ;;  %v7866_v48 = vld [vmem:[#allocation11 + $0x700] ss:$24 sps:$4 sm:$0xff]  }
 0x770   :  { %6299 = vmatpush1.bf16.msra.mxu0 %v7851_v52  ;;  %6330 = vmatprep.mubr.bf16.mxu0 %v8628_v38  ;;  %v7869_v38 = vld [vmem:[#allocation11 + $0x730] ss:$24 sps:$4 sm:$0xff]  }
 0x771   :  { %6300 = vmatprep.subr.bf16.mxu0 %v7856_v10  ;;  %v7922_v10 = vld [vmem:[#allocation11 + $0xa64] ss:$24 sps:$4 sm:$0xff]  }
 0x774   :  { %6301 = vmatpush1.bf16.msra.mxu0 %v7854_v21  ;;  %v7920_v21 = vld [vmem:[#allocation11 + $0xa60] ss:$24 sps:$4 sm:$0xff]  }
 0x775   :  { %6302 = vmatprep.subr.bf16.mxu0 %v7859_v55  ;;  %v7925_v55 = vld [vmem:[#allocation11 + $0xa94] ss:$24 sps:$4 sm:$0xff]  }
 0x778   :  { %6303 = vmatpush1.bf16.msra.mxu0 %v7857_v41  ;;  %v7923_v41 = vld [vmem:[#allocation11 + $0xa90] ss:$24 sps:$4 sm:$0xff]  }
 0x779   :  { %6304 = vmatprep.subr.bf16.mxu0 %v7862_v53  ;;  %v7928_v53 = vld [vmem:[#allocation11 + $0xac4] ss:$24 sps:$4 sm:$0xff]  }
 0x77c   :  { %6305 = vmatpush1.bf16.msra.mxu0 %v7860_v24 }
 0x77d   :  { %6306 = vmatprep.subr.bf16.mxu0 %v7865_v54 }
 0x780   :  { %6307 = vmatpush1.bf16.msra.mxu0 %v7863_v50  ;;  %v7926_v50 = vld [vmem:[#allocation11 + $0xac0] ss:$24 sps:$4 sm:$0xff]  }
 0x781   :  { %6308 = vmatprep.subr.bf16.mxu0 %v7868_v36 }
 0x784   :  { %6309 = vmatpush1.bf16.msra.mxu0 %v7866_v48  ;;  %v7931_v48 = vld [vmem:[#allocation11 + $0xaf4] ss:$24 sps:$4 sm:$0xff]  }
 0x785   :  { %6310 = vmatprep.subr.bf16.mxu0 %v7871_v42 }
 0x788   :  { %6311 = vmatpush1.bf16.msra.mxu0 %v7869_v38  ;;  %v7929_v38 = vld [vmem:[#allocation11 + $0xaf0] ss:$24 sps:$4 sm:$0xff]  }
 0x789   :  { %6312 = vmatprep.subr.bf16.mxu0 %v7874_v29  ;;  %v7934_v29 = vld [vmem:[#allocation11 + $0xb24] ss:$24 sps:$4 sm:$0xff]  }
 0x78c   :  { %6313 = vmatpush1.bf16.msra.mxu0 %v7872_v4  ;;  %v7932_v4 = vld [vmem:[#allocation11 + $0xb20] ss:$24 sps:$4 sm:$0xff]  }
 0x78d   :  { %6314 = vmatprep.subr.bf16.mxu0 %v7877_v37  ;;  %v7937_v37 = vld [vmem:[#allocation11 + $0xb54] ss:$24 sps:$4 sm:$0xff]  }
 0x790   :  { %6315 = vmatpush1.bf16.msra.mxu0 %v7875_v60  ;;  %v7935_v60 = vld [vmem:[#allocation11 + $0xb50] ss:$24 sps:$4 sm:$0xff]  }
 0x791   :  { %6316 = vmatprep.subr.bf16.mxu0 %v7880_v44  ;;  %v7940_v44 = vld [vmem:[#allocation11 + $0xb84] ss:$24 sps:$4 sm:$0xff]  }
 0x794   :  { %6317 = vmatpush1.bf16.msra.mxu0 %v7878_v57  ;;  %v7938_v57 = vld [vmem:[#allocation11 + $0xb80] ss:$24 sps:$4 sm:$0xff]  }
 0x795   :  { %6318 = vmatprep.subr.bf16.mxu0 %v7883_v45  ;;  %v7943_v45 = vld [vmem:[#allocation11 + $0xbb4] ss:$24 sps:$4 sm:$0xff]  }
 0x798   :  { %6319 = vmatpush1.bf16.msra.mxu0 %v7881_v20  ;;  %v7941_v20 = vld [vmem:[#allocation11 + $0xbb0] ss:$24 sps:$4 sm:$0xff]  }
 0x799   :  { %6320 = vmatprep.subr.bf16.mxu0 %v7886_v43  ;;  %v7946_v43 = vld [vmem:[#allocation11 + $0xbe4] ss:$24 sps:$4 sm:$0xff]  }
 0x79c   :  { %6321 = vmatpush1.bf16.msra.mxu0 %v7884_v16  ;;  %v7944_v16 = vld [vmem:[#allocation11 + $0xbe0] ss:$24 sps:$4 sm:$0xff]  }
 0x79d   :  { %6322 = vmatprep.subr.bf16.mxu0 %v7889_v59  ;;  %v3957_v59 = vrot.slane %v8662_v5, %v8502_v46 }
 0x7a0   :  { %6323 = vmatpush1.bf16.msra.mxu0 %v7887_v61  ;;  %v3961_v61 = vrot.slane %v8662_v5, %v8505_v51 }
 0x7a1   :  { %6324 = vmatprep.subr.bf16.mxu0 %v7892_v33 }
 0x7a4   :  { %6325 = vmatpush1.bf16.msra.mxu0 %v7890_v62 }
 0x7a5   :  { %6326 = vmatprep.subr.bf16.mxu0 %v7895_v2 }
 0x7a8   :  { %6327 = vmatpush1.bf16.msra.mxu0 %v7893_v26 }
 0x7a9   :  { %6328 = vmatprep.subr.bf16.mxu0 %v7898_v15 }
 0x7ac   :  { %6329 = vmatpush1.bf16.msra.mxu0 %v7896_v14 }
 0x7ad   :  { %6339 = vmatprep.subr.bf16.mxu0 %v7901_v18 }
 0x7af   :  { %6331 = vmatmul.mubr.bf16.vlgmr.msra.gmra.mrb[16].mxu0 %v8640_v13  ;;  %v7916_v13 = vld [vmem:[#allocation11 + $0xa04] ss:$24 sps:$4 sm:$0xff]  }
 0x7b0   :  { %6340 = vmatpush1.bf16.msra.mxu0 %v7899_v6  ;;  %6371 = vmatprep.mubr.bf16.mxu0 %v8643_v12  ;;  %v3941_v12 = vrot.slane %v8662_v5, %v8299_v56 }
 0x7b1   :  { %6341 = vmatprep.subr.bf16.mxu0 %v7904_v19 }
 0x7b4   :  { %6342 = vmatpush1.bf16.msra.mxu0 %v7902_v58 }
 0x7b5   :  { %6343 = vmatprep.subr.bf16.mxu0 %v7907_v22 }
 0x7b8   :  { %6344 = vmatpush1.bf16.msra.mxu0 %v7905_v3 }
 0x7b9   :  { %6345 = vmatprep.subr.bf16.mxu0 %v7910_v40 }
 0x7bc   :  { %6346 = vmatpush1.bf16.msra.mxu0 %v7908_v35 }
 0x7bd   :  { %6347 = vmatprep.subr.bf16.mxu0 %v7913_v9 }
 0x7c0   :  { %6348 = vmatpush1.bf16.msra.mxu0 %v7911_v8 }
 0x7c1   :  { %6349 = vmatprep.subr.bf16.mxu0 %v7916_v13 }
 0x7c2   :  { %v6045_v23 = vpop.f32.mrb[12].mxu0 }
 0x7c3   :  { %v7168_v27 = vadd.f32 %v6045_v23, %v3941_v12  ;;  %v6209_v7 = vpop.f32.mrb[24].mxu1  ;;  %v6047_v28 = vpop.f32.mrb[13].mxu0 }
 0x7c4   :  { %v7170_v32 = vadd.f32 %v6209_v7, %v3949_v11  ;;  %v7169_v34 = vadd.f32 %v6047_v28, %v3945_v17  ;;  %v6211_v56 = vpop.f32.mrb[25].mxu1  ;;  %v6049_v47 = vpop.f32.mrb[14].mxu0  ;;  %6350 = vmatpush1.bf16.msra.mxu0 %v7914_v63 }
 0x7c5   :  { %7977 = vtanh.f32 %v7168_v27  ;;  %v7171_v30 = vadd.f32 %v6211_v56, %v3953_v1  ;;  %v6213_v52 = vpop.f32.mrb[26].mxu1  ;;  %v6050_v39 = vpop.f32.mrb[15].mxu0  ;;  %6351 = vmatprep.subr.bf16.mxu0 %v7919_v25 }
 0x7c6   :  { %7979 = vtanh.f32 %v7170_v32  ;;  %v6214_v31 = vpop.f32.mrb[27].mxu1 }
 0x7c7   :  { %7981 = vtanh.f32 %v7169_v34 }
 0x7c8   :  { %7983 = vtanh.f32 %v7171_v30  ;;  %6352 = vmatpush1.bf16.msra.mxu0 %v7917_v49 }
 0x7c9   :  { %6353 = vmatprep.subr.bf16.mxu0 %v7922_v10 }
 0x7cc   :  { %6354 = vmatpush1.bf16.msra.mxu0 %v7920_v21 }
 0x7cd   :  { %6355 = vmatprep.subr.bf16.mxu0 %v7925_v55 }
 0x7cf   :  { %v7978_v24 = vpop.eup %7977 }
 0x7d0   :  { %v7980_v54 = vpop.eup %7979  ;;  %6386 = vst [vmem:[%s8702_s7] sm:$0xff] %v7978_v24  ;;  %6356 = vmatpush1.bf16.msra.mxu0 %v7923_v41 }
 0x7d1   :  { %v7982_v36 = vpop.eup %7981  ;;  %6388 = vst [vmem:[%s8702_s7 + $0x10] sm:$0xff] %v7980_v54  ;;  %6357 = vmatprep.subr.bf16.mxu0 %v7928_v53 }
 0x7d2   :  { %v7984_v42 = vpop.eup %7983  ;;  %6387 = vst [vmem:[%s8702_s7 + $0x8] sm:$0xff] %v7982_v36 }
 0x7d3   :  { %6389 = vst [vmem:[%s8702_s7 + $0x18] sm:$0xff] %v7984_v42 }
 0x7d4   :  { %6358 = vmatpush1.bf16.msra.mxu0 %v7926_v50 }
 0x7d5   :  { %6359 = vmatprep.subr.bf16.mxu0 %v7931_v48 }
 0x7d8   :  { %6360 = vmatpush1.bf16.msra.mxu0 %v7929_v38 }
 0x7d9   :  { %6361 = vmatprep.subr.bf16.mxu0 %v7934_v29 }
 0x7dc   :  { %6362 = vmatpush1.bf16.msra.mxu0 %v7932_v4 }
 0x7dd   :  { %6363 = vmatprep.subr.bf16.mxu0 %v7937_v37 }
 0x7e0   :  { %6364 = vmatpush1.bf16.msra.mxu0 %v7935_v60 }
 0x7e1   :  { %6365 = vmatprep.subr.bf16.mxu0 %v7940_v44 }
 0x7e4   :  { %6366 = vmatpush1.bf16.msra.mxu0 %v7938_v57 }
 0x7e5   :  { %6367 = vmatprep.subr.bf16.mxu0 %v7943_v45 }
 0x7e8   :  { %6368 = vmatpush1.bf16.msra.mxu0 %v7941_v20 }
 0x7e9   :  { %6369 = vmatprep.subr.bf16.mxu0 %v7946_v43 }
 0x7ec   :  { %6370 = vmatpush1.bf16.msra.mxu0 %v7944_v16 }
 0x7ef   :  { %6372 = vmatmul.mubr.bf16.vlgmr.msra.gmra.mrb[16].mxu0 %v8651_v0 }
 0x8c2   :  { %v6373_v33 = vpop.f32.mrb[16].mxu0 }
 0x8c3   :  { %v7172_v62 = vadd.f32 %v6373_v33, %v3957_v59  ;;  %v6375_v2 = vpop.f32.mrb[17].mxu0 }
 0x8c4   :  { %v7173_v26 = vadd.f32 %v6375_v2, %v3961_v61  ;;  %v6377_v15 = vpop.f32.mrb[18].mxu0 }
 0x8c5   :  { %7985 = vtanh.f32 %v7172_v62  ;;  %v6378_v14 = vpop.f32.mrb[19].mxu0 }
 0x8c6   :  { %7987 = vtanh.f32 %v7173_v26 }
 0x8cf   :  { %v7986_v18 = vpop.eup %7985 }
 0x8d0   :  { %v7988_v6 = vpop.eup %7987  ;;  %6390 = vst [vmem:[%s8702_s7 + $0x20] sm:$0xff] %v7986_v18 }
 0x8d1   :  { %6391 = vst [vmem:[%s8702_s7 + $0x28] sm:$0xff] %v7988_v6 }
 0x8d2   :  { %6396 = vsyncpa [#allocation4], 1 }
 0x8d3   :  { %6397 = vsyncpa [#allocation6], 1 }
 0x8d4   :  { %6398 = vsyncpa [#allocation9], 1 }
 0x8d5   :  { %6399 = vsyncpa [#allocation12], 1 }

</bundles_post_ra>
